<compile_context>
chip_gen: v5e
topology: v5e:2x2
jax: 0.10.0
libtpu: 0.0.40
codegen_flags: <defaults>
</compile_context>

<pallas_src>
import functools

import jax
import jax.numpy as jnp
from jax.experimental import pallas as pl
from jax.experimental.pallas import tpu as pltpu


# ----------------------------------------------------------------------------
# Fused Pallas kernel: conv1 -> conv2 -> normalize -> dot-product decode
# ----------------------------------------------------------------------------
def _daegc_fused_kernel(x_ref, adj_ref, m_ref,
                        w1_ref, a1s_ref, a1n_ref,
                        w2_ref, a2s_ref, a2n_ref,
                        a_pred_ref, z_ref, *, alpha):
    x = x_ref[...].astype(jnp.float32)
    adj = adj_ref[...].astype(jnp.float32)
    M = m_ref[...].astype(jnp.float32)
    neg_big = jnp.float32(-9e15)
    slope = jnp.float32(alpha)

    def gat_layer(h_in, W, a_self_row, a_neigh_row):
        # h = h_in @ W                                            (N, D), f32 MXU
        h = jnp.dot(h_in, W.astype(jnp.float32),
                    preferred_element_type=jnp.float32)

        # Attention scores as VPU multiply + cross-lane (XLU) reduction.
        # Avoids two lane-width-1 MXU matvecs and the (N,1)->(1,N) transpose:
        # the neighbor score is built directly in row orientation.
        s_self = jnp.sum(h * a_self_row.astype(jnp.float32),
                         axis=1, keepdims=True)                   # (N, 1)
        s_neigh = jnp.sum(h * a_neigh_row.astype(jnp.float32),
                          axis=1)                                 # (N,)
        attn = (s_self + s_neigh.reshape(1, -1)) * M              # (N, N)

        # LeakyReLU with negative slope = alpha (f32 VPU).
        attn = jnp.where(attn > 0.0, attn, slope * attn)

        # Masked softmax over rows (axis=1), all in f32.
        logits = jnp.where(adj > 0.0, attn, neg_big)
        logits = logits - jnp.max(logits, axis=1, keepdims=True)
        e = jnp.exp(logits)
        p = e * pl.reciprocal(jnp.sum(e, axis=1, keepdims=True), approx=True)

        # attention @ h on the MXU with bf16 operands, f32 accumulation.
        h_prime = jnp.dot(p.astype(jnp.bfloat16), h.astype(jnp.bfloat16),
                          preferred_element_type=jnp.float32)

        # ELU: clamp the exp argument so the discarded positive branch never
        # produces inf (jnp.where evaluates both sides).
        return jnp.where(h_prime > 0.0, h_prime,
                         jnp.exp(jnp.minimum(h_prime, 0.0)) - 1.0)

    h1 = gat_layer(x, w1_ref[...], a1s_ref[...], a1n_ref[...])    # (N, hidden)
    h2 = gat_layer(h1, w2_ref[...], a2s_ref[...], a2n_ref[...])   # (N, emb)

    # z = L2-normalize(h2, dim=1). F.normalize uses eps=1e-12 on the norm, so
    # clamp the squared norm at 1e-24 and use rsqrt (EUP) instead of sqrt+div.
    norm_sq = jnp.sum(h2 * h2, axis=1, keepdims=True)
    z = h2 * jax.lax.rsqrt(jnp.maximum(norm_sq, jnp.float32(1e-24)))

    # A_pred = sigmoid(z @ z^T): contract the last dims of both operands
    # directly (no explicit transpose), bf16 MXU operands, f32 accumulation.
    zb = z.astype(jnp.bfloat16)
    logits = jax.lax.dot_general(zb, zb, (((1,), (1,)), ((), ())),
                                 preferred_element_type=jnp.float32)
    a_pred_ref[...] = jax.nn.sigmoid(logits).astype(a_pred_ref.dtype)
    z_ref[...] = z.astype(z_ref.dtype)


# ----------------------------------------------------------------------------
# Wrapper (single fused pallas_call; whole arrays resident in VMEM)
# ----------------------------------------------------------------------------
def daegc_forward(params, x, adj, M, alpha):
    N = x.shape[0]
    emb = params["W2"].shape[1]
    vmem = pl.BlockSpec(memory_space=pltpu.MemorySpace.VMEM)
    kernel = functools.partial(_daegc_fused_kernel, alpha=float(alpha))
    return pl.pallas_call(
        kernel,
        out_shape=(jax.ShapeDtypeStruct((N, N), jnp.float32),
                   jax.ShapeDtypeStruct((N, emb), jnp.float32)),
        in_specs=[vmem] * 9,
        out_specs=(vmem, vmem),
        compiler_params=pltpu.CompilerParams(
            vmem_limit_bytes=48 * 1024 * 1024),  # safe on v5e/v6e/v7x
    )(x, adj, M,
      params["W1"],
      params["a_self1"].reshape(1, -1),   # (1, hidden) lane-aligned row vectors
      params["a_neigh1"].reshape(1, -1),
      params["W2"],
      params["a_self2"].reshape(1, -1),
      params["a_neigh2"].reshape(1, -1))


# ----------------------------------------------------------------------------
# Parameter init (xavier_uniform_, gain=1.414 — matches the DAEGC layer init)
# ----------------------------------------------------------------------------
def xavier_uniform(key, shape, gain=1.414):
    fan_in, fan_out = shape[0], shape[1]
    bound = gain * jnp.sqrt(6.0 / (fan_in + fan_out))
    return jax.random.uniform(key, shape, jnp.float32, -bound, bound)


def init_daegc_params(key, num_features, hidden_size, embedding_size):
    ks = jax.random.split(key, 6)
    return {
        "W1": xavier_uniform(ks[0], (num_features, hidden_size)),
        "a_self1": xavier_uniform(ks[1], (hidden_size, 1)),
        "a_neigh1": xavier_uniform(ks[2], (hidden_size, 1)),
        "W2": xavier_uniform(ks[3], (hidden_size, embedding_size)),
        "a_self2": xavier_uniform(ks[4], (embedding_size, 1)),
        "a_neigh2": xavier_uniform(ks[5], (embedding_size, 1)),
    }


# ----------------------------------------------------------------------------
# Main
# ----------------------------------------------------------------------------
if __name__ == "__main__":
    N = 128              # number of graph nodes (multiple of 128 -> lane-dense)
    num_features = 32
    hidden_size = 16
    embedding_size = 8
    alpha = 0.2

    key = jax.random.PRNGKey(0)
    k_x, k_adj, k_m, k_p = jax.random.split(key, 4)

    x = jax.random.normal(k_x, (N, num_features), jnp.float32)
    # symmetric binary adjacency with self-loops
    a = (jax.random.uniform(k_adj, (N, N)) < 0.2).astype(jnp.float32)
    adj = jnp.clip(a + a.T + jnp.eye(N, dtype=jnp.float32), 0.0, 1.0)
    # M: transition/proximity matrix (dense float), same shape as adj
    M = jax.random.uniform(k_m, (N, N), jnp.float32)

    params = init_daegc_params(k_p, num_features, hidden_size, embedding_size)

    fwd = jax.jit(functools.partial(daegc_forward, alpha=alpha))
    A_pred, z = fwd(params, x, adj, M)
    jax.block_until_ready((A_pred, z))

    assert A_pred.shape == (N, N) and z.shape == (N, embedding_size)
    assert bool(jnp.all(jnp.isfinite(A_pred))) and bool(jnp.all(jnp.isfinite(z)))
    assert bool(jnp.all((A_pred >= 0.0) & (A_pred <= 1.0)))
    # z rows should be (approximately) unit-norm after F.normalize semantics
    row_norms = jnp.sqrt(jnp.sum(z * z, axis=1))
    assert bool(jnp.all(jnp.abs(row_norms - 1.0) < 1e-3))
    print("KERNEL_OK")
</pallas_src>

<mosaic_0001>
module attributes {stable_mosaic.version = 11 : i64} {
  func.func @_daegc_fused_kernel(%arg0: memref<128x32xf32, #tpu.memory_space<vmem>>, %arg1: memref<128x128xf32, #tpu.memory_space<vmem>>, %arg2: memref<128x128xf32, #tpu.memory_space<vmem>>, %arg3: memref<32x16xf32, #tpu.memory_space<vmem>>, %arg4: memref<1x16xf32, #tpu.memory_space<vmem>>, %arg5: memref<1x16xf32, #tpu.memory_space<vmem>>, %arg6: memref<16x8xf32, #tpu.memory_space<vmem>>, %arg7: memref<1x8xf32, #tpu.memory_space<vmem>>, %arg8: memref<1x8xf32, #tpu.memory_space<vmem>>, %arg9: memref<128x128xf32, #tpu.memory_space<vmem>>, %arg10: memref<128x8xf32, #tpu.memory_space<vmem>>) attributes {dimension_semantics = [], scalar_prefetch = 0 : i64, scratch_operands = 0 : i64, tpu.core_type = #tpu.core_type<tc>} {
    %c0 = arith.constant 0 : index
    %c0_0 = arith.constant 0 : index
    %0 = vector.load %arg0[%c0, %c0_0] : memref<128x32xf32, #tpu.memory_space<vmem>>, vector<128x32xf32>
    %c0_1 = arith.constant 0 : index
    %c0_2 = arith.constant 0 : index
    %1 = vector.load %arg1[%c0_1, %c0_2] : memref<128x128xf32, #tpu.memory_space<vmem>>, vector<128x128xf32>
    %c0_3 = arith.constant 0 : index
    %c0_4 = arith.constant 0 : index
    %2 = vector.load %arg2[%c0_3, %c0_4] : memref<128x128xf32, #tpu.memory_space<vmem>>, vector<128x128xf32>
    %c0_5 = arith.constant 0 : index
    %c0_6 = arith.constant 0 : index
    %3 = vector.load %arg3[%c0_5, %c0_6] : memref<32x16xf32, #tpu.memory_space<vmem>>, vector<32x16xf32>
    %c0_7 = arith.constant 0 : index
    %c0_8 = arith.constant 0 : index
    %4 = vector.load %arg4[%c0_7, %c0_8] : memref<1x16xf32, #tpu.memory_space<vmem>>, vector<1x16xf32>
    %c0_9 = arith.constant 0 : index
    %c0_10 = arith.constant 0 : index
    %5 = vector.load %arg5[%c0_9, %c0_10] : memref<1x16xf32, #tpu.memory_space<vmem>>, vector<1x16xf32>
    %cst = arith.constant dense<0.000000e+00> : vector<128x16xf32>
    %6 = tpu.matmul %0, %3, %cst {dimension_numbers = #tpu.dot_dimension_numbers<[1], [0], [0], [1], [0, 0, 1, 1], [], []>} : vector<128x32xf32>, vector<32x16xf32>, vector<128x16xf32> -> vector<128x16xf32>
    %7 = vector.broadcast %4 : vector<1x16xf32> to vector<128x16xf32>
    %8 = arith.mulf %6, %7 : vector<128x16xf32>
    %cst_11 = arith.constant dense<0.000000e+00> : vector<128xf32>
    %9 = vector.multi_reduction <add>, %8, %cst_11 [1] : vector<128x16xf32> to vector<128xf32>
    %10 = vector.shape_cast %9 : vector<128xf32> to vector<128x1xf32>
    %11 = vector.broadcast %5 : vector<1x16xf32> to vector<128x16xf32>
    %12 = arith.mulf %6, %11 : vector<128x16xf32>
    %cst_12 = arith.constant dense<0.000000e+00> : vector<128xf32>
    %13 = vector.multi_reduction <add>, %12, %cst_12 [1] : vector<128x16xf32> to vector<128xf32>
    %14 = vector.shape_cast %13 : vector<128xf32> to vector<1x128xf32>
    %15 = vector.broadcast %10 : vector<128x1xf32> to vector<128x128xf32>
    %16 = vector.broadcast %14 : vector<1x128xf32> to vector<128x128xf32>
    %17 = arith.addf %15, %16 : vector<128x128xf32>
    %18 = arith.mulf %17, %2 : vector<128x128xf32>
    %cst_13 = arith.constant 0.000000e+00 : f32
    %19 = vector.broadcast %cst_13 : f32 to vector<128x128xf32>
    %20 = arith.cmpf ogt, %18, %19 : vector<128x128xf32>
    %cst_14 = arith.constant 2.000000e-01 : f32
    %21 = vector.broadcast %cst_14 : f32 to vector<128x128xf32>
    %22 = arith.mulf %21, %18 : vector<128x128xf32>
    %23 = arith.select %20, %18, %22 : vector<128x128xi1>, vector<128x128xf32>
    %cst_15 = arith.constant 0.000000e+00 : f32
    %24 = vector.broadcast %cst_15 : f32 to vector<128x128xf32>
    %25 = arith.cmpf ogt, %1, %24 : vector<128x128xf32>
    %cst_16 = arith.constant -9.000000e+15 : f32
    %26 = vector.broadcast %cst_16 : f32 to vector<128x128xf32>
    %27 = arith.select %25, %23, %26 : vector<128x128xi1>, vector<128x128xf32>
    %cst_17 = arith.constant dense<0xFF800000> : vector<128xf32>
    %28 = vector.multi_reduction <maximumf>, %27, %cst_17 [1] : vector<128x128xf32> to vector<128xf32>
    %29 = vector.shape_cast %28 : vector<128xf32> to vector<128x1xf32>
    %30 = vector.broadcast %29 : vector<128x1xf32> to vector<128x128xf32>
    %31 = arith.subf %27, %30 : vector<128x128xf32>
    %32 = math.exp %31 : vector<128x128xf32>
    %cst_18 = arith.constant dense<0.000000e+00> : vector<128xf32>
    %33 = vector.multi_reduction <add>, %32, %cst_18 [1] : vector<128x128xf32> to vector<128xf32>
    %34 = vector.shape_cast %33 : vector<128xf32> to vector<128x1xf32>
    %35 = tpu.reciprocal %34 {approx = true} : vector<128x1xf32> -> vector<128x1xf32>
    %36 = vector.broadcast %35 : vector<128x1xf32> to vector<128x128xf32>
    %37 = arith.mulf %32, %36 : vector<128x128xf32>
    %38 = arith.truncf %37 : vector<128x128xf32> to vector<128x128xbf16>
    %39 = arith.truncf %6 : vector<128x16xf32> to vector<128x16xbf16>
    %cst_19 = arith.constant dense<0.000000e+00> : vector<128x16xf32>
    %40 = tpu.matmul %38, %39, %cst_19 {dimension_numbers = #tpu.dot_dimension_numbers<[1], [0], [0], [1], [0, 0, 1, 1], [], []>} : vector<128x128xbf16>, vector<128x16xbf16>, vector<128x16xf32> -> vector<128x16xf32>
    %cst_20 = arith.constant 0.000000e+00 : f32
    %41 = vector.broadcast %cst_20 : f32 to vector<128x16xf32>
    %42 = arith.cmpf ogt, %40, %41 : vector<128x16xf32>
    %cst_21 = arith.constant 0.000000e+00 : f32
    %43 = vector.broadcast %cst_21 : f32 to vector<128x16xf32>
    %44 = arith.minimumf %40, %43 : vector<128x16xf32>
    %45 = math.exp %44 : vector<128x16xf32>
    %cst_22 = arith.constant 1.000000e+00 : f32
    %46 = vector.broadcast %cst_22 : f32 to vector<128x16xf32>
    %47 = arith.subf %45, %46 : vector<128x16xf32>
    %48 = arith.select %42, %40, %47 : vector<128x16xi1>, vector<128x16xf32>
    %c0_23 = arith.constant 0 : index
    %c0_24 = arith.constant 0 : index
    %49 = vector.load %arg6[%c0_23, %c0_24] : memref<16x8xf32, #tpu.memory_space<vmem>>, vector<16x8xf32>
    %c0_25 = arith.constant 0 : index
    %c0_26 = arith.constant 0 : index
    %50 = vector.load %arg7[%c0_25, %c0_26] : memref<1x8xf32, #tpu.memory_space<vmem>>, vector<1x8xf32>
    %c0_27 = arith.constant 0 : index
    %c0_28 = arith.constant 0 : index
    %51 = vector.load %arg8[%c0_27, %c0_28] : memref<1x8xf32, #tpu.memory_space<vmem>>, vector<1x8xf32>
    %cst_29 = arith.constant dense<0.000000e+00> : vector<128x8xf32>
    %52 = tpu.matmul %48, %49, %cst_29 {dimension_numbers = #tpu.dot_dimension_numbers<[1], [0], [0], [1], [0, 0, 1, 1], [], []>} : vector<128x16xf32>, vector<16x8xf32>, vector<128x8xf32> -> vector<128x8xf32>
    %53 = vector.broadcast %50 : vector<1x8xf32> to vector<128x8xf32>
    %54 = arith.mulf %52, %53 : vector<128x8xf32>
    %cst_30 = arith.constant dense<0.000000e+00> : vector<128xf32>
    %55 = vector.multi_reduction <add>, %54, %cst_30 [1] : vector<128x8xf32> to vector<128xf32>
    %56 = vector.shape_cast %55 : vector<128xf32> to vector<128x1xf32>
    %57 = vector.broadcast %51 : vector<1x8xf32> to vector<128x8xf32>
    %58 = arith.mulf %52, %57 : vector<128x8xf32>
    %cst_31 = arith.constant dense<0.000000e+00> : vector<128xf32>
    %59 = vector.multi_reduction <add>, %58, %cst_31 [1] : vector<128x8xf32> to vector<128xf32>
    %60 = vector.shape_cast %59 : vector<128xf32> to vector<1x128xf32>
    %61 = vector.broadcast %56 : vector<128x1xf32> to vector<128x128xf32>
    %62 = vector.broadcast %60 : vector<1x128xf32> to vector<128x128xf32>
    %63 = arith.addf %61, %62 : vector<128x128xf32>
    %64 = arith.mulf %63, %2 : vector<128x128xf32>
    %cst_32 = arith.constant 0.000000e+00 : f32
    %65 = vector.broadcast %cst_32 : f32 to vector<128x128xf32>
    %66 = arith.cmpf ogt, %64, %65 : vector<128x128xf32>
    %cst_33 = arith.constant 2.000000e-01 : f32
    %67 = vector.broadcast %cst_33 : f32 to vector<128x128xf32>
    %68 = arith.mulf %67, %64 : vector<128x128xf32>
    %69 = arith.select %66, %64, %68 : vector<128x128xi1>, vector<128x128xf32>
    %cst_34 = arith.constant 0.000000e+00 : f32
    %70 = vector.broadcast %cst_34 : f32 to vector<128x128xf32>
    %71 = arith.cmpf ogt, %1, %70 : vector<128x128xf32>
    %cst_35 = arith.constant -9.000000e+15 : f32
    %72 = vector.broadcast %cst_35 : f32 to vector<128x128xf32>
    %73 = arith.select %71, %69, %72 : vector<128x128xi1>, vector<128x128xf32>
    %cst_36 = arith.constant dense<0xFF800000> : vector<128xf32>
    %74 = vector.multi_reduction <maximumf>, %73, %cst_36 [1] : vector<128x128xf32> to vector<128xf32>
    %75 = vector.shape_cast %74 : vector<128xf32> to vector<128x1xf32>
    %76 = vector.broadcast %75 : vector<128x1xf32> to vector<128x128xf32>
    %77 = arith.subf %73, %76 : vector<128x128xf32>
    %78 = math.exp %77 : vector<128x128xf32>
    %cst_37 = arith.constant dense<0.000000e+00> : vector<128xf32>
    %79 = vector.multi_reduction <add>, %78, %cst_37 [1] : vector<128x128xf32> to vector<128xf32>
    %80 = vector.shape_cast %79 : vector<128xf32> to vector<128x1xf32>
    %81 = tpu.reciprocal %80 {approx = true} : vector<128x1xf32> -> vector<128x1xf32>
    %82 = vector.broadcast %81 : vector<128x1xf32> to vector<128x128xf32>
    %83 = arith.mulf %78, %82 : vector<128x128xf32>
    %84 = arith.truncf %83 : vector<128x128xf32> to vector<128x128xbf16>
    %85 = arith.truncf %52 : vector<128x8xf32> to vector<128x8xbf16>
    %cst_38 = arith.constant dense<0.000000e+00> : vector<128x8xf32>
    %86 = tpu.matmul %84, %85, %cst_38 {dimension_numbers = #tpu.dot_dimension_numbers<[1], [0], [0], [1], [0, 0, 1, 1], [], []>} : vector<128x128xbf16>, vector<128x8xbf16>, vector<128x8xf32> -> vector<128x8xf32>
    %cst_39 = arith.constant 0.000000e+00 : f32
    %87 = vector.broadcast %cst_39 : f32 to vector<128x8xf32>
    %88 = arith.cmpf ogt, %86, %87 : vector<128x8xf32>
    %cst_40 = arith.constant 0.000000e+00 : f32
    %89 = vector.broadcast %cst_40 : f32 to vector<128x8xf32>
    %90 = arith.minimumf %86, %89 : vector<128x8xf32>
    %91 = math.exp %90 : vector<128x8xf32>
    %cst_41 = arith.constant 1.000000e+00 : f32
    %92 = vector.broadcast %cst_41 : f32 to vector<128x8xf32>
    %93 = arith.subf %91, %92 : vector<128x8xf32>
    %94 = arith.select %88, %86, %93 : vector<128x8xi1>, vector<128x8xf32>
    %95 = arith.mulf %94, %94 : vector<128x8xf32>
    %cst_42 = arith.constant dense<0.000000e+00> : vector<128xf32>
    %96 = vector.multi_reduction <add>, %95, %cst_42 [1] : vector<128x8xf32> to vector<128xf32>
    %97 = vector.shape_cast %96 : vector<128xf32> to vector<128x1xf32>
    %cst_43 = arith.constant 1.000000e-24 : f32
    %98 = vector.broadcast %cst_43 : f32 to vector<128x1xf32>
    %99 = arith.maximumf %97, %98 : vector<128x1xf32>
    %100 = math.rsqrt %99 : vector<128x1xf32>
    %101 = vector.broadcast %100 : vector<128x1xf32> to vector<128x8xf32>
    %102 = arith.mulf %94, %101 : vector<128x8xf32>
    %103 = arith.truncf %102 : vector<128x8xf32> to vector<128x8xbf16>
    %cst_44 = arith.constant dense<0.000000e+00> : vector<128x128xf32>
    %104 = tpu.matmul %103, %103, %cst_44 {dimension_numbers = #tpu.dot_dimension_numbers<[1], [1], [0], [0], [0, 0, 1, 0], [], []>} : vector<128x8xbf16>, vector<128x8xbf16>, vector<128x128xf32> -> vector<128x128xf32>
    %105 = arith.negf %104 : vector<128x128xf32>
    %106 = math.exp %105 : vector<128x128xf32>
    %cst_45 = arith.constant 1.000000e+00 : f32
    %107 = vector.broadcast %cst_45 : f32 to vector<128x128xf32>
    %108 = arith.addf %107, %106 : vector<128x128xf32>
    %109 = arith.divf %107, %108 : vector<128x128xf32>
    %c0_46 = arith.constant 0 : index
    %c0_47 = arith.constant 0 : index
    %110 = vector.load %arg9[%c0_46, %c0_47] : memref<128x128xf32, #tpu.memory_space<vmem>>, vector<128x128xf32>
    tpu.vector_store %arg9[%c0_46, %c0_47], %109 {strides = array<i32>} : memref<128x128xf32, #tpu.memory_space<vmem>>, vector<128x128xf32>,
    %c0_48 = arith.constant 0 : index
    %c0_49 = arith.constant 0 : index
    %111 = vector.load %arg10[%c0_48, %c0_49] : memref<128x8xf32, #tpu.memory_space<vmem>>, vector<128x8xf32>
    tpu.vector_store %arg10[%c0_48, %c0_49], %102 {strides = array<i32>} : memref<128x8xf32, #tpu.memory_space<vmem>>, vector<128x8xf32>,
    return
  }
}

</mosaic_0001>

<bundles_post_ra>
// kernel: daegc_forward.1
= control target key start
LH: loop header
LB: loop body
LE: loop exit
PB: predicated region body
PF: predicated region fallthrough
CT: control target
= control target key end

     0   :  { %16 = vsyncpa [#allocation3], 0  ;;  %s4092_s0 = inlined_call_operand.vmem [shape: f32[128,32], index: 0, kind: input, shape index: {}]   ;;  %s4093_s1 = inlined_call_operand.vmem [shape: f32[128,128], index: 1, kind: input, shape index: {}]   ;;  %s4094_s2 = inlined_call_operand.hbm [shape: f32[128,128], index: 2, kind: input, shape index: {}]   ;;  %s4095_s3 = inlined_call_operand.vmem [shape: f32[32,16], index: 3, kind: input, shape index: {}]   ;;  %s4096_s4 = inlined_call_operand.vmem [shape: f32[1,16], index: 4, kind: input, shape index: {}]   ;;  %s4097_s5 = inlined_call_operand.vmem [shape: f32[1,16], index: 5, kind: input, shape index: {}]   ;;  %s4098_s6 = inlined_call_operand.vmem [shape: f32[16,8], index: 6, kind: input, shape index: {}]   ;;  %s4099_s7 = inlined_call_operand.vmem [shape: f32[1,8], index: 7, kind: input, shape index: {}]   ;;  %s4100_s8 = inlined_call_operand.vmem [shape: f32[1,8], index: 8, kind: input, shape index: {}]   ;;  %s4101_s9 = inlined_call_operand.hbm [shape: f32[128,128], index: 9, kind: output, shape index: {0}]   ;;  %s4102_s10 = inlined_call_operand.vmem [shape: f32[128,8], index: 10, kind: output, shape index: {1}]  }
   0x1   :  { %17 = vsyncpa [#allocation4], 0  ;;  %s26_s15 = sshll.u32 %s4094_s2, 4  ;;  %s2730_s16 = smov [#allocation2]   ;;  %s27_s15 = int_to_ptr.hbm [resolvable:$true] %s26_s15 }
   0x2   :  { %s28_s17 = sshll.u32 %s2730_s16, 4  ;;  %s2731_s18 = smov 128   ;;  %s29_s17 = int_to_ptr.vmem [resolvable:$true] %s28_s17 }
   0x3   :  { %s2732_s19 = smov 8  }
   0x4   :  { %34 = dma.hbm_to_vmem [thread:$0]  %s27_s15, 2048, %s29_s17, [#allocation3], %s2731_s18, %s2731_s18, %s2732_s19  }
   0x5   :  { %2726 = dma.done.wait [#allocation3], 2048  }
   0x6   :  { %2727 = vsyncadd [#allocation3], 4294965248  ;;  %v102_v0 = vld [vmem:[%s4095_s3 + $0x18] sm:$0xff]  ;;  %v101_v1 = vld [vmem:[%s4095_s3 + $0x10] sm:$0xff]  ;;  %vm105_vm0 = vcmask 261120   ;;  %vm238_vm1 = vcmask 130048  }
   0x7   :  { %166 = vmatpush.msra.mxu0 %v102_v0  ;;  %v100_v2 = vld [vmem:[%s4095_s3 + $0x8] sm:$0xff]  ;;  %v99_v3 = vld [vmem:[%s4095_s3] sm:$0xff]  ;;  %v53_v6 = vld [vmem:[%s4092_s0 + $0x10] sm:$0xff]  ;;  %vm375_vm2 = vcmask 130112   ;;  %vm379_vm3 = vcmask 195712   ;;  %vm383_vm4 = vcmask 261312  }
   0x8   :  { %v51_v4 = vld [vmem:[%s4092_s0] sm:$0xff]  ;;  %v52_v5 = vld [vmem:[%s4092_s0 + $0x8] sm:$0xff]  ;;  %v54_v7 = vld [vmem:[%s4092_s0 + $0x18] sm:$0xff]  ;;  %vm387_vm5 = vcmask 326912   ;;  %vm391_vm6 = vcmask 392512   ;;  %vm395_vm7 = vcmask 458112  }
   0x9   :  { %167 = vmatpush.msra.mxu0 %v101_v1  ;;  %v55_v8 = vld [vmem:[%s4092_s0 + $0x20] sm:$0xff]  ;;  %v56_v9 = vld [vmem:[%s4092_s0 + $0x28] sm:$0xff]  ;;  %v57_v10 = vld [vmem:[%s4092_s0 + $0x30] sm:$0xff]  ;;  %vm399_vm8 = vcmask 523712   ;;  %vm403_vm9 = vcmask 589312   ;;  %vm407_vm10 = vcmask 654912  }
   0xa   :  { %v58_v11 = vld [vmem:[%s4092_s0 + $0x38] sm:$0xff]  ;;  %v59_v12 = vld [vmem:[%s4092_s0 + $0x40] sm:$0xff]  ;;  %v60_v13 = vld [vmem:[%s4092_s0 + $0x48] sm:$0xff]  ;;  %vm4108_vm11 = vcmask 720512   ;;  %vm4107_vm12 = vcmask 786112   ;;  %vm4106_vm13 = vcmask 851712  }
   0xb   :  { %168 = vmatpush.msra.mxu0 %v100_v2  ;;  %v61_v14 = vld [vmem:[%s4092_s0 + $0x50] sm:$0xff]  ;;  %v62_v15 = vld [vmem:[%s4092_s0 + $0x58] sm:$0xff]  ;;  %v63_v16 = vld [vmem:[%s4092_s0 + $0x60] sm:$0xff]  ;;  %vm4105_vm14 = vcmask 917312   ;;  %vm4104_vm15 = vcmask 982912  }
   0xc   :  { %v64_v17 = vld [vmem:[%s4092_s0 + $0x68] sm:$0xff]  ;;  %v65_v18 = vld [vmem:[%s4092_s0 + $0x70] sm:$0xff]  ;;  %v66_v19 = vld [vmem:[%s4092_s0 + $0x78] sm:$0xff]  ;;  %s2249_s0 = sshll.u32 %s4101_s9, 4  ;;  %s2250_s0 = int_to_ptr.hbm [resolvable:$true] %s2249_s0 }
   0xd   :  { %169 = vmatpush.msra.mxu0 %v99_v3  ;;  %v2874_v20 = vld [vmem:[%s4097_s5] ss:$0 sm:$0xff] }
   0xe   :  { %2266 = vmatmul.msk.f32.vlgmr.msra.gmra.mxu0 %vm105_vm0, %v51_v4  ;;  %v2957_v3 = vld [vmem:[%s4096_s4] ss:$0 sm:$0xff] }
  0x16   :  { %2267 = vmatmul.msk.f32.gmra.mxu0 %vm105_vm0, %v52_v5 }
  0x1e   :  { %2268 = vmatmul.msk.f32.gmra.mxu0 %vm105_vm0, %v53_v6 }
  0x26   :  { %2269 = vmatmul.msk.f32.gmra.mxu0 %vm105_vm0, %v54_v7 }
  0x2e   :  { %2270 = vmatmul.msk.f32.gmra.mxu0 %vm105_vm0, %v55_v8 }
  0x36   :  { %2271 = vmatmul.msk.f32.gmra.mxu0 %vm105_vm0, %v56_v9 }
  0x3e   :  { %2272 = vmatmul.msk.f32.gmra.mxu0 %vm105_vm0, %v57_v10 }
  0x46   :  { %2273 = vmatmul.msk.f32.gmra.mxu0 %vm105_vm0, %v58_v11 }
  0x4e   :  { %2274 = vmatmul.msk.f32.gmra.mxu0 %vm105_vm0, %v59_v12 }
  0x56   :  { %2275 = vmatmul.msk.f32.gmra.mxu0 %vm105_vm0, %v60_v13 }
  0x5e   :  { %2276 = vmatmul.msk.f32.gmra.mxu0 %vm105_vm0, %v61_v14 }
  0x66   :  { %2277 = vmatmul.msk.f32.gmra.mxu0 %vm105_vm0, %v62_v15 }
  0x6e   :  { %2278 = vmatmul.msk.f32.gmra.mxu0 %vm105_vm0, %v63_v16 }
  0x76   :  { %2279 = vmatmul.msk.f32.gmra.mxu0 %vm105_vm0, %v64_v17 }
  0x7e   :  { %2280 = vmatmul.msk.f32.gmra.mxu0 %vm105_vm0, %v65_v18 }
  0x86   :  { %2281 = vmatmul.msk.f32.gmra.mxu0 %vm105_vm0, %v66_v19  ;;  %vm4103_vm0 = vcmask 1048512  }
  0x8b   :  { %v2876_v21 = vpop.f32.mrf.mxu0 }
  0x8c   :  { %v290_v22 = vmul.f32 %v2874_v20, %v2876_v21  ;;  %v222_v4 = vmul.f32 %v2957_v3, %v2876_v21 }
  0x8e   :  { %v306_v23 = vsel %vm238_vm1, %v290_v22, 0.0  ;;  %v239_v7 = vsel %vm238_vm1, %v222_v4, 0.0 }
  0x8f   :  { %307 = vadd.xlane.f32.xlu0 %v306_v23 }
  0x93   :  { %v2881_v24 = vpop.f32.mrf.mxu0 }
  0x94   :  { %v291_v25 = vmul.f32 %v2874_v20, %v2881_v24  ;;  %v710_v26 = vpack.c.bf16 %v2881_v24, %v2876_v21  ;;  %v223_v10 = vmul.f32 %v2957_v3, %v2881_v24 }
  0x96   :  { %v309_v27 = vsel %vm238_vm1, %v291_v25, 0.0  ;;  %v242_v15 = vsel %vm238_vm1, %v223_v10, 0.0 }
  0x97   :  { %310 = vadd.xlane.f32.xlu0 %v309_v27 }
  0x9b   :  { %v2888_v28 = vpop.f32.mrf.mxu0 }
  0x9c   :  { %v292_v29 = vmul.f32 %v2874_v20, %v2888_v28 }
  0x9e   :  { %v312_v30 = vsel %vm238_vm1, %v292_v29, 0.0 }
  0x9f   :  { %313 = vadd.xlane.f32.xlu1 %v312_v30 }
  0xa3   :  { %v2893_v31 = vpop.f32.mrf.mxu0 }
  0xa4   :  { %v293_v32 = vmul.f32 %v2874_v20, %v2893_v31  ;;  %v711_v33 = vpack.c.bf16 %v2893_v31, %v2888_v28  ;;  %v225_v9 = vmul.f32 %v2957_v3, %v2893_v31 }
  0xa6   :  { %v315_v34 = vsel %vm238_vm1, %v293_v32, 0.0  ;;  %v248_v14 = vsel %vm238_vm1, %v225_v9, 0.0 }
  0xa7   :  { %316 = vadd.xlane.f32.xlu1 %v315_v34 }
  0xab   :  { %v2900_v35 = vpop.f32.mrf.mxu0 }
  0xac   :  { %v294_v36 = vmul.f32 %v2874_v20, %v2900_v35  ;;  %v226_v19 = vmul.f32 %v2957_v3, %v2900_v35 }
  0xae   :  { %v318_v37 = vsel %vm238_vm1, %v294_v36, 0.0  ;;  %v251_v25 = vsel %vm238_vm1, %v226_v19, 0.0 }
  0xaf   :  { %319 = vadd.xlane.f32.xlu2 %v318_v37 }
  0xb3   :  { %v2905_v38 = vpop.f32.mrf.mxu0 }
  0xb4   :  { %v295_v39 = vmul.f32 %v2874_v20, %v2905_v38  ;;  %v712_v40 = vpack.c.bf16 %v2905_v38, %v2900_v35  ;;  %v227_v32 = vmul.f32 %v2957_v3, %v2905_v38 }
  0xb6   :  { %v321_v41 = vsel %vm238_vm1, %v295_v39, 0.0  ;;  %v254_v36 = vsel %vm238_vm1, %v227_v32, 0.0 }
  0xb7   :  { %322 = vadd.xlane.f32.xlu2 %v321_v41 }
  0xbb   :  { %v2912_v42 = vpop.f32.mrf.mxu0 }
  0xbc   :  { %v296_v43 = vmul.f32 %v2874_v20, %v2912_v42  ;;  %v228_v18 = vmul.f32 %v2957_v3, %v2912_v42 }
  0xbe   :  { %v324_v44 = vsel %vm238_vm1, %v296_v43, 0.0  ;;  %v257_v23 = vsel %vm238_vm1, %v228_v18, 0.0 }
  0xbf   :  { %325 = vadd.xlane.f32.xlu0 %v324_v44 }
  0xc3   :  { %v2917_v45 = vpop.f32.mrf.mxu0 }
  0xc4   :  { %v297_v46 = vmul.f32 %v2874_v20, %v2917_v45  ;;  %v713_v47 = vpack.c.bf16 %v2917_v45, %v2912_v42  ;;  %v229_v30 = vmul.f32 %v2957_v3, %v2917_v45  ;;  %v370_v45 = vlaneseq }
  0xc6   :  { %v327_v48 = vsel %vm238_vm1, %v297_v46, 0.0  ;;  %v260_v34 = vsel %vm238_vm1, %v229_v30, 0.0 }
  0xc7   :  { %328 = vadd.xlane.f32.xlu1 %v327_v48 }
  0xcb   :  { %v2924_v49 = vpop.f32.mrf.mxu0 }
  0xcc   :  { %v298_v50 = vmul.f32 %v2874_v20, %v2924_v49  ;;  %v230_v37 = vmul.f32 %v2957_v3, %v2924_v49 }
  0xce   :  { %v330_v51 = vsel %vm238_vm1, %v298_v50, 0.0  ;;  %v263_v39 = vsel %vm238_vm1, %v230_v37, 0.0 }
  0xcf   :  { %331 = vadd.xlane.f32.xlu2 %v330_v51 }
  0xd3   :  { %v2929_v52 = vpop.f32.mrf.mxu0 }
  0xd4   :  { %v299_v53 = vmul.f32 %v2874_v20, %v2929_v52  ;;  %v714_v29 = vpack.c.bf16 %v2929_v52, %v2924_v49 }
  0xd6   :  { %v333_v54 = vsel %vm238_vm1, %v299_v53, 0.0 }
  0xd7   :  { %334 = vadd.xlane.f32.xlu0 %v333_v54 }
  0xdb   :  { %v2934_v55 = vpop.f32.mrf.mxu0 }
  0xdc   :  { %v300_v56 = vmul.f32 %v2874_v20, %v2934_v55 }
  0xde   :  { %v336_v57 = vsel %vm238_vm1, %v300_v56, 0.0 }
  0xdf   :  { %337 = vadd.xlane.f32.xlu1 %v336_v57 }
  0xe3   :  { %v2939_v58 = vpop.f32.mrf.mxu0 }
  0xe4   :  { %v301_v59 = vmul.f32 %v2874_v20, %v2939_v58  ;;  %v715_v22 = vpack.c.bf16 %v2939_v58, %v2934_v55 }
  0xe6   :  { %v339_v60 = vsel %vm238_vm1, %v301_v59, 0.0 }
  0xe7   :  { %340 = vadd.xlane.f32.xlu2 %v339_v60 }
  0xeb   :  { %v2944_v61 = vpop.f32.mrf.mxu0 }
  0xec   :  { %v302_v62 = vmul.f32 %v2874_v20, %v2944_v61 }
  0xee   :  { %v342_v63 = vsel %vm238_vm1, %v302_v62, 0.0 }
  0xef   :  { %343 = vadd.xlane.f32.xlu0 %v342_v63 }
  0xf3   :  { %v2949_v0 = vpop.f32.mrf.mxu0 }
  0xf4   :  { %v303_v1 = vmul.f32 %v2874_v20, %v2949_v0  ;;  %v716_v17 = vpack.c.bf16 %v2949_v0, %v2944_v61 }
  0xf6   :  { %v345_v2 = vsel %vm238_vm1, %v303_v1, 0.0 }
  0xf7   :  { %346 = vadd.xlane.f32.xlu1 %v345_v2 }
  0xfb   :  { %v2961_v5 = vpop.f32.mrf.mxu0 }
  0xfc   :  { %v304_v6 = vmul.f32 %v2874_v20, %v2961_v5 }
  0xfe   :  { %v348_v8 = vsel %vm238_vm1, %v304_v6, 0.0 }
  0xff   :  { %240 = vadd.xlane.f32.xlu1 %v239_v7  ;;  %349 = vadd.xlane.f32.xlu2 %v348_v8 }
 0x102   :  { %v308_v43 = vpop.xlane.xlu0 %307 }
 0x103   :  { %v2971_v11 = vpop.f32.mrf.mxu0 }
 0x104   :  { %v717_v12 = vpack.c.bf16 %v2971_v11, %v2961_v5  ;;  %v305_v13 = vmul.f32 %v2874_v20, %v2971_v11  ;;  %v224_v20 = vmul.f32 %v2957_v3, %v2888_v28  ;;  %v3016_v28 = vand.u32 127, %v370_v45 }
 0x106   :  { %718 = vmatpush.bf16.msra.mxu1 %v717_v12  ;;  %v351_v16 = vsel %vm238_vm1, %v305_v13, 0.0  ;;  %v245_v27 = vsel %vm238_vm1, %v224_v20, 0.0  ;;  %v3019_v31 = vadd.s32 4294967288, %v3016_v28  ;;  %v3025_v21 = vadd.s32 4294967272, %v3016_v28 }
 0x107   :  { %249 = vadd.xlane.f32.xlu1 %v248_v14  ;;  %243 = vadd.xlane.f32.xlu2 %v242_v15  ;;  %v3030_v49 = vadd.s32 4294967264, %v3016_v28  ;;  %v3034_v53 = vadd.s32 4294967256, %v3016_v28  ;;  %v3038_v56 = vadd.s32 4294967248, %v3016_v28  ;;  %v372_v57 = vperm.slane %v308_v43, %v3016_v28 }
 0x108   :  { %352 = vadd.xlane.f32.xlu0 %v351_v16  ;;  %v3043_v60 = vadd.s32 4294967240, %v3016_v28  ;;  %v3047_v63 = vadd.s32 4294967232, %v3016_v28  ;;  %v3052_v4 = vadd.s32 4294967224, %v3016_v28  ;;  %v3057_v8 = vadd.s32 4294967216, %v3016_v28 }
 0x109   :  { %v3062_v12 = vadd.s32 4294967208, %v3016_v28  ;;  %v3067_v16 = vadd.s32 4294967200, %v3016_v28  ;;  %v3072_v20 = vadd.s32 4294967192, %v3016_v28 }
 0x10a   :  { %719 = vmatpush.bf16.msra.mxu1 %v716_v17 }
 0x10e   :  { %720 = vmatpush.bf16.msra.mxu1 %v715_v22 }
 0x10f   :  { %258 = vadd.xlane.f32.xlu1 %v257_v23  ;;  %252 = vadd.xlane.f32.xlu2 %v251_v25 }
 0x110   :  { %246 = vadd.xlane.f32.xlu0 %v245_v27  ;;  %v3077_v27 = vadd.s32 4294967184, %v3016_v28 }
 0x112   :  { %721 = vmatpush.bf16.msra.mxu1 %v714_v29  ;;  %v314_v41 = vpop.xlane.xlu1 %313 }
 0x116   :  { %722 = vmatpush.bf16.msra.mxu1 %v713_v47 }
 0x117   :  { %261 = vadd.xlane.f32.xlu2 %v260_v34 }
 0x118   :  { %255 = vadd.xlane.f32.xlu0 %v254_v36 }
 0x11a   :  { %723 = vmatpush.bf16.msra.mxu1 %v712_v40  ;;  %v317_v44 = vpop.xlane.xlu1 %316  ;;  %v311_v40 = vpop.xlane.xlu0 %310 }
 0x11b   :  { %v374_v51 = vperm.slane %v311_v40, %v3019_v31  ;;  %v382_v59 = vperm.slane %v317_v44, %v3025_v21 }
 0x11d   :  { %v376_v1 = vsel %vm375_vm2, %v374_v51, %v372_v57  ;;  %v3102_v51 = vld [vmem:[%s4093_s1 + $0x18] sm:$0xff] }
 0x11e   :  { %724 = vmatpush.bf16.msra.mxu1 %v711_v33  ;;  %v3022_v33 = vadd.s32 4294967280, %v3016_v28 }
 0x11f   :  { %264 = vadd.xlane.f32.xlu2 %v263_v39  ;;  %v3087_v39 = vadd.s32 4294967176, %v3016_v28 }
 0x120   :  { %v378_v54 = vperm.slane %v314_v41, %v3022_v33 }
 0x122   :  { %725 = vmatpush.bf16.msra.mxu1 %v710_v26  ;;  %v320_v42 = vpop.xlane.xlu2 %319  ;;  %v380_v6 = vsel %vm379_vm3, %v378_v54, %v376_v1 }
 0x123   :  { %v386_v62 = vperm.slane %v320_v42, %v3030_v49  ;;  %v384_v9 = vsel %vm383_vm4, %v382_v59, %v380_v6 }
 0x125   :  { %v388_v14 = vsel %vm387_vm5, %v386_v62, %v384_v9  ;;  %v3110_v62 = vld [vmem:[%s4093_s1 + $0x8] sm:$0xff] }
 0x12a   :  { %v323_v35 = vpop.xlane.xlu2 %322 }
 0x12b   :  { %v390_v2 = vperm.slane %v323_v35, %v3034_v53 }
 0x12d   :  { %v392_v18 = vsel %vm391_vm6, %v390_v2, %v388_v14  ;;  %v85_v14 = vld [vmem:[#allocation2 + $0x10] sm:$0xff] }
 0x132   :  { %v326_v48 = vpop.xlane.xlu0 %325 }
 0x133   :  { %v394_v7 = vperm.slane %v326_v48, %v3038_v56 }
 0x135   :  { %v396_v23 = vsel %vm395_vm7, %v394_v7, %v392_v18  ;;  %v87_v7 = vld [vmem:[#allocation2 + $0x20] sm:$0xff] }
 0x13a   :  { %v329_v38 = vpop.xlane.xlu1 %328 }
 0x13b   :  { %v398_v10 = vperm.slane %v329_v38, %v3043_v60 }
 0x13d   :  { %v400_v29 = vsel %vm399_vm8, %v398_v10, %v396_v23  ;;  %v3116_v10 = vld [vmem:[%s4093_s1] sm:$0xff] }
 0x142   :  { %v332_v46 = vpop.xlane.xlu2 %331 }
 0x143   :  { %v402_v15 = vperm.slane %v332_v46, %v3047_v63 }
 0x145   :  { %v404_v32 = vsel %vm403_vm9, %v402_v15, %v400_v29 }
 0x14a   :  { %v335_v50 = vpop.xlane.xlu0 %334 }
 0x14b   :  { %v406_v19 = vperm.slane %v335_v50, %v3052_v4  ;;  %v83_v50 = vld [vmem:[#allocation2] sm:$0xff] }
 0x14d   :  { %v408_v36 = vsel %vm407_vm10, %v406_v19, %v404_v32 }
 0x152   :  { %v338_v47 = vpop.xlane.xlu1 %337 }
 0x153   :  { %v410_v25 = vperm.slane %v338_v47, %v3057_v8 }
 0x155   :  { %v412_v41 = vsel %vm4108_vm11, %v410_v25, %v408_v36  ;;  %vm526_vm11 = vcmp.gt.f32.partialorder %v3116_v10, 0.0 }
 0x15a   :  { %v341_v24 = vpop.xlane.xlu2 %340 }
 0x15b   :  { %v414_v30 = vperm.slane %v341_v24, %v3062_v12  ;;  %v86_v24 = vld [vmem:[#allocation2 + $0x18] sm:$0xff] }
 0x15d   :  { %v416_v43 = vsel %vm4107_vm12, %v414_v30, %v412_v41 }
 0x162   :  { %v344_v17 = vpop.xlane.xlu0 %343 }
 0x163   :  { %v418_v34 = vperm.slane %v344_v17, %v3067_v16 }
 0x165   :  { %v420_v35 = vsel %vm4106_vm13, %v418_v34, %v416_v43 }
 0x16a   :  { %v3027_v26 = vpop.xlane.xlu1 %346 }
 0x16b   :  { %v422_v37 = vperm.slane %v3027_v26, %v3072_v20  ;;  %v84_v26 = vld [vmem:[#allocation2 + $0x8] sm:$0xff] }
 0x16d   :  { %v424_v40 = vsel %vm4105_vm14, %v422_v37, %v420_v35  ;;  %vm527_vm14 = vcmp.gt.f32.partialorder %v3110_v62, 0.0 }
 0x172   :  { %v350_v13 = vpop.xlane.xlu2 %349  ;;  %v241_v22 = vpop.xlane.xlu1 %240 }
 0x173   :  { %v426_v42 = vperm.slane %v350_v13, %v3077_v27 }
 0x175   :  { %v428_v46 = vsel %vm4104_vm15, %v426_v42, %v424_v40  ;;  %v3139_v42 = vld [vmem:[%s4093_s1 + $0x20] sm:$0xff] }
 0x17a   :  { %v244_v44 = vpop.xlane.xlu2 %243  ;;  %v250_v47 = vpop.xlane.xlu1 %249 }
 0x17b   :  { %v353_v38 = vpop.xlane.xlu0 %352 }
 0x17c   :  { %v430_v45 = vperm.slane %v353_v38, %v3087_v39  ;;  %v231_v38 = vmul.f32 %v2957_v3, %v2929_v52 }
 0x17e   :  { %v3097_v48 = vsel %vm4103_vm0, %v430_v45, %v428_v46  ;;  %vm4109_vm0 = vcmp.gt.f32.partialorder %v3102_v51, 0.0 }
 0x17f   :  { %v449_v54 = vadd.f32 %v3097_v48, %v250_v47  ;;  %v447_v57 = vadd.f32 %v3097_v48, %v244_v44  ;;  %v446_v59 = vadd.f32 %v3097_v48, %v241_v22  ;;  %v3145_v44 = vld [vmem:[%s4093_s1 + $0x10] sm:$0xff] }
 0x181   :  { %v465_v1 = vmul.f32 %v449_v54, %v86_v24  ;;  %v463_v2 = vmul.f32 %v447_v57, %v84_v26  ;;  %v462_v6 = vmul.f32 %v446_v59, %v83_v50  ;;  %v266_v24 = vsel %vm238_vm1, %v231_v38, 0.0  ;;  %v88_v26 = vld [vmem:[#allocation2 + $0x28] sm:$0xff] }
 0x182   :  { %v253_v9 = vpop.xlane.xlu2 %252  ;;  %v235_v50 = vmul.f32 %v2957_v3, %v2949_v0  ;;  %v233_v54 = vmul.f32 %v2957_v3, %v2939_v58  ;;  %v232_v57 = vmul.f32 %v2957_v3, %v2934_v55  ;;  %v3177_v55 = vld [vmem:[%s4093_s1 + $0x28] sm:$0xff] }
 0x183   :  { %v450_v13 = vadd.f32 %v3097_v48, %v253_v9  ;;  %v247_v15 = vpop.xlane.xlu0 %246  ;;  %vm481_vm15 = vcmp.gt.f32.partialorder %v465_v1, 0.0  ;;  %v497_v17 = vmul.f32 0.2, %v465_v1  ;;  %vm479_vm13 = vcmp.gt.f32.partialorder %v463_v2, 0.0 }
 0x184   :  { %v448_v18 = vadd.f32 %v3097_v48, %v247_v15  ;;  %v495_v19 = vmul.f32 0.2, %v463_v2  ;;  %vm478_vm12 = vcmp.gt.f32.partialorder %v462_v6, 0.0  ;;  %v494_v25 = vmul.f32 0.2, %v462_v6  ;;  %v89_v15 = vld [vmem:[#allocation2 + $0x30] sm:$0xff] }
 0x185   :  { %v466_v22 = vmul.f32 %v450_v13, %v87_v7  ;;  %v513_v23 = vsel %vm481_vm15, %v465_v1, %v497_v17  ;;  %vm4110_vm15 = vcmp.gt.f32.partialorder %v3139_v42, 0.0  ;;  %v272_v7 = vsel %vm238_vm1, %v233_v54, 0.0 }
 0x186   :  { %v464_v29 = vmul.f32 %v448_v18, %v85_v14  ;;  %v3124_v30 = vsel %vm4109_vm0, %v513_v23, -9e+15  ;;  %v511_v32 = vsel %vm479_vm13, %v463_v2, %v495_v19  ;;  %v510_v36 = vsel %vm478_vm12, %v462_v6, %v494_v25  ;;  %v259_v2 = vpop.xlane.xlu1 %258  ;;  %v90_v14 = vld [vmem:[#allocation2 + $0x38] sm:$0xff] }
 0x187   :  { %564 = vmax.xlane.f32.xlu2 %v3124_v30  ;;  %v3129_v34 = vsel %vm527_vm14, %v511_v32, -9e+15  ;;  %v498_v37 = vmul.f32 0.2, %v466_v22  ;;  %v3134_v41 = vsel %vm526_vm11, %v510_v36, -9e+15  ;;  %v452_v0 = vadd.f32 %v3097_v48, %v259_v2 }
 0x188   :  { %560 = vmax.xlane.f32.xlu1 %v3129_v34  ;;  %vm482_vm13 = vcmp.gt.f32.partialorder %v466_v22, 0.0  ;;  %v496_v43 = vmul.f32 0.2, %v464_v29  ;;  %558 = vmax.xlane.f32.xlu0 %v3134_v41  ;;  %vm480_vm12 = vcmp.gt.f32.partialorder %v464_v29, 0.0  ;;  %vm4112_vm0 = vcmp.gt.f32.partialorder %v3145_v44, 0.0  ;;  %v3191_v32 = vld [vmem:[%s4093_s1 + $0x38] sm:$0xff] }
 0x189   :  { %v514_v35 = vsel %vm482_vm13, %v466_v22, %v498_v37  ;;  %v278_v6 = vsel %vm238_vm1, %v235_v50, 0.0  ;;  %v269_v13 = vsel %vm238_vm1, %v232_v57, 0.0  ;;  %v234_v17 = vmul.f32 %v2957_v3, %v2944_v61  ;;  %v3196_v36 = vld [vmem:[%s4093_s1 + $0x30] sm:$0xff]  ;;  %v91_v2 = vld [vmem:[#allocation2 + $0x40] sm:$0xff] }
 0x18a   :  { %v512_v40 = vsel %vm480_vm12, %v464_v29, %v496_v43  ;;  %v3153_v46 = vsel %vm4110_vm15, %v514_v35, -9e+15  ;;  %v262_v59 = vpop.xlane.xlu2 %261  ;;  %v468_v19 = vmul.f32 %v452_v0, %v89_v15  ;;  %vm4111_vm12 = vcmp.gt.f32.partialorder %v3177_v55, 0.0 }
 0x18b   :  { %v256_v45 = vpop.xlane.xlu0 %255  ;;  %v3158_v47 = vsel %vm4112_vm0, %v512_v40, -9e+15  ;;  %v453_v9 = vadd.f32 %v3097_v48, %v262_v59  ;;  %v275_v23 = vsel %vm238_vm1, %v234_v17, 0.0  ;;  %vm4113_vm0 = vcmp.gt.f32.partialorder %v3196_v36, 0.0 }
 0x18c   :  { %v451_v52 = vadd.f32 %v3097_v48, %v256_v45  ;;  %v500_v61 = vmul.f32 0.2, %v468_v19  ;;  %v236_v40 = vmul.f32 %v2957_v3, %v2961_v5 }
 0x18d   :  { %v469_v18 = vmul.f32 %v453_v9, %v90_v14  ;;  %v92_v9 = vld [vmem:[#allocation2 + $0x48] sm:$0xff] }
 0x18e   :  { %v467_v1 = vmul.f32 %v451_v52, %v88_v26  ;;  %v281_v45 = vsel %vm238_vm1, %v236_v40, 0.0  ;;  %v93_v40 = vld [vmem:[#allocation2 + $0x50] sm:$0xff] }
 0x18f   :  { %566 = vmax.xlane.f32.xlu2 %v3153_v46  ;;  %v501_v29 = vmul.f32 0.2, %v469_v18  ;;  %vm485_vm15 = vcmp.gt.f32.partialorder %v469_v18, 0.0 }
 0x190   :  { %562 = vmax.xlane.f32.xlu1 %v3158_v47  ;;  %267 = vadd.xlane.f32.xlu0 %v266_v24  ;;  %v499_v58 = vmul.f32 0.2, %v467_v1  ;;  %vm483_vm13 = vcmp.gt.f32.partialorder %v467_v1, 0.0 }
 0x191   :  { %v517_v37 = vsel %vm485_vm15, %v469_v18, %v501_v29  ;;  %v3232_v18 = vld [vmem:[%s4093_s1 + $0x40] sm:$0xff] }
 0x192   :  { %v515_v22 = vsel %vm483_vm13, %v467_v1, %v499_v58  ;;  %vm484_vm13 = vcmp.gt.f32.partialorder %v468_v19, 0.0  ;;  %v265_v24 = vpop.xlane.xlu2 %264 }
 0x193   :  { %v3185_v25 = vsel %vm4111_vm12, %v515_v22, -9e+15  ;;  %vm4114_vm12 = vcmp.gt.f32.partialorder %v3191_v32, 0.0  ;;  %v516_v43 = vsel %vm484_vm13, %v468_v19, %v500_v61  ;;  %v454_v59 = vadd.f32 %v3097_v48, %v265_v24 }
 0x194   :  { %v3202_v35 = vsel %vm4114_vm12, %v517_v37, -9e+15  ;;  %v3207_v38 = vsel %vm4113_vm0, %v516_v43, -9e+15  ;;  %vm4117_vm12 = vcmp.gt.f32.partialorder %v3232_v18, 0.0 }
 0x197   :  { %279 = vadd.xlane.f32.xlu2 %v278_v6 }
 0x198   :  { %273 = vadd.xlane.f32.xlu1 %v272_v7  ;;  %270 = vadd.xlane.f32.xlu0 %v269_v13  ;;  %v470_v7 = vmul.f32 %v454_v59, %v91_v2  ;;  %v94_v59 = vld [vmem:[#allocation2 + $0x58] sm:$0xff] }
 0x19a   :  { %v502_v15 = vmul.f32 0.2, %v470_v7  ;;  %vm486_vm15 = vcmp.gt.f32.partialorder %v470_v7, 0.0 }
 0x19c   :  { %v518_v37 = vsel %vm486_vm15, %v470_v7, %v502_v15 }
 0x1a0   :  { %276 = vadd.xlane.f32.xlu1 %v275_v23  ;;  %568 = vmax.xlane.f32.xlu0 %v3185_v25 }
 0x1a8   :  { %572 = vmax.xlane.f32.xlu1 %v3202_v35  ;;  %570 = vmax.xlane.f32.xlu0 %v3207_v38 }
 0x1b0   :  { %282 = vadd.xlane.f32.xlu1 %v281_v45 }
 0x1fa   :  { %v565_v6 = vpop.xlane.xlu2 %564 }
 0x1fb   :  { %v561_v52 = vpop.xlane.xlu1 %560  ;;  %v559_v50 = vpop.xlane.xlu0 %558  ;;  %v593_v17 = vsub.f32 %v3124_v30, %v565_v6  ;;  %v237_v30 = vmul.f32 %v2957_v3, %v2971_v11  ;;  %v3252_v3 = vld [vmem:[%s4093_s1 + $0x50] sm:$0xff] }
 0x1fc   :  { %v591_v26 = vsub.f32 %v3129_v34, %v561_v52  ;;  %v590_v54 = vsub.f32 %v3134_v41, %v559_v50  ;;  %v3222_v34 = vld [vmem:[%s4093_s1 + $0x48] sm:$0xff] }
 0x1fd   :  { %vm4118_vm0 = vcmp.gt.f32.partialorder %v3222_v34, 0.0  ;;  %v612_v43 = vmul.f32 1.442695, %v593_v17  ;;  %v284_v50 = vsel %vm238_vm1, %v237_v30, 0.0 }
 0x1fe   :  { %v608_v57 = vmul.f32 1.442695, %v591_v26  ;;  %v606_v1 = vmul.f32 1.442695, %v590_v54  ;;  %v3247_v26 = vsel %vm4117_vm12, %v518_v37, -9e+15 }
 0x200   :  { %2374 = vpow2.f32 %v608_v57 }
 0x201   :  { %2376 = vpow2.f32 %v606_v1 }
 0x202   :  { %v567_v23 = vpop.xlane.xlu2 %566  ;;  %2378 = vpow2.f32 %v612_v43 }
 0x203   :  { %v563_v5 = vpop.xlane.xlu1 %562  ;;  %v268_v13 = vpop.xlane.xlu0 %267  ;;  %v594_v54 = vsub.f32 %v3153_v46, %v567_v23 }
 0x204   :  { %v455_v0 = vadd.f32 %v3097_v48, %v268_v13  ;;  %v592_v19 = vsub.f32 %v3158_v47, %v563_v5 }
 0x205   :  { %v614_v7 = vmul.f32 1.442695, %v594_v54 }
 0x206   :  { %v3217_v14 = vpop.eup %2374  ;;  %v471_v58 = vmul.f32 %v455_v0, %v92_v9  ;;  %v610_v47 = vmul.f32 1.442695, %v592_v19 }
 0x207   :  { %v3224_v41 = vpop.eup %2376  ;;  %640 = vadd.xlane.f32.xlu0 %v3217_v14 }
 0x208   :  { %638 = vadd.xlane.f32.xlu2 %v3224_v41  ;;  %vm487_vm13 = vcmp.gt.f32.partialorder %v471_v58, 0.0  ;;  %v503_v22 = vmul.f32 0.2, %v471_v58  ;;  %2380 = vpow2.f32 %v610_v47 }
 0x209   :  { %2382 = vpow2.f32 %v614_v7 }
 0x20a   :  { %v519_v61 = vsel %vm487_vm13, %v471_v58, %v503_v22  ;;  %vm4115_vm13 = vcmp.gt.f32.partialorder %v3252_v3, 0.0  ;;  %v280_v5 = vpop.xlane.xlu2 %279  ;;  %v3265_v58 = vpop.eup %2378  ;;  %v96_v22 = vld [vmem:[#allocation2 + $0x68] sm:$0xff] }
 0x20b   :  { %v274_v29 = vpop.xlane.xlu1 %273  ;;  %v271_v45 = vpop.xlane.xlu0 %270  ;;  %v3241_v24 = vsel %vm4118_vm0, %v519_v61, -9e+15  ;;  %v459_v17 = vadd.f32 %v3097_v48, %v280_v5  ;;  %v95_v61 = vld [vmem:[#allocation2 + $0x60] sm:$0xff] }
 0x20c   :  { %v456_v52 = vadd.f32 %v3097_v48, %v271_v45  ;;  %576 = vmax.xlane.f32.xlu1 %v3241_v24  ;;  %v457_v57 = vadd.f32 %v3097_v48, %v274_v29 }
 0x20d   :  { %v475_v37 = vmul.f32 %v459_v17, %v96_v22 }
 0x20e   :  { %v472_v11 = vmul.f32 %v456_v52, %v93_v40  ;;  %v473_v9 = vmul.f32 %v457_v57, %v94_v59  ;;  %v3267_v15 = vpop.eup %2380 }
 0x20f   :  { %574 = vmax.xlane.f32.xlu0 %v3247_v26  ;;  %v3280_v52 = vpop.eup %2382  ;;  %v507_v57 = vmul.f32 0.2, %v475_v37 }
 0x210   :  { %285 = vadd.xlane.f32.xlu2 %v284_v50  ;;  %vm488_vm15 = vcmp.gt.f32.partialorder %v472_v11, 0.0  ;;  %v504_v1 = vmul.f32 0.2, %v472_v11  ;;  %v505_v29 = vmul.f32 0.2, %v473_v9 }
 0x212   :  { %v520_v6 = vsel %vm488_vm15, %v472_v11, %v504_v1  ;;  %vm489_vm15 = vcmp.gt.f32.partialorder %v473_v9, 0.0 }
 0x213   :  { %v277_v2 = vpop.xlane.xlu1 %276  ;;  %v569_v13 = vpop.xlane.xlu0 %568  ;;  %v3261_v0 = vsel %vm4115_vm13, %v520_v6, -9e+15  ;;  %v521_v45 = vsel %vm489_vm15, %v473_v9, %v505_v29  ;;  %vm491_vm15 = vcmp.gt.f32.partialorder %v475_v37, 0.0  ;;  %v97_v6 = vld [vmem:[#allocation2 + $0x70] sm:$0xff] }
 0x214   :  { %v595_v46 = vsub.f32 %v3185_v25, %v569_v13  ;;  %578 = vmax.xlane.f32.xlu1 %v3261_v0  ;;  %v458_v23 = vadd.f32 %v3097_v48, %v277_v2  ;;  %v3276_v25 = vld [vmem:[%s4093_s1 + $0x58] sm:$0xff]  ;;  %v3300_v2 = vld [vmem:[%s4093_s1 + $0x60] sm:$0xff]  ;;  %v523_v5 = vsel %vm491_vm15, %v475_v37, %v507_v57 }
 0x215   :  { %vm4116_vm13 = vcmp.gt.f32.partialorder %v3276_v25, 0.0  ;;  %vm4122_vm0 = vcmp.gt.f32.partialorder %v3300_v2, 0.0 }
 0x216   :  { %v616_v19 = vmul.f32 1.442695, %v595_v46  ;;  %v474_v43 = vmul.f32 %v458_v23, %v95_v61  ;;  %v3287_v54 = vsel %vm4116_vm13, %v521_v45, -9e+15  ;;  %v3321_v23 = vld [vmem:[%s4093_s1 + $0x70] sm:$0xff] }
 0x217   :  { %644 = vadd.xlane.f32.xlu0 %v3265_v58  ;;  %vm4119_vm15 = vcmp.gt.f32.partialorder %v3321_v23, 0.0 }
 0x218   :  { %642 = vadd.xlane.f32.xlu2 %v3267_v15  ;;  %2384 = vpow2.f32 %v616_v19  ;;  %v506_v59 = vmul.f32 0.2, %v474_v43  ;;  %vm490_vm13 = vcmp.gt.f32.partialorder %v474_v43, 0.0 }
 0x21a   :  { %v522_v13 = vsel %vm490_vm13, %v474_v43, %v506_v59 }
 0x21b   :  { %v573_v30 = vpop.xlane.xlu1 %572  ;;  %v571_v40 = vpop.xlane.xlu0 %570  ;;  %v3314_v22 = vsel %vm4122_vm0, %v522_v13, -9e+15 }
 0x21c   :  { %v596_v47 = vsub.f32 %v3207_v38, %v571_v40  ;;  %v3294_v38 = vld [vmem:[%s4093_s1 + $0x68] sm:$0xff]  ;;  %v597_v1 = vsub.f32 %v3202_v35, %v573_v30 }
 0x21d   :  { %vm4121_vm12 = vcmp.gt.f32.partialorder %v3294_v38, 0.0 }
 0x21e   :  { %v3282_v11 = vpop.eup %2384  ;;  %v618_v50 = vmul.f32 1.442695, %v596_v47  ;;  %v620_v46 = vmul.f32 1.442695, %v597_v1  ;;  %v3307_v35 = vsel %vm4121_vm12, %v523_v5, -9e+15 }
 0x21f   :  { %646 = vadd.xlane.f32.xlu0 %v3280_v52  ;;  %648 = vadd.xlane.f32.xlu1 %v3282_v11  ;;  %v98_v5 = vld [vmem:[#allocation2 + $0x78] sm:$0xff] }
 0x220   :  { %580 = vmax.xlane.f32.xlu2 %v3287_v54  ;;  %2386 = vpow2.f32 %v618_v50 }
 0x221   :  { %2388 = vpow2.f32 %v620_v46 }
 0x223   :  { %v283_v7 = vpop.xlane.xlu1 %282 }
 0x224   :  { %v460_v9 = vadd.f32 %v3097_v48, %v283_v7 }
 0x226   :  { %v476_v17 = vmul.f32 %v460_v9, %v97_v6  ;;  %v3309_v19 = vpop.eup %2386 }
 0x227   :  { %584 = vmax.xlane.f32.xlu0 %v3307_v35  ;;  %650 = vadd.xlane.f32.xlu1 %v3309_v19  ;;  %v3328_v30 = vpop.eup %2388 }
 0x228   :  { %582 = vmax.xlane.f32.xlu2 %v3314_v22  ;;  %vm492_vm13 = vcmp.gt.f32.partialorder %v476_v17, 0.0  ;;  %v508_v29 = vmul.f32 0.2, %v476_v17 }
 0x22a   :  { %v524_v61 = vsel %vm492_vm13, %v476_v17, %v508_v29 }
 0x22b   :  { %v3326_v37 = vsel %vm4119_vm15, %v524_v61, -9e+15 }
 0x22f   :  { %586 = vmax.xlane.f32.xlu0 %v3326_v37 }
 0x230   :  { %652 = vadd.xlane.f32.xlu2 %v3328_v30 }
 0x27a   :  { %v641_v43 = vpop.xlane.xlu0 %640 }
 0x27b   :  { %v639_v40 = vpop.xlane.xlu2 %638  ;;  %2390 = vrcp.f32 %v641_v43 }
 0x27c   :  { %2392 = vrcp.f32 %v639_v40 }
 0x27f   :  { %v577_v45 = vpop.xlane.xlu1 %576 }
 0x280   :  { %v599_v50 = vsub.f32 %v3241_v24, %v577_v45  ;;  %v3340_v24 = vld [vmem:[%s4093_s1 + $0x78] sm:$0xff] }
 0x281   :  { %v2391_v47 = vpop.eup %2390  ;;  %vm4120_vm15 = vcmp.gt.f32.partialorder %v3340_v24, 0.0 }
 0x282   :  { %v2393_v57 = vpop.eup %2392  ;;  %v575_v59 = vpop.xlane.xlu0 %574  ;;  %v687_v1 = vmul.f32 %v2391_v47, %v3217_v14  ;;  %v624_v6 = vmul.f32 1.442695, %v599_v50 }
 0x283   :  { %v598_v7 = vsub.f32 %v3247_v26, %v575_v59  ;;  %v286_v9 = vpop.xlane.xlu2 %285  ;;  %v686_v13 = vmul.f32 %v2393_v57, %v3224_v41 }
 0x284   :  { %v461_v46 = vadd.f32 %v3097_v48, %v286_v9  ;;  %2394 = vpow2.f32 %v624_v6 }
 0x285   :  { %v622_v17 = vmul.f32 1.442695, %v598_v7  ;;  %v702_v29 = vpack.c.bf16 %v687_v1, %v686_v13 }
 0x286   :  { %v477_v61 = vmul.f32 %v461_v46, %v98_v5 }
 0x287   :  { %2396 = vpow2.f32 %v622_v17  ;;  %726 = vmatmul.bf16.vlgmr.msra.gmra.mxu1 %v702_v29  ;;  %v579_v14 = vpop.xlane.xlu1 %578 }
 0x288   :  { %vm493_vm13 = vcmp.gt.f32.partialorder %v477_v61, 0.0  ;;  %v509_v26 = vmul.f32 0.2, %v477_v61  ;;  %v600_v41 = vsub.f32 %v3261_v0, %v579_v14 }
 0x28a   :  { %v645_v43 = vpop.xlane.xlu0 %644  ;;  %v525_v48 = vsel %vm493_vm13, %v477_v61, %v509_v26  ;;  %v3344_v40 = vpop.eup %2394  ;;  %v626_v45 = vmul.f32 1.442695, %v600_v41 }
 0x28b   :  { %2398 = vrcp.f32 %v645_v43  ;;  %v643_v47 = vpop.xlane.xlu2 %642  ;;  %v3348_v50 = vsel %vm4120_vm15, %v525_v48, -9e+15  ;;  %656 = vadd.xlane.f32.xlu0 %v3344_v40 }
 0x28c   :  { %2400 = vrcp.f32 %v643_v47  ;;  %588 = vmax.xlane.f32.xlu1 %v3348_v50 }
 0x28d   :  { %v3352_v57 = vpop.eup %2396  ;;  %2402 = vpow2.f32 %v626_v45 }
 0x28e   :  { %654 = vadd.xlane.f32.xlu2 %v3352_v57 }
 0x291   :  { %v2399_v0 = vpop.eup %2398 }
 0x292   :  { %v2401_v59 = vpop.eup %2400  ;;  %v647_v1 = vpop.xlane.xlu0 %646  ;;  %v689_v6 = vmul.f32 %v2399_v0, %v3265_v58 }
 0x293   :  { %v3356_v7 = vpop.eup %2402  ;;  %v581_v5 = vpop.xlane.xlu2 %580  ;;  %v688_v9 = vmul.f32 %v2401_v59, %v3267_v15  ;;  %2404 = vrcp.f32 %v647_v1 }
 0x294   :  { %v649_v13 = vpop.xlane.xlu1 %648  ;;  %v601_v46 = vsub.f32 %v3287_v54, %v581_v5  ;;  %658 = vadd.xlane.f32.xlu1 %v3356_v7 }
 0x295   :  { %v703_v17 = vpack.c.bf16 %v689_v6, %v688_v9  ;;  %2406 = vrcp.f32 %v649_v13 }
 0x296   :  { %v628_v29 = vmul.f32 1.442695, %v601_v46 }
 0x297   :  { %731 = vmatmul.bf16.gmra.mxu1 %v703_v17 }
 0x298   :  { %2408 = vpow2.f32 %v628_v29  ;;  %v864_v29 = vld [vmem:[%s4098_s6 + $0x8] sm:$0xff] }
 0x299   :  { %v2405_v26 = vpop.eup %2404  ;;  %929 = vmatpush.msrb.mxu0 %v864_v29  ;;  %2354 = vmatpush.msrb.mxu1 %v864_v29 }
 0x29a   :  { %v585_v61 = vpop.xlane.xlu0 %584  ;;  %v690_v45 = vmul.f32 %v2405_v26, %v3280_v52  ;;  %2355 = vmatpush.msra.mxu2 %v864_v29 }
 0x29b   :  { %v603_v14 = vsub.f32 %v3307_v35, %v585_v61  ;;  %v583_v58 = vpop.xlane.xlu2 %582  ;;  %v2407_v43 = vpop.eup %2406  ;;  %v863_v61 = vld [vmem:[%s4098_s6] sm:$0xff] }
 0x29c   :  { %v602_v41 = vsub.f32 %v3314_v22, %v583_v58  ;;  %v691_v47 = vmul.f32 %v2407_v43, %v3282_v11  ;;  %v651_v9 = vpop.xlane.xlu1 %650  ;;  %930 = vmatpush.msrb.mxu0 %v863_v61  ;;  %2356 = vmatpush.msrb.mxu1 %v863_v61 }
 0x29d   :  { %v632_v15 = vmul.f32 1.442695, %v603_v14  ;;  %2357 = vmatpush.msra.mxu2 %v863_v61 }
 0x29e   :  { %v3363_v48 = vpop.eup %2408  ;;  %v630_v54 = vmul.f32 1.442695, %v602_v41  ;;  %v704_v6 = vpack.c.bf16 %v691_v47, %v690_v45 }
 0x29f   :  { %2410 = vpow2.f32 %v632_v15  ;;  %660 = vadd.xlane.f32.xlu2 %v3363_v48 }
 0x2a0   :  { %2412 = vpow2.f32 %v630_v54 }
 0x2a2   :  { %v587_v0 = vpop.xlane.xlu0 %586 }
 0x2a3   :  { %v604_v35 = vsub.f32 %v3326_v37, %v587_v0  ;;  %v653_v22 = vpop.xlane.xlu2 %652 }
 0x2a5   :  { %v3369_v59 = vpop.eup %2410  ;;  %v634_v1 = vmul.f32 1.442695, %v604_v35 }
 0x2a6   :  { %v3371_v5 = vpop.eup %2412  ;;  %664 = vadd.xlane.f32.xlu1 %v3369_v59 }
 0x2a7   :  { %2414 = vpow2.f32 %v634_v1  ;;  %736 = vmatmul.bf16.gmra.mxu1 %v704_v6  ;;  %662 = vadd.xlane.f32.xlu0 %v3371_v5 }
 0x2a8   :  { %2416 = vrcp.f32 %v653_v22 }
 0x2a9   :  { %2418 = vrcp.f32 %v651_v9 }
 0x2ad   :  { %v3375_v52 = vpop.eup %2414 }
 0x2ae   :  { %v2417_v11 = vpop.eup %2416  ;;  %666 = vadd.xlane.f32.xlu2 %v3375_v52 }
 0x2af   :  { %v2419_v37 = vpop.eup %2418  ;;  %v693_v13 = vmul.f32 %v2417_v11, %v3328_v30 }
 0x2b0   :  { %v692_v46 = vmul.f32 %v2419_v37, %v3309_v19 }
 0x2b2   :  { %v705_v17 = vpack.c.bf16 %v693_v13, %v692_v46 }
 0x2b7   :  { %741 = vmatmul.bf16.gmra.mxu1 %v705_v17 }
 0x2fe   :  { %v657_v14 = vpop.xlane.xlu0 %656 }
 0x2ff   :  { %v589_v30 = vpop.xlane.xlu1 %588  ;;  %2420 = vrcp.f32 %v657_v14 }
 0x300   :  { %v605_v19 = vsub.f32 %v3348_v50, %v589_v30 }
 0x301   :  { %v655_v58 = vpop.xlane.xlu2 %654 }
 0x302   :  { %v636_v26 = vmul.f32 1.442695, %v605_v19  ;;  %2422 = vrcp.f32 %v655_v58 }
 0x304   :  { %2424 = vpow2.f32 %v636_v26  ;;  %v727_v41 = vpop.f32.mrf.mxu1 }
 0x305   :  { %v783_v43 = vmin.f32 %v727_v41, 0.0  ;;  %v2421_v15 = vpop.eup %2420  ;;  %vm767_vm13 = vcmp.gt.f32.partialorder %v727_v41, 0.0 }
 0x306   :  { %v695_v0 = vmul.f32 %v2421_v15, %v3344_v40 }
 0x307   :  { %v799_v54 = vmul.f32 1.442695, %v783_v43  ;;  %v659_v22 = vpop.xlane.xlu1 %658 }
 0x308   :  { %v2423_v45 = vpop.eup %2422 }
 0x309   :  { %2426 = vpow2.f32 %v799_v54  ;;  %v694_v47 = vmul.f32 %v2423_v45, %v3352_v57 }
 0x30a   :  { %v3389_v35 = vpop.eup %2424  ;;  %2428 = vrcp.f32 %v659_v22 }
 0x30b   :  { %668 = vadd.xlane.f32.xlu0 %v3389_v35  ;;  %v706_v1 = vpack.c.bf16 %v695_v0, %v694_v47 }
 0x30c   :  { %v729_v50 = vpop.f32.mrf.mxu1 }
 0x30d   :  { %v784_v6 = vmin.f32 %v729_v50, 0.0  ;;  %746 = vmatmul.bf16.gmra.mxu1 %v706_v1  ;;  %vm768_vm15 = vcmp.gt.f32.partialorder %v729_v50, 0.0 }
 0x30f   :  { %v2427_v9 = vpop.eup %2426  ;;  %v801_v11 = vmul.f32 1.442695, %v784_v6 }
 0x310   :  { %v2282_v37 = vadd.f32 -1.0, %v2427_v9  ;;  %v2429_v17 = vpop.eup %2428 }
 0x311   :  { %2430 = vpow2.f32 %v801_v11  ;;  %v696_v58 = vmul.f32 %v2429_v17, %v3356_v7 }
 0x312   :  { %v661_v13 = vpop.xlane.xlu2 %660  ;;  %v847_v46 = vsel %vm767_vm13, %v727_v41, %v2282_v37 }
 0x313   :  { %2432 = vrcp.f32 %v661_v13  ;;  %2298 = vmatmul.msk.f32.vlgmr.msrb.gmra.mxu0 %vm238_vm1, %v847_v46 }
 0x314   :  { %v732_v40 = vpop.f32.mrf.mxu1 }
 0x315   :  { %v785_v57 = vmin.f32 %v732_v40, 0.0  ;;  %vm769_vm13 = vcmp.gt.f32.partialorder %v732_v40, 0.0 }
 0x317   :  { %v2431_v29 = vpop.eup %2430  ;;  %v803_v61 = vmul.f32 1.442695, %v785_v57 }
 0x318   :  { %v2283_v14 = vadd.f32 -1.0, %v2431_v29 }
 0x319   :  { %v2433_v30 = vpop.eup %2432  ;;  %2434 = vpow2.f32 %v803_v61  ;;  %v665_v43 = vpop.xlane.xlu1 %664 }
 0x31a   :  { %v848_v19 = vsel %vm768_vm15, %v729_v50, %v2283_v14  ;;  %v697_v26 = vmul.f32 %v2433_v30, %v3363_v48  ;;  %v663_v41 = vpop.xlane.xlu0 %662  ;;  %2436 = vrcp.f32 %v665_v43 }
 0x31b   :  { %2299 = vmatmul.msk.f32.gmra.mxu0 %vm238_vm1, %v848_v19  ;;  %2438 = vrcp.f32 %v663_v41 }
 0x31c   :  { %v734_v15 = vpop.f32.mrf.mxu1  ;;  %v707_v54 = vpack.c.bf16 %v697_v26, %v696_v58 }
 0x31d   :  { %v786_v45 = vmin.f32 %v734_v15, 0.0  ;;  %vm770_vm15 = vcmp.gt.f32.partialorder %v734_v15, 0.0 }
 0x31e   :  { %751 = vmatmul.bf16.gmra.mxu1 %v707_v54 }
 0x31f   :  { %v2435_v47 = vpop.eup %2434  ;;  %v805_v0 = vmul.f32 1.442695, %v786_v45 }
 0x320   :  { %v2284_v1 = vadd.f32 -1.0, %v2435_v47  ;;  %v2437_v7 = vpop.eup %2436 }
 0x321   :  { %2440 = vpow2.f32 %v805_v0  ;;  %v2439_v22 = vpop.eup %2438  ;;  %v699_v46 = vmul.f32 %v2437_v7, %v3369_v59  ;;  %v667_v43 = vpop.xlane.xlu2 %666 }
 0x322   :  { %v849_v50 = vsel %vm769_vm13, %v732_v40, %v2284_v1  ;;  %v698_v13 = vmul.f32 %v2439_v22, %v3371_v5 }
 0x323   :  { %2300 = vmatmul.msk.f32.gmra.mxu0 %vm238_vm1, %v849_v50 }
 0x324   :  { %v737_v48 = vpop.f32.mrf.mxu1  ;;  %v708_v40 = vpack.c.bf16 %v699_v46, %v698_v13 }
 0x325   :  { %v787_v6 = vmin.f32 %v737_v48, 0.0  ;;  %vm771_vm13 = vcmp.gt.f32.partialorder %v737_v48, 0.0 }
 0x327   :  { %v2441_v9 = vpop.eup %2440  ;;  %v807_v11 = vmul.f32 1.442695, %v787_v6 }
 0x328   :  { %v2285_v37 = vadd.f32 -1.0, %v2441_v9 }
 0x329   :  { %2442 = vpow2.f32 %v807_v11  ;;  %v3407_v11 = vld [vmem:[%s4100_s8] ss:$0 sm:$0xff] }
 0x32a   :  { %v850_v57 = vsel %vm770_vm15, %v734_v15, %v2285_v37 }
 0x32b   :  { %2301 = vmatmul.msk.f32.gmra.mxu0 %vm238_vm1, %v850_v57 }
 0x32c   :  { %v739_v17 = vpop.f32.mrf.mxu1 }
 0x32d   :  { %v788_v29 = vmin.f32 %v739_v17, 0.0  ;;  %vm772_vm12 = vcmp.gt.f32.partialorder %v739_v17, 0.0 }
 0x32e   :  { %756 = vmatmul.bf16.gmra.mxu1 %v708_v40 }
 0x32f   :  { %v2443_v61 = vpop.eup %2442  ;;  %v809_v14 = vmul.f32 1.442695, %v788_v29 }
 0x330   :  { %v2286_v30 = vadd.f32 -1.0, %v2443_v61 }
 0x331   :  { %2444 = vpow2.f32 %v809_v14 }
 0x332   :  { %v851_v19 = vsel %vm771_vm13, %v737_v48, %v2286_v30  ;;  %2446 = vrcp.f32 %v667_v43 }
 0x333   :  { %2302 = vmatmul.msk.f32.gmra.mxu0 %vm238_vm1, %v851_v19 }
 0x334   :  { %v742_v26 = vpop.f32.mrf.mxu1 }
 0x335   :  { %v789_v45 = vmin.f32 %v742_v26, 0.0  ;;  %vm773_vm13 = vcmp.gt.f32.partialorder %v742_v26, 0.0 }
 0x337   :  { %v2445_v5 = vpop.eup %2444  ;;  %v811_v50 = vmul.f32 1.442695, %v789_v45 }
 0x338   :  { %v2287_v58 = vadd.f32 -1.0, %v2445_v5  ;;  %v2447_v54 = vpop.eup %2446 }
 0x339   :  { %v700_v0 = vmul.f32 %v2447_v54, %v3375_v52 }
 0x33a   :  { %v852_v59 = vsel %vm772_vm12, %v739_v17, %v2287_v58  ;;  %vm999_vm12 = vcmask 64512  }
 0x33b   :  { %2303 = vmatmul.msk.f32.gmra.mxu0 %vm238_vm1, %v852_v59 }
 0x33c   :  { %v744_v15 = vpop.f32.mrf.mxu1 }
 0x33d   :  { %v790_v6 = vmin.f32 %v744_v15, 0.0 }
 0x33f   :  { %v813_v37 = vmul.f32 1.442695, %v790_v6 }
 0x37e   :  { %v669_v41 = vpop.xlane.xlu0 %668 }
 0x37f   :  { %2448 = vrcp.f32 %v669_v41 }
 0x380   :  { %2450 = vpow2.f32 %v811_v50 }
 0x385   :  { %v2449_v47 = vpop.eup %2448 }
 0x386   :  { %v701_v1 = vmul.f32 %v2449_v47, %v3389_v35  ;;  %v2451_v35 = vpop.eup %2450 }
 0x387   :  { %v2288_v29 = vadd.f32 -1.0, %v2451_v35 }
 0x388   :  { %v709_v7 = vpack.c.bf16 %v701_v1, %v700_v0 }
 0x389   :  { %v853_v5 = vsel %vm773_vm13, %v742_v26, %v2288_v29  ;;  %vm774_vm13 = vcmp.gt.f32.partialorder %v744_v15, 0.0 }
 0x38a   :  { %761 = vmatmul.bf16.gmra.mxu1 %v709_v7  ;;  %v747_v48 = vpop.f32.mrf.mxu1 }
 0x38b   :  { %v791_v22 = vmin.f32 %v747_v48, 0.0  ;;  %vm775_vm15 = vcmp.gt.f32.partialorder %v747_v48, 0.0 }
 0x38d   :  { %v815_v9 = vmul.f32 1.442695, %v791_v22 }
 0x38f   :  { %2452 = vpow2.f32 %v815_v9 }
 0x390   :  { %v3409_v13 = vpop.f32.mrf.mxu0  ;;  %2454 = vpow2.f32 %v813_v37 }
 0x391   :  { %v1051_v52 = vmul.f32 %v3407_v11, %v3409_v13 }
 0x392   :  { %v749_v46 = vpop.f32.mrf.mxu1 }
 0x393   :  { %v792_v57 = vmin.f32 %v749_v46, 0.0  ;;  %v1067_v17 = vsel %vm999_vm12, %v1051_v52, 0.0 }
 0x394   :  { %1068 = vadd.xlane.f32.xlu1 %v1067_v17 }
 0x395   :  { %v2453_v40 = vpop.eup %2452  ;;  %v817_v61 = vmul.f32 1.442695, %v792_v57 }
 0x396   :  { %v2290_v14 = vadd.f32 -1.0, %v2453_v40  ;;  %v2455_v43 = vpop.eup %2454 }
 0x397   :  { %2456 = vpow2.f32 %v817_v61  ;;  %v2289_v0 = vadd.f32 -1.0, %v2455_v43 }
 0x398   :  { %v3414_v30 = vpop.f32.mrf.mxu0  ;;  %v855_v19 = vsel %vm775_vm15, %v747_v48, %v2290_v14  ;;  %vm776_vm15 = vcmp.gt.f32.partialorder %v749_v46, 0.0 }
 0x399   :  { %2306 = vmatmul.msk.f32.vlgmr.msra.gmra.mxu2 %vm238_vm1, %v855_v19  ;;  %v1052_v58 = vmul.f32 %v3407_v11, %v3414_v30  ;;  %v1417_v59 = vpack.c.bf16 %v3414_v30, %v3409_v13  ;;  %v854_v48 = vsel %vm774_vm13, %v744_v15, %v2289_v0 }
 0x39a   :  { %2304 = vmatmul.msk.f32.vlgmr.msrb.gmra.mxu1 %vm238_vm1, %v853_v5 }
 0x39b   :  { %v752_v41 = vpop.f32.mrf.mxu1  ;;  %v1070_v54 = vsel %vm999_vm12, %v1052_v58, 0.0 }
 0x39c   :  { %v793_v45 = vmin.f32 %v752_v41, 0.0  ;;  %1071 = vadd.xlane.f32.xlu2 %v1070_v54  ;;  %vm777_vm0 = vcmp.gt.f32.partialorder %v752_v41, 0.0 }
 0x39d   :  { %v2457_v47 = vpop.eup %2456 }
 0x39e   :  { %v819_v1 = vmul.f32 1.442695, %v793_v45  ;;  %v2291_v26 = vadd.f32 -1.0, %v2457_v47 }
 0x3a0   :  { %2458 = vpow2.f32 %v819_v1  ;;  %v3423_v50 = vpop.f32.mrf.mxu0  ;;  %v856_v7 = vsel %vm776_vm15, %v749_v46, %v2291_v26 }
 0x3a1   :  { %2307 = vmatmul.msk.f32.gmra.mxu2 %vm238_vm1, %v856_v7  ;;  %v1053_v22 = vmul.f32 %v3407_v11, %v3423_v50 }
 0x3a2   :  { %2305 = vmatmul.msk.f32.gmra.mxu1 %vm238_vm1, %v854_v48 }
 0x3a3   :  { %v754_v6 = vpop.f32.mrf.mxu1  ;;  %v1073_v9 = vsel %vm999_vm12, %v1053_v22, 0.0 }
 0x3a4   :  { %v794_v37 = vmin.f32 %v754_v6, 0.0  ;;  %1074 = vadd.xlane.f32.xlu0 %v1073_v9  ;;  %vm778_vm15 = vcmp.gt.f32.partialorder %v754_v6, 0.0 }
 0x3a6   :  { %v2459_v52 = vpop.eup %2458  ;;  %v821_v35 = vmul.f32 1.442695, %v794_v37 }
 0x3a7   :  { %v2292_v57 = vadd.f32 -1.0, %v2459_v52 }
 0x3a8   :  { %2460 = vpow2.f32 %v821_v35  ;;  %v3430_v17 = vpop.f32.mrf.mxu0 }
 0x3a9   :  { %v857_v15 = vsel %vm777_vm0, %v752_v41, %v2292_v57  ;;  %v1054_v46 = vmul.f32 %v3407_v11, %v3430_v17  ;;  %v1418_v40 = vpack.c.bf16 %v3430_v17, %v3423_v50 }
 0x3aa   :  { %2308 = vmatmul.msk.f32.gmra.mxu2 %vm238_vm1, %v857_v15 }
 0x3ab   :  { %v757_v29 = vpop.f32.mrf.mxu1  ;;  %v1076_v61 = vsel %vm999_vm12, %v1054_v46, 0.0 }
 0x3ac   :  { %v795_v14 = vmin.f32 %v757_v29, 0.0  ;;  %1077 = vadd.xlane.f32.xlu1 %v1076_v61  ;;  %vm779_vm0 = vcmp.gt.f32.partialorder %v757_v29, 0.0 }
 0x3ae   :  { %v2461_v19 = vpop.eup %2460  ;;  %v823_v5 = vmul.f32 1.442695, %v795_v14 }
 0x3af   :  { %v2293_v58 = vadd.f32 -1.0, %v2461_v19 }
 0x3b0   :  { %2462 = vpow2.f32 %v823_v5  ;;  %v3438_v43 = vpop.f32.mrf.mxu0 }
 0x3b1   :  { %v858_v41 = vsel %vm778_vm15, %v754_v6, %v2293_v58  ;;  %v1055_v54 = vmul.f32 %v3407_v11, %v3438_v43 }
 0x3b2   :  { %2309 = vmatmul.msk.f32.gmra.mxu2 %vm238_vm1, %v858_v41 }
 0x3b3   :  { %v759_v45 = vpop.f32.mrf.mxu1  ;;  %v1079_v47 = vsel %vm999_vm12, %v1055_v54, 0.0 }
 0x3b4   :  { %v796_v0 = vmin.f32 %v759_v45, 0.0  ;;  %1080 = vadd.xlane.f32.xlu2 %v1079_v47  ;;  %vm780_vm13 = vcmp.gt.f32.partialorder %v759_v45, 0.0 }
 0x3b6   :  { %v2463_v1 = vpop.eup %2462  ;;  %v825_v26 = vmul.f32 1.442695, %v796_v0 }
 0x3b7   :  { %v2294_v7 = vadd.f32 -1.0, %v2463_v1 }
 0x3b8   :  { %2464 = vpow2.f32 %v825_v26  ;;  %v3444_v48 = vpop.f32.mrf.mxu0 }
 0x3b9   :  { %v1056_v22 = vmul.f32 %v3407_v11, %v3444_v48  ;;  %v859_v6 = vsel %vm779_vm0, %v757_v29, %v2294_v7  ;;  %v1419_v9 = vpack.c.bf16 %v3444_v48, %v3438_v43 }
 0x3ba   :  { %2310 = vmatmul.msk.f32.gmra.mxu2 %vm238_vm1, %v859_v6 }
 0x3bb   :  { %v1082_v37 = vsel %vm999_vm12, %v1056_v22, 0.0 }
 0x3bc   :  { %1083 = vadd.xlane.f32.xlu0 %v1082_v37 }
 0x3be   :  { %v2465_v52 = vpop.eup %2464 }
 0x3bf   :  { %v2295_v35 = vadd.f32 -1.0, %v2465_v52 }
 0x3c1   :  { %v860_v57 = vsel %vm780_vm13, %v759_v45, %v2295_v35 }
 0x3c2   :  { %2311 = vmatmul.msk.f32.gmra.mxu2 %vm238_vm1, %v860_v57 }
 0x407   :  { %v762_v15 = vpop.f32.mrf.mxu1 }
 0x408   :  { %v797_v46 = vmin.f32 %v762_v15, 0.0  ;;  %vm781_vm15 = vcmp.gt.f32.partialorder %v762_v15, 0.0 }
 0x40a   :  { %v827_v61 = vmul.f32 1.442695, %v797_v46 }
 0x40c   :  { %2466 = vpow2.f32 %v827_v61 }
 0x40f   :  { %v764_v14 = vpop.f32.mrf.mxu1 }
 0x410   :  { %v798_v29 = vmin.f32 %v764_v14, 0.0  ;;  %vm782_vm0 = vcmp.gt.f32.partialorder %v764_v14, 0.0 }
 0x412   :  { %v2467_v19 = vpop.eup %2466  ;;  %v829_v5 = vmul.f32 1.442695, %v798_v29 }
 0x413   :  { %v2296_v58 = vadd.f32 -1.0, %v2467_v19 }
 0x414   :  { %2468 = vpow2.f32 %v829_v5 }
 0x415   :  { %v861_v41 = vsel %vm781_vm15, %v762_v15, %v2296_v58  ;;  %vm4131_vm15 = vcmp.gt.f32.partialorder %v3139_v42, 0.0 }
 0x416   :  { %2312 = vmatmul.msk.f32.gmra.mxu2 %vm238_vm1, %v861_v41 }
 0x417   :  { %v3454_v54 = vpop.f32.mrf.mxu1 }
 0x418   :  { %v1057_v45 = vmul.f32 %v3407_v11, %v3454_v54 }
 0x41a   :  { %v2469_v47 = vpop.eup %2468  ;;  %v1085_v0 = vsel %vm999_vm12, %v1057_v45, 0.0 }
 0x41b   :  { %1086 = vadd.xlane.f32.xlu1 %v1085_v0  ;;  %v2297_v1 = vadd.f32 -1.0, %v2469_v47 }
 0x41c   :  { %v3459_v26 = vpop.f32.mrf.mxu2 }
 0x41d   :  { %v862_v7 = vsel %vm782_vm0, %v764_v14, %v2297_v1  ;;  %v1059_v22 = vmul.f32 %v3407_v11, %v3459_v26 }
 0x41e   :  { %2313 = vmatmul.msk.f32.gmra.mxu2 %vm238_vm1, %v862_v7  ;;  %vm4123_vm1 = vcmask 720512  }
 0x41f   :  { %v3464_v6 = vpop.f32.mrf.mxu1  ;;  %v1091_v37 = vsel %vm999_vm12, %v1059_v22, 0.0 }
 0x420   :  { %v1058_v52 = vmul.f32 %v3407_v11, %v3464_v6  ;;  %1092 = vadd.xlane.f32.xlu0 %v1091_v37  ;;  %v1420_v35 = vpack.c.bf16 %v3464_v6, %v3454_v54 }
 0x422   :  { %v1088_v57 = vsel %vm999_vm12, %v1058_v52, 0.0  ;;  %v3503_v52 = vld [vmem:[%s4099_s7] ss:$0 sm:$0xff] }
 0x423   :  { %1089 = vadd.xlane.f32.xlu2 %v1088_v57 }
 0x424   :  { %v3472_v15 = vpop.f32.mrf.mxu2 }
 0x425   :  { %v1060_v46 = vmul.f32 %v3407_v11, %v3472_v15  ;;  %v1421_v61 = vpack.c.bf16 %v3472_v15, %v3459_v26 }
 0x427   :  { %v1094_v14 = vsel %vm999_vm12, %v1060_v46, 0.0  ;;  %v983_v46 = vmul.f32 %v3503_v52, %v3409_v13 }
 0x428   :  { %1095 = vadd.xlane.f32.xlu1 %v1094_v14 }
 0x429   :  { %v1000_v14 = vsel %vm999_vm12, %v983_v46, 0.0 }
 0x42d   :  { %v3479_v29 = vpop.f32.mrf.mxu2 }
 0x42e   :  { %v1061_v19 = vmul.f32 %v3407_v11, %v3479_v29 }
 0x430   :  { %v1097_v5 = vsel %vm999_vm12, %v1061_v19, 0.0  ;;  %v986_v19 = vmul.f32 %v3503_v52, %v3430_v17 }
 0x431   :  { %1098 = vadd.xlane.f32.xlu2 %v1097_v5 }
 0x432   :  { %v1009_v5 = vsel %vm999_vm12, %v986_v19, 0.0 }
 0x435   :  { %v3484_v58 = vpop.f32.mrf.mxu2 }
 0x436   :  { %v1062_v41 = vmul.f32 %v3407_v11, %v3484_v58  ;;  %v1422_v45 = vpack.c.bf16 %v3484_v58, %v3479_v29 }
 0x438   :  { %v1100_v47 = vsel %vm999_vm12, %v1062_v41, 0.0  ;;  %v989_v41 = vmul.f32 %v3503_v52, %v3454_v54 }
 0x439   :  { %1101 = vadd.xlane.f32.xlu0 %v1100_v47 }
 0x43a   :  { %v1018_v47 = vsel %vm999_vm12, %v989_v41, 0.0 }
 0x43d   :  { %v3491_v0 = vpop.f32.mrf.mxu2 }
 0x43e   :  { %v1063_v1 = vmul.f32 %v3407_v11, %v3491_v0 }
 0x440   :  { %v1103_v7 = vsel %vm999_vm12, %v1063_v1, 0.0 }
 0x441   :  { %1104 = vadd.xlane.f32.xlu1 %v1103_v7 }
 0x445   :  { %v3496_v22 = vpop.f32.mrf.mxu2 }
 0x446   :  { %v1064_v37 = vmul.f32 %v3407_v11, %v3496_v22  ;;  %v1423_v41 = vpack.c.bf16 %v3496_v22, %v3491_v0 }
 0x448   :  { %v1106_v57 = vsel %vm999_vm12, %v1064_v37, 0.0 }
 0x449   :  { %1107 = vadd.xlane.f32.xlu2 %v1106_v57  ;;  %v984_v57 = vmul.f32 %v3503_v52, %v3414_v30 }
 0x44b   :  { %v1003_v19 = vsel %vm999_vm12, %v984_v57, 0.0  ;;  %v988_v57 = vmul.f32 %v3503_v52, %v3444_v48 }
 0x451   :  { %1001 = vadd.xlane.f32.xlu2 %v1000_v14 }
 0x459   :  { %1010 = vadd.xlane.f32.xlu2 %v1009_v5 }
 0x461   :  { %1019 = vadd.xlane.f32.xlu2 %v1018_v47  ;;  %v987_v47 = vmul.f32 %v3503_v52, %v3438_v43 }
 0x499   :  { %v3515_v1 = vpop.f32.mrf.mxu2 }
 0x49a   :  { %v1065_v7 = vmul.f32 %v3407_v11, %v3515_v1 }
 0x49c   :  { %v1109_v37 = vsel %vm999_vm12, %v1065_v7, 0.0  ;;  %v985_v7 = vmul.f32 %v3503_v52, %v3423_v50 }
 0x49d   :  { %1110 = vadd.xlane.f32.xlu0 %v1109_v37 }
 0x49e   :  { %v1006_v37 = vsel %vm999_vm12, %v985_v7, 0.0 }
 0x4a1   :  { %v3522_v46 = vpop.f32.mrf.mxu2 }
 0x4a2   :  { %v1424_v14 = vpack.c.bf16 %v3522_v46, %v3515_v1  ;;  %v1066_v54 = vmul.f32 %v3407_v11, %v3522_v46  ;;  %v1012_v11 = vsel %vm999_vm12, %v987_v47, 0.0 }
 0x4a4   :  { %1425 = vmatpush.bf16.msra.mxu3 %v1424_v14  ;;  %v1112_v5 = vsel %vm999_vm12, %v1066_v54, 0.0  ;;  %v990_v14 = vmul.f32 %v3503_v52, %v3464_v6 }
 0x4a5   :  { %1004 = vadd.xlane.f32.xlu0 %v1003_v19  ;;  %1113 = vadd.xlane.f32.xlu1 %v1112_v5  ;;  %v1015_v19 = vsel %vm999_vm12, %v988_v57, 0.0  ;;  %v1069_v5 = vpop.xlane.xlu1 %1068 }
 0x4a6   :  { %v1021_v54 = vsel %vm999_vm12, %v990_v14, 0.0  ;;  %v1131_v13 = vperm.slane %v1069_v5, %v3016_v28 }
 0x4a8   :  { %1426 = vmatpush.bf16.msra.mxu3 %v1423_v41  ;;  %v1075_v41 = vpop.xlane.xlu0 %1074 }
 0x4ac   :  { %1427 = vmatpush.bf16.msra.mxu3 %v1422_v45  ;;  %v991_v45 = vmul.f32 %v3503_v52, %v3459_v26 }
 0x4ad   :  { %1013 = vadd.xlane.f32.xlu0 %v1012_v11  ;;  %1007 = vadd.xlane.f32.xlu1 %v1006_v37  ;;  %v1078_v48 = vpop.xlane.xlu1 %1077 }
 0x4ae   :  { %v1024_v6 = vsel %vm999_vm12, %v991_v45, 0.0  ;;  %v1136_v30 = vperm.slane %v1078_v48, %v3025_v21 }
 0x4b0   :  { %1428 = vmatpush.bf16.msra.mxu3 %v1421_v61 }
 0x4b4   :  { %1429 = vmatpush.bf16.msra.mxu3 %v1420_v35  ;;  %v1072_v35 = vpop.xlane.xlu2 %1071 }
 0x4b5   :  { %1022 = vadd.xlane.f32.xlu0 %v1021_v54  ;;  %1016 = vadd.xlane.f32.xlu1 %v1015_v19  ;;  %v1087_v26 = vpop.xlane.xlu1 %1086  ;;  %v1132_v50 = vperm.slane %v1072_v35, %v3019_v31 }
 0x4b6   :  { %v1142_v19 = vperm.slane %v1087_v26, %v3038_v56 }
 0x4b7   :  { %v1133_v57 = vsel %vm375_vm2, %v1132_v50, %v1131_v13  ;;  %vm4124_vm2 = vcmask 786112  }
 0x4b8   :  { %1430 = vmatpush.bf16.msra.mxu3 %v1419_v9  ;;  %v1084_v9 = vpop.xlane.xlu0 %1083 }
 0x4b9   :  { %v1140_v14 = vperm.slane %v1084_v9, %v3034_v53 }
 0x4bc   :  { %1431 = vmatpush.bf16.msra.mxu3 %v1418_v40  ;;  %v1081_v61 = vpop.xlane.xlu2 %1080  ;;  %v1134_v40 = vperm.slane %v1075_v41, %v3022_v33 }
 0x4bd   :  { %1025 = vadd.xlane.f32.xlu0 %v1024_v6  ;;  %v1096_v11 = vpop.xlane.xlu1 %1095 }
 0x4be   :  { %v1135_v54 = vsel %vm379_vm3, %v1134_v40, %v1133_v57  ;;  %v1148_v53 = vperm.slane %v1096_v11, %v3052_v4  ;;  %vm4125_vm3 = vcmask 851712   ;;  %v2664_v57 = vld [vmem:[#allocation2 + $0x18] sm:$0xff] }
 0x4bf   :  { %v1137_v31 = vsel %vm383_vm4, %v1136_v30, %v1135_v54  ;;  %vm4126_vm4 = vcmask 917312   ;;  %v2663_v30 = vld [vmem:[#allocation2] sm:$0xff] }
 0x4c0   :  { %1432 = vmatpush.bf16.msra.mxu3 %v1417_v59  ;;  %v1093_v7 = vpop.xlane.xlu0 %1092  ;;  %v1138_v59 = vperm.slane %v1081_v61, %v3030_v49 }
 0x4c1   :  { %v1146_v5 = vperm.slane %v1093_v7, %v3047_v63 }
 0x4c2   :  { %v1139_v45 = vsel %vm387_vm5, %v1138_v59, %v1137_v31  ;;  %vm4127_vm5 = vcmask 982912  }
 0x4c3   :  { %v1141_v28 = vsel %vm391_vm6, %v1140_v14, %v1139_v45  ;;  %vm4128_vm6 = vcmask 1048512  }
 0x4c4   :  { %v1090_v43 = vpop.xlane.xlu2 %1089  ;;  %v1143_v21 = vsel %vm395_vm7, %v1142_v19, %v1141_v28 }
 0x4c5   :  { %v1144_v33 = vperm.slane %v1090_v43, %v3043_v60  ;;  %v1105_v6 = vpop.xlane.xlu1 %1104 }
 0x4c6   :  { %v1154_v43 = vperm.slane %v1105_v6, %v3067_v16 }
 0x4c7   :  { %v1145_v35 = vsel %vm399_vm8, %v1144_v33, %v1143_v21 }
 0x4c8   :  { %v1102_v37 = vpop.xlane.xlu0 %1101  ;;  %v1147_v60 = vsel %vm403_vm9, %v1146_v5, %v1145_v35 }
 0x4c9   :  { %v1152_v41 = vperm.slane %v1102_v37, %v3062_v12  ;;  %v1149_v48 = vsel %vm407_vm10, %v1148_v53, %v1147_v60  ;;  %v2662_v37 = vld [vmem:[#allocation2 + $0x8] sm:$0xff]  ;;  %v2666_v53 = vld [vmem:[#allocation2 + $0x10] sm:$0xff]  ;;  %vm4129_vm10 = vcmp.gt.f32.partialorder %v3102_v51, 0.0 }
 0x4cc   :  { %v1099_v47 = vpop.xlane.xlu2 %1098 }
 0x4cd   :  { %v1150_v56 = vperm.slane %v1099_v47, %v3057_v8 }
 0x4cf   :  { %v1151_v26 = vsel %vm4123_vm1, %v1150_v56, %v1149_v48  ;;  %v992_v48 = vmul.f32 %v3503_v52, %v3472_v15  ;;  %v994_v15 = vmul.f32 %v3503_v52, %v3484_v58  ;;  %vm4132_vm1 = vcmp.gt.f32.partialorder %v3177_v55, 0.0 }
 0x4d0   :  { %v1153_v4 = vsel %vm4124_vm2, %v1152_v41, %v1151_v26  ;;  %v997_v55 = vmul.f32 %v3503_v52, %v3515_v1  ;;  %v2670_v1 = vld [vmem:[#allocation2 + $0x40] sm:$0xff] }
 0x4d1   :  { %v1155_v63 = vsel %vm4125_vm3, %v1154_v43, %v1153_v4  ;;  %v1027_v51 = vsel %vm999_vm12, %v992_v48, 0.0 }
 0x4d4   :  { %v1108_v17 = vpop.xlane.xlu2 %1107 }
 0x4d5   :  { %v1156_v9 = vperm.slane %v1108_v17, %v3072_v20 }
 0x4d7   :  { %v1157_v12 = vsel %vm4126_vm4, %v1156_v9, %v1155_v63  ;;  %vm4133_vm4 = vcmp.gt.f32.partialorder %v3191_v32, 0.0 }
 0x4dc   :  { %v1002_v61 = vpop.xlane.xlu2 %1001 }
 0x4e4   :  { %v1011_v40 = vpop.xlane.xlu2 %1010 }
 0x510   :  { %v1111_v49 = vpop.xlane.xlu0 %1110 }
 0x511   :  { %v1158_v50 = vperm.slane %v1111_v49, %v3077_v27  ;;  %v2665_v49 = vld [vmem:[#allocation2 + $0x20] sm:$0xff] }
 0x513   :  { %v1159_v16 = vsel %vm4127_vm5, %v1158_v50, %v1157_v12  ;;  %vm4134_vm5 = vcmp.gt.f32.partialorder %v3196_v36, 0.0 }
 0x518   :  { %v1005_v7 = vpop.xlane.xlu0 %1004  ;;  %v1114_v8 = vpop.xlane.xlu1 %1113 }
 0x519   :  { %v1160_v47 = vperm.slane %v1114_v8, %v3087_v39 }
 0x51b   :  { %v3587_v11 = vsel %vm4128_vm6, %v1160_v47, %v1159_v16  ;;  %v996_v47 = vmul.f32 %v3503_v52, %v3496_v22  ;;  %v1020_v16 = vpop.xlane.xlu2 %1019  ;;  %v2668_v22 = vld [vmem:[#allocation2 + $0x38] sm:$0xff] }
 0x51c   :  { %v1170_v20 = vadd.f32 %v3587_v11, %v1005_v7  ;;  %v1169_v27 = vadd.f32 %v3587_v11, %v1002_v61  ;;  %v1172_v17 = vadd.f32 %v3587_v11, %v1011_v40  ;;  %v2667_v7 = vld [vmem:[#allocation2 + $0x28] sm:$0xff]  ;;  %v1033_v40 = vsel %vm999_vm12, %v994_v15, 0.0 }
 0x51d   :  { %v1175_v58 = vadd.f32 %v3587_v11, %v1020_v16 }
 0x51e   :  { %v1186_v13 = vmul.f32 %v2662_v37, %v1170_v20  ;;  %v1185_v59 = vmul.f32 %v2663_v30, %v1169_v27  ;;  %v1188_v14 = vmul.f32 %v2664_v57, %v1172_v17  ;;  %v995_v17 = vmul.f32 %v3503_v52, %v3491_v0  ;;  %v2669_v30 = vld [vmem:[#allocation2 + $0x30] sm:$0xff] }
 0x520   :  { %v1014_v54 = vpop.xlane.xlu0 %1013  ;;  %v1008_v39 = vpop.xlane.xlu1 %1007  ;;  %vm1202_vm7 = vcmp.gt.f32.partialorder %v1186_v13, 0.0  ;;  %v1218_v19 = vmul.f32 0.2, %v1186_v13  ;;  %vm1201_vm8 = vcmp.gt.f32.partialorder %v1185_v59, 0.0  ;;  %v1217_v31 = vmul.f32 0.2, %v1185_v59 }
 0x521   :  { %v1173_v33 = vadd.f32 %v3587_v11, %v1014_v54  ;;  %v1171_v45 = vadd.f32 %v3587_v11, %v1008_v39  ;;  %vm1204_vm9 = vcmp.gt.f32.partialorder %v1188_v14, 0.0  ;;  %v1220_v28 = vmul.f32 0.2, %v1188_v14 }
 0x522   :  { %v1234_v21 = vsel %vm1202_vm7, %v1186_v13, %v1218_v19  ;;  %v1233_v6 = vsel %vm1201_vm8, %v1185_v59, %v1217_v31  ;;  %v1191_v59 = vmul.f32 %v2669_v30, %v1175_v58  ;;  %v1036_v57 = vsel %vm999_vm12, %v995_v17, 0.0 }
 0x523   :  { %v1189_v35 = vmul.f32 %v2665_v49, %v1173_v33  ;;  %v1187_v61 = vmul.f32 %v2666_v53, %v1171_v45  ;;  %v3596_v5 = vsel %vm527_vm14, %v1234_v21, -9e+15  ;;  %v3600_v56 = vsel %vm526_vm11, %v1233_v6, -9e+15 }
 0x524   :  { %1267 = vmax.xlane.f32.xlu2 %v3596_v5  ;;  %1265 = vmax.xlane.f32.xlu1 %v3600_v56  ;;  %v1236_v41 = vsel %vm1204_vm9, %v1188_v14, %v1220_v28  ;;  %vm4130_vm11 = vcmp.gt.f32.partialorder %v3145_v44, 0.0  ;;  %v993_v44 = vmul.f32 %v3503_v52, %v3479_v29  ;;  %v1039_v29 = vsel %vm999_vm12, %v996_v47, 0.0 }
 0x525   :  { %v3606_v60 = vsel %vm4129_vm10, %v1236_v41, -9e+15  ;;  %vm1203_vm13 = vcmp.gt.f32.partialorder %v1187_v61, 0.0  ;;  %v1219_v43 = vmul.f32 0.2, %v1187_v61  ;;  %vm1205_vm14 = vcmp.gt.f32.partialorder %v1189_v35, 0.0 }
 0x526   :  { %1271 = vmax.xlane.f32.xlu0 %v3606_v60  ;;  %v1221_v62 = vmul.f32 0.2, %v1189_v35  ;;  %v1030_v42 = vsel %vm999_vm12, %v993_v44, 0.0  ;;  %v1223_v39 = vmul.f32 0.2, %v1191_v59  ;;  %vm1207_vm3 = vcmp.gt.f32.partialorder %v1191_v59, 0.0 }
 0x527   :  { %v1235_v10 = vsel %vm1203_vm13, %v1187_v61, %v1219_v43  ;;  %v1042_v45 = vsel %vm999_vm12, %v997_v55, 0.0  ;;  %vm4135_vm8 = vcmp.gt.f32.partialorder %v3222_v34, 0.0  ;;  %vm4136_vm9 = vcmp.gt.f32.partialorder %v3232_v18, 0.0 }
 0x528   :  { %v1017_v9 = vpop.xlane.xlu1 %1016  ;;  %v1237_v26 = vsel %vm1205_vm14, %v1189_v35, %v1221_v62  ;;  %v3613_v50 = vsel %vm4130_vm11, %v1235_v10, -9e+15  ;;  %v1023_v12 = vpop.xlane.xlu0 %1022  ;;  %v1239_v0 = vsel %vm1207_vm3, %v1191_v59, %v1223_v39  ;;  %vm4137_vm13 = vcmp.gt.f32.partialorder %v3252_v3, 0.0 }
 0x529   :  { %v1174_v4 = vadd.f32 %v3587_v11, %v1017_v9  ;;  %v3620_v63 = vsel %vm4131_vm15, %v1237_v26, -9e+15  ;;  %v1176_v20 = vadd.f32 %v3587_v11, %v1023_v12  ;;  %v3648_v33 = vsel %vm4134_vm5, %v1239_v0, -9e+15  ;;  %v2671_v9 = vld [vmem:[#allocation2 + $0x48] sm:$0xff] }
 0x52a   :  { %vm4138_vm11 = vcmp.gt.f32.partialorder %v3276_v25, 0.0 }
 0x52b   :  { %v1190_v8 = vmul.f32 %v2667_v7, %v1174_v4  ;;  %v1192_v37 = vmul.f32 %v2668_v22, %v1176_v20  ;;  %v2673_v22 = vld [vmem:[#allocation2 + $0x58] sm:$0xff] }
 0x52c   :  { %1269 = vmax.xlane.f32.xlu2 %v3613_v50  ;;  %1028 = vadd.xlane.f32.xlu1 %v1027_v51 }
 0x52d   :  { %v1222_v27 = vmul.f32 0.2, %v1190_v8  ;;  %vm1206_vm0 = vcmp.gt.f32.partialorder %v1190_v8, 0.0  ;;  %v1224_v54 = vmul.f32 0.2, %v1192_v37  ;;  %vm1208_vm2 = vcmp.gt.f32.partialorder %v1192_v37, 0.0 }
 0x52e   :  { %1273 = vmax.xlane.f32.xlu0 %v3620_v63 }
 0x52f   :  { %v1238_v13 = vsel %vm1206_vm0, %v1190_v8, %v1222_v27  ;;  %v1240_v19 = vsel %vm1208_vm2, %v1192_v37, %v1224_v54  ;;  %v998_v8 = vmul.f32 %v3503_v52, %v3522_v46  ;;  %vm4140_vm2 = vcmp.gt.f32.partialorder %v3294_v38, 0.0 }
 0x530   :  { %v3639_v14 = vsel %vm4132_vm1, %v1238_v13, -9e+15  ;;  %v3644_v31 = vsel %vm4133_vm4, %v1240_v19, -9e+15  ;;  %v1026_v28 = vpop.xlane.xlu0 %1025  ;;  %vm4139_vm1 = vcmp.gt.f32.partialorder %v3300_v2, 0.0  ;;  %vm4141_vm4 = vcmp.gt.f32.partialorder %v3321_v23, 0.0 }
 0x531   :  { %v1177_v53 = vadd.f32 %v3587_v11, %v1026_v28  ;;  %v1045_v58 = vsel %vm999_vm12, %v998_v8, 0.0 }
 0x533   :  { %v1193_v62 = vmul.f32 %v2670_v1, %v1177_v53 }
 0x534   :  { %1034 = vadd.xlane.f32.xlu2 %v1033_v40  ;;  %1031 = vadd.xlane.f32.xlu1 %v1030_v42 }
 0x535   :  { %v1225_v4 = vmul.f32 0.2, %v1193_v62  ;;  %vm1209_vm7 = vcmp.gt.f32.partialorder %v1193_v62, 0.0 }
 0x536   :  { %1040 = vadd.xlane.f32.xlu0 %v1039_v29 }
 0x537   :  { %v1241_v42 = vsel %vm1209_vm7, %v1193_v62, %v1225_v4 }
 0x538   :  { %v3679_v52 = vsel %vm4136_vm9, %v1241_v42, -9e+15 }
 0x53c   :  { %1037 = vadd.xlane.f32.xlu2 %v1036_v57  ;;  %1275 = vmax.xlane.f32.xlu1 %v3639_v14 }
 0x544   :  { %1279 = vmax.xlane.f32.xlu2 %v3644_v31  ;;  %1277 = vmax.xlane.f32.xlu1 %v3648_v33 }
 0x54c   :  { %1043 = vadd.xlane.f32.xlu2 %v1042_v45 }
 0x597   :  { %v1266_v21 = vpop.xlane.xlu1 %1265  ;;  %v1268_v6 = vpop.xlane.xlu2 %1267 }
 0x598   :  { %v1297_v32 = vsub.f32 %v3600_v56, %v1266_v21  ;;  %v1298_v49 = vsub.f32 %v3596_v5, %v1268_v6 }
 0x599   :  { %v1272_v61 = vpop.xlane.xlu0 %1271 }
 0x59a   :  { %v1313_v36 = vmul.f32 1.442695, %v1297_v32  ;;  %v1315_v35 = vmul.f32 1.442695, %v1298_v49  ;;  %v1300_v15 = vsub.f32 %v3606_v60, %v1272_v61  ;;  %v2672_v60 = vld [vmem:[#allocation2 + $0x50] sm:$0xff]  ;;  %v2675_v32 = vld [vmem:[#allocation2 + $0x68] sm:$0xff] }
 0x59c   :  { %2470 = vpow2.f32 %v1313_v36  ;;  %v1319_v20 = vmul.f32 1.442695, %v1300_v15 }
 0x59d   :  { %2472 = vpow2.f32 %v1315_v35 }
 0x59f   :  { %v1029_v41 = vpop.xlane.xlu1 %1028  ;;  %v1270_v43 = vpop.xlane.xlu2 %1269 }
 0x5a0   :  { %v1178_v48 = vadd.f32 %v3587_v11, %v1029_v41  ;;  %v1299_v5 = vsub.f32 %v3613_v50, %v1270_v43 }
 0x5a1   :  { %v1274_v44 = vpop.xlane.xlu0 %1273 }
 0x5a2   :  { %v3659_v10 = vpop.eup %2470  ;;  %v1194_v26 = vmul.f32 %v2671_v9, %v1178_v48  ;;  %v1317_v50 = vmul.f32 1.442695, %v1299_v5  ;;  %v1301_v46 = vsub.f32 %v3620_v63, %v1274_v44 }
 0x5a3   :  { %v3661_v56 = vpop.eup %2472  ;;  %1345 = vadd.xlane.f32.xlu0 %v3659_v10 }
 0x5a4   :  { %1347 = vadd.xlane.f32.xlu1 %v3661_v56  ;;  %vm1210_vm6 = vcmp.gt.f32.partialorder %v1194_v26, 0.0  ;;  %v1226_v51 = vmul.f32 0.2, %v1194_v26  ;;  %2474 = vpow2.f32 %v1317_v50  ;;  %v1321_v57 = vmul.f32 1.442695, %v1301_v46  ;;  %v2677_v46 = vld [vmem:[#allocation2 + $0x78] sm:$0xff] }
 0x5a5   :  { %2476 = vpow2.f32 %v1319_v20 }
 0x5a6   :  { %v1242_v7 = vsel %vm1210_vm6, %v1194_v26, %v1226_v51  ;;  %v2676_v51 = vld [vmem:[#allocation2 + $0x70] sm:$0xff]  ;;  %vm4142_vm6 = vcmp.gt.f32.partialorder %v3340_v24, 0.0 }
 0x5a7   :  { %v1032_v12 = vpop.xlane.xlu1 %1031  ;;  %v1035_v47 = vpop.xlane.xlu2 %1034  ;;  %v3671_v16 = vsel %vm4135_vm8, %v1242_v7, -9e+15 }
 0x5a8   :  { %v1179_v40 = vadd.f32 %v3587_v11, %v1032_v12  ;;  %1283 = vmax.xlane.f32.xlu2 %v3671_v16  ;;  %v1180_v29 = vadd.f32 %v3587_v11, %v1035_v47 }
 0x5a9   :  { %v1041_v54 = vpop.xlane.xlu0 %1040 }
 0x5aa   :  { %v1195_v27 = vmul.f32 %v2672_v60, %v1179_v40  ;;  %v1196_v37 = vmul.f32 %v2673_v22, %v1180_v29  ;;  %v3689_v39 = vpop.eup %2474  ;;  %v1182_v3 = vadd.f32 %v3587_v11, %v1041_v54 }
 0x5ab   :  { %1046 = vadd.xlane.f32.xlu0 %v1045_v58  ;;  %v3691_v0 = vpop.eup %2476 }
 0x5ac   :  { %1281 = vmax.xlane.f32.xlu1 %v3679_v52  ;;  %vm1211_vm10 = vcmp.gt.f32.partialorder %v1195_v27, 0.0  ;;  %v1227_v34 = vmul.f32 0.2, %v1195_v27  ;;  %v1228_v55 = vmul.f32 0.2, %v1196_v37  ;;  %vm1212_vm14 = vcmp.gt.f32.partialorder %v1196_v37, 0.0 }
 0x5ad   :  { %v1198_v49 = vmul.f32 %v2675_v32, %v1182_v3 }
 0x5ae   :  { %v1243_v17 = vsel %vm1211_vm10, %v1195_v27, %v1227_v34  ;;  %v1244_v6 = vsel %vm1212_vm14, %v1196_v37, %v1228_v55 }
 0x5af   :  { %v1276_v13 = vpop.xlane.xlu1 %1275  ;;  %v1038_v30 = vpop.xlane.xlu2 %1037  ;;  %v3685_v59 = vsel %vm4137_vm13, %v1243_v17, -9e+15  ;;  %v3702_v61 = vsel %vm4138_vm11, %v1244_v6, -9e+15  ;;  %vm1214_vm0 = vcmp.gt.f32.partialorder %v1198_v49, 0.0 }
 0x5b0   :  { %v1302_v18 = vsub.f32 %v3639_v14, %v1276_v13  ;;  %1285 = vmax.xlane.f32.xlu2 %v3685_v59  ;;  %v1181_v63 = vadd.f32 %v3587_v11, %v1038_v30  ;;  %v2674_v14 = vld [vmem:[#allocation2 + $0x60] sm:$0xff] }
 0x5b2   :  { %v1323_v19 = vmul.f32 1.442695, %v1302_v18  ;;  %v1197_v45 = vmul.f32 %v2674_v14, %v1181_v63 }
 0x5b3   :  { %1349 = vadd.xlane.f32.xlu0 %v3689_v39 }
 0x5b4   :  { %2478 = vpow2.f32 %v1323_v19  ;;  %1351 = vadd.xlane.f32.xlu1 %v3691_v0  ;;  %v1229_v43 = vmul.f32 0.2, %v1197_v45  ;;  %vm1213_vm15 = vcmp.gt.f32.partialorder %v1197_v45, 0.0 }
 0x5b5   :  { %2480 = vpow2.f32 %v1321_v57 }
 0x5b6   :  { %v1245_v48 = vsel %vm1213_vm15, %v1197_v45, %v1229_v43 }
 0x5b7   :  { %v1278_v28 = vpop.xlane.xlu1 %1277  ;;  %v1280_v21 = vpop.xlane.xlu2 %1279  ;;  %v3715_v15 = vsel %vm4139_vm1, %v1245_v48, -9e+15 }
 0x5b8   :  { %v1303_v36 = vsub.f32 %v3648_v33, %v1278_v28  ;;  %v1304_v1 = vsub.f32 %v3644_v31, %v1280_v21  ;;  %v1230_v33 = vmul.f32 0.2, %v1198_v49 }
 0x5ba   :  { %v3698_v35 = vpop.eup %2478  ;;  %v1325_v53 = vmul.f32 1.442695, %v1303_v36  ;;  %v1327_v25 = vmul.f32 1.442695, %v1304_v1  ;;  %v1246_v26 = vsel %vm1214_vm0, %v1198_v49, %v1230_v33 }
 0x5bb   :  { %v3704_v41 = vpop.eup %2480  ;;  %1355 = vadd.xlane.f32.xlu2 %v3698_v35  ;;  %1287 = vmax.xlane.f32.xlu0 %v3702_v61  ;;  %v3720_v31 = vsel %vm4140_vm2, %v1246_v26, -9e+15 }
 0x5bc   :  { %2482 = vpow2.f32 %v1325_v53  ;;  %1353 = vadd.xlane.f32.xlu1 %v3704_v41 }
 0x5bd   :  { %2484 = vpow2.f32 %v1327_v25 }
 0x5bf   :  { %v1044_v62 = vpop.xlane.xlu2 %1043 }
 0x5c0   :  { %v1183_v9 = vadd.f32 %v3587_v11, %v1044_v62 }
 0x5c2   :  { %v3711_v5 = vpop.eup %2482  ;;  %v1199_v4 = vmul.f32 %v2676_v51, %v1183_v9 }
 0x5c3   :  { %1357 = vadd.xlane.f32.xlu2 %v3711_v5  ;;  %1289 = vmax.xlane.f32.xlu0 %v3715_v15  ;;  %v3724_v8 = vpop.eup %2484 }
 0x5c4   :  { %1291 = vmax.xlane.f32.xlu1 %v3720_v31  ;;  %v1231_v44 = vmul.f32 0.2, %v1199_v4  ;;  %vm1215_vm3 = vcmp.gt.f32.partialorder %v1199_v4, 0.0 }
 0x5c6   :  { %v1247_v7 = vsel %vm1215_vm3, %v1199_v4, %v1231_v44 }
 0x5c7   :  { %v3729_v2 = vsel %vm4141_vm4, %v1247_v7, -9e+15 }
 0x5cb   :  { %1359 = vadd.xlane.f32.xlu0 %v3724_v8 }
 0x5cc   :  { %1293 = vmax.xlane.f32.xlu1 %v3729_v2 }
 0x616   :  { %v1346_v38 = vpop.xlane.xlu0 %1345 }
 0x617   :  { %2486 = vrcp.f32 %v1346_v38  ;;  %v1348_v12 = vpop.xlane.xlu1 %1347 }
 0x618   :  { %2488 = vrcp.f32 %v1348_v12 }
 0x61b   :  { %v1284_v47 = vpop.xlane.xlu2 %1283 }
 0x61c   :  { %v1306_v50 = vsub.f32 %v3671_v16, %v1284_v47 }
 0x61d   :  { %v2487_v40 = vpop.eup %2486 }
 0x61e   :  { %v2489_v42 = vpop.eup %2488  ;;  %v1331_v20 = vmul.f32 1.442695, %v1306_v50  ;;  %v1047_v60 = vpop.xlane.xlu0 %1046  ;;  %v1393_v27 = vmul.f32 %v2487_v40, %v3659_v10 }
 0x61f   :  { %v1184_v58 = vadd.f32 %v3587_v11, %v1047_v60  ;;  %v1282_v23 = vpop.xlane.xlu1 %1281  ;;  %v1394_v29 = vmul.f32 %v2489_v42, %v3661_v56 }
 0x620   :  { %2490 = vpow2.f32 %v1331_v20  ;;  %v1305_v34 = vsub.f32 %v3679_v52, %v1282_v23 }
 0x621   :  { %v1200_v17 = vmul.f32 %v2677_v46, %v1184_v58  ;;  %v1409_v22 = vpack.c.bf16 %v1394_v29, %v1393_v27 }
 0x622   :  { %v1329_v37 = vmul.f32 1.442695, %v1305_v34 }
 0x623   :  { %1433 = vmatmul.bf16.vlgmr.msra.gmra.mxu3 %v1409_v22  ;;  %v1286_v16 = vpop.xlane.xlu2 %1285  ;;  %vm1216_vm5 = vcmp.gt.f32.partialorder %v1200_v17, 0.0  ;;  %v1232_v13 = vmul.f32 0.2, %v1200_v17 }
 0x624   :  { %2492 = vpow2.f32 %v1329_v37  ;;  %v1307_v30 = vsub.f32 %v3685_v59, %v1286_v16 }
 0x625   :  { %v1248_v10 = vsel %vm1216_vm5, %v1200_v17, %v1232_v13 }
 0x626   :  { %v3738_v18 = vpop.eup %2490  ;;  %v1333_v11 = vmul.f32 1.442695, %v1307_v30  ;;  %v1350_v57 = vpop.xlane.xlu0 %1349  ;;  %v3742_v56 = vsel %vm4142_vm6, %v1248_v10, -9e+15 }
 0x627   :  { %v1352_v52 = vpop.xlane.xlu1 %1351  ;;  %2494 = vrcp.f32 %v1350_v57  ;;  %1295 = vmax.xlane.f32.xlu2 %v3742_v56  ;;  %1363 = vadd.xlane.f32.xlu1 %v3738_v18 }
 0x628   :  { %2496 = vpow2.f32 %v1333_v11 }
 0x629   :  { %2498 = vrcp.f32 %v1352_v52 }
 0x62a   :  { %v3746_v54 = vpop.eup %2492 }
 0x62b   :  { %1361 = vadd.xlane.f32.xlu0 %v3746_v54 }
 0x62d   :  { %v2495_v59 = vpop.eup %2494 }
 0x62e   :  { %v3749_v19 = vpop.eup %2496  ;;  %v1288_v63 = vpop.xlane.xlu0 %1287  ;;  %v1395_v24 = vmul.f32 %v2495_v59, %v3689_v39 }
 0x62f   :  { %v2499_v55 = vpop.eup %2498  ;;  %v1354_v3 = vpop.xlane.xlu1 %1353  ;;  %v1308_v14 = vsub.f32 %v3702_v61, %v1288_v63  ;;  %1365 = vadd.xlane.f32.xlu2 %v3749_v19 }
 0x630   :  { %v1396_v45 = vmul.f32 %v2499_v55, %v3691_v0  ;;  %v1356_v21 = vpop.xlane.xlu2 %1355 }
 0x631   :  { %v1335_v28 = vmul.f32 1.442695, %v1308_v14 }
 0x632   :  { %v1410_v6 = vpack.c.bf16 %v1396_v45, %v1395_v24 }
 0x633   :  { %2500 = vpow2.f32 %v1335_v28 }
 0x634   :  { %2502 = vrcp.f32 %v1356_v21  ;;  %1438 = vmatmul.bf16.gmra.mxu3 %v1410_v6 }
 0x635   :  { %2504 = vrcp.f32 %v1354_v3 }
 0x636   :  { %v1290_v32 = vpop.xlane.xlu0 %1289 }
 0x637   :  { %v1292_v49 = vpop.xlane.xlu1 %1291  ;;  %v1309_v36 = vsub.f32 %v3715_v15, %v1290_v32 }
 0x638   :  { %v1310_v39 = vsub.f32 %v3720_v31, %v1292_v49  ;;  %v1358_v31 = vpop.xlane.xlu2 %1357 }
 0x639   :  { %v2501_v53 = vpop.eup %2500  ;;  %v1337_v43 = vmul.f32 1.442695, %v1309_v36 }
 0x63a   :  { %v2503_v61 = vpop.eup %2502  ;;  %v1339_v1 = vmul.f32 1.442695, %v1310_v39  ;;  %1367 = vadd.xlane.f32.xlu0 %v2501_v53 }
 0x63b   :  { %v2505_v33 = vpop.eup %2504  ;;  %2506 = vpow2.f32 %v1337_v43  ;;  %v1398_v62 = vmul.f32 %v2503_v61, %v3698_v35 }
 0x63c   :  { %2508 = vpow2.f32 %v1339_v1  ;;  %v1397_v0 = vmul.f32 %v2505_v33, %v3704_v41 }
 0x63e   :  { %v1360_v51 = vpop.xlane.xlu0 %1359  ;;  %v1411_v15 = vpack.c.bf16 %v1398_v62, %v1397_v0 }
 0x63f   :  { %v1294_v48 = vpop.xlane.xlu1 %1293 }
 0x640   :  { %v1311_v25 = vsub.f32 %v3729_v2, %v1294_v48 }
 0x641   :  { %v2507_v9 = vpop.eup %2506 }
 0x642   :  { %v2509_v26 = vpop.eup %2508  ;;  %v1341_v4 = vmul.f32 1.442695, %v1311_v25  ;;  %1369 = vadd.xlane.f32.xlu1 %v2507_v9 }
 0x643   :  { %1371 = vadd.xlane.f32.xlu2 %v2509_v26 }
 0x644   :  { %2510 = vpow2.f32 %v1341_v4  ;;  %1443 = vmatmul.bf16.gmra.mxu3 %v1411_v15 }
 0x645   :  { %2512 = vrcp.f32 %v1360_v51 }
 0x646   :  { %2514 = vrcp.f32 %v1358_v31 }
 0x64a   :  { %v2511_v44 = vpop.eup %2510 }
 0x64b   :  { %v2513_v7 = vpop.eup %2512  ;;  %1373 = vadd.xlane.f32.xlu0 %v2511_v44 }
 0x64c   :  { %v2515_v41 = vpop.eup %2514  ;;  %v1400_v35 = vmul.f32 %v2513_v7, %v3724_v8 }
 0x64d   :  { %v1399_v2 = vmul.f32 %v2515_v41, %v3711_v5 }
 0x64f   :  { %v1412_v38 = vpack.c.bf16 %v1400_v35, %v1399_v2 }
 0x654   :  { %1448 = vmatmul.bf16.gmra.mxu3 %v1412_v38 }
 0x69a   :  { %v1296_v12 = vpop.xlane.xlu2 %1295  ;;  %v1364_v47 = vpop.xlane.xlu1 %1363 }
 0x69b   :  { %v1312_v50 = vsub.f32 %v3742_v56, %v1296_v12  ;;  %2516 = vrcp.f32 %v1364_v47 }
 0x69d   :  { %v1343_v40 = vmul.f32 1.442695, %v1312_v50 }
 0x69e   :  { %v1362_v42 = vpop.xlane.xlu0 %1361 }
 0x69f   :  { %2518 = vpow2.f32 %v1343_v40 }
 0x6a0   :  { %2520 = vrcp.f32 %v1362_v42 }
 0x6a1   :  { %v2517_v20 = vpop.eup %2516 }
 0x6a2   :  { %v1402_v8 = vmul.f32 %v2517_v20, %v3738_v18  ;;  %v1366_v5 = vpop.xlane.xlu2 %1365 }
 0x6a3   :  { %2522 = vrcp.f32 %v1366_v5 }
 0x6a5   :  { %v2519_v60 = vpop.eup %2518 }
 0x6a6   :  { %v2521_v27 = vpop.eup %2520  ;;  %1375 = vadd.xlane.f32.xlu1 %v2519_v60  ;;  %v3766_v56 = vpop.f32.mrf.mxu3 }
 0x6a7   :  { %v1401_v58 = vmul.f32 %v2521_v27, %v3746_v54  ;;  %v1490_v2 = vmin.f32 %v3766_v56, 0.0  ;;  %vm1474_vm13 = vcmp.gt.f32.partialorder %v3766_v56, 0.0 }
 0x6a9   :  { %v1413_v23 = vpack.c.bf16 %v1402_v8, %v1401_v58  ;;  %v2523_v34 = vpop.eup %2522  ;;  %v1506_v47 = vmul.f32 1.442695, %v1490_v2 }
 0x6aa   :  { %v1403_v17 = vmul.f32 %v2523_v34, %v3749_v19 }
 0x6ab   :  { %1453 = vmatmul.bf16.gmra.mxu3 %v1413_v23 }
 0x6ad   :  { %v1368_v29 = vpop.xlane.xlu0 %1367 }
 0x6ae   :  { %2524 = vrcp.f32 %v1368_v29  ;;  %v3768_v52 = vpop.f32.mrf.mxu3 }
 0x6af   :  { %vm1475_vm6 = vcmp.gt.f32.partialorder %v3768_v52, 0.0 }
 0x6b4   :  { %v2525_v46 = vpop.eup %2524 }
 0x6b5   :  { %v1404_v22 = vmul.f32 %v2525_v46, %v2501_v53  ;;  %v1370_v16 = vpop.xlane.xlu1 %1369 }
 0x6b6   :  { %v1372_v13 = vpop.xlane.xlu2 %1371  ;;  %2526 = vrcp.f32 %v1370_v16 }
 0x6b7   :  { %v1414_v37 = vpack.c.bf16 %v1404_v22, %v1403_v17  ;;  %2528 = vrcp.f32 %v1372_v13  ;;  %v3770_v54 = vpop.f32.mrf.mxu3 }
 0x6b8   :  { %vm1476_vm4 = vcmp.gt.f32.partialorder %v3770_v54, 0.0 }
 0x6bb   :  { %1458 = vmatmul.bf16.gmra.mxu3 %v1414_v37 }
 0x6bc   :  { %v2527_v30 = vpop.eup %2526 }
 0x6bd   :  { %v2529_v10 = vpop.eup %2528  ;;  %v1405_v18 = vmul.f32 %v2527_v30, %v2507_v9 }
 0x6be   :  { %v1406_v11 = vmul.f32 %v2529_v10, %v2509_v26  ;;  %v1374_v24 = vpop.xlane.xlu0 %1373 }
 0x6bf   :  { %v3772_v59 = vpop.f32.mrf.mxu3  ;;  %2530 = vrcp.f32 %v1374_v24 }
 0x6c0   :  { %v1415_v57 = vpack.c.bf16 %v1406_v11, %v1405_v18 }
 0x6c5   :  { %v2531_v14 = vpop.eup %2530 }
 0x6c6   :  { %v1407_v28 = vmul.f32 %v2531_v14, %v2511_v44 }
 0x6c7   :  { %v3774_v19 = vpop.f32.mrf.mxu3 }
 0x6c8   :  { %vm1478_vm5 = vcmp.gt.f32.partialorder %v3774_v19, 0.0 }
 0x6cb   :  { %1463 = vmatmul.bf16.gmra.mxu3 %v1415_v57 }
 0x6cf   :  { %v1446_v63 = vpop.f32.mrf.mxu3 }
 0x6d0   :  { %v1495_v51 = vmin.f32 %v1446_v63, 0.0  ;;  %vm1479_vm10 = vcmp.gt.f32.partialorder %v1446_v63, 0.0 }
 0x6d2   :  { %v1516_v44 = vmul.f32 1.442695, %v1495_v51 }
 0x6d7   :  { %v1449_v3 = vpop.f32.mrf.mxu3 }
 0x6d8   :  { %v1496_v62 = vmin.f32 %v1449_v3, 0.0  ;;  %vm1480_vm9 = vcmp.gt.f32.partialorder %v1449_v3, 0.0 }
 0x6da   :  { %v1518_v48 = vmul.f32 1.442695, %v1496_v62 }
 0x6df   :  { %v3776_v32 = vpop.f32.mrf.mxu3 }
 0x6e0   :  { %vm1481_vm2 = vcmp.gt.f32.partialorder %v3776_v32, 0.0 }
 0x719   :  { %v1376_v55 = vpop.xlane.xlu1 %1375 }
 0x71a   :  { %2532 = vrcp.f32 %v1376_v55 }
 0x720   :  { %v2533_v45 = vpop.eup %2532 }
 0x721   :  { %v1408_v21 = vmul.f32 %v2533_v45, %v2519_v60  ;;  %v1497_v45 = vmin.f32 %v3776_v32, 0.0 }
 0x723   :  { %v1416_v6 = vpack.c.bf16 %v1408_v21, %v1407_v28 }
 0x725   :  { %1468 = vmatmul.bf16.gmra.mxu3 %v1416_v6 }
 0x72e   :  { %v3778_v49 = vpop.f32.mrf.mxu3 }
 0x72f   :  { %v1498_v10 = vmin.f32 %v3778_v49, 0.0  ;;  %vm1482_vm0 = vcmp.gt.f32.partialorder %v3778_v49, 0.0 }
 0x731   :  { %v1522_v57 = vmul.f32 1.442695, %v1498_v10 }
 0x736   :  { %v3780_v36 = vpop.f32.mrf.mxu3 }
 0x737   :  { %v1499_v21 = vmin.f32 %v3780_v36, 0.0  ;;  %vm1483_vm3 = vcmp.gt.f32.partialorder %v3780_v36, 0.0 }
 0x73e   :  { %v3782_v39 = vpop.f32.mrf.mxu3 }
 0x73f   :  { %v1500_v11 = vmin.f32 %v3782_v39, 0.0  ;;  %vm1484_vm1 = vcmp.gt.f32.partialorder %v3782_v39, 0.0 }
 0x746   :  { %v1461_v53 = vpop.f32.mrf.mxu3 }
 0x747   :  { %v1501_v43 = vmin.f32 %v1461_v53, 0.0  ;;  %vm1485_vm8 = vcmp.gt.f32.partialorder %v1461_v53, 0.0 }
 0x749   :  { %v1528_v61 = vmul.f32 1.442695, %v1501_v43 }
 0x74b   :  { %2534 = vpow2.f32 %v1528_v61  ;;  %v1520_v61 = vmul.f32 1.442695, %v1497_v45 }
 0x74e   :  { %v1464_v1 = vpop.f32.mrf.mxu3 }
 0x74f   :  { %v1502_v33 = vmin.f32 %v1464_v1, 0.0  ;;  %vm1486_vm7 = vcmp.gt.f32.partialorder %v1464_v1, 0.0 }
 0x751   :  { %v1530_v0 = vmul.f32 1.442695, %v1502_v33  ;;  %v2535_v25 = vpop.eup %2534  ;;  %v1524_v33 = vmul.f32 1.442695, %v1499_v21 }
 0x752   :  { %v2325_v4 = vadd.f32 -1.0, %v2535_v25 }
 0x753   :  { %2536 = vpow2.f32 %v1530_v0 }
 0x754   :  { %2538 = vpow2.f32 %v1518_v48  ;;  %v3789_v41 = vsel %vm1485_vm8, %v1461_v53, %v2325_v4 }
 0x755   :  { %2540 = vpow2.f32 %v1516_v44  ;;  %v1581_v38 = vmul.f32 %v3789_v41, %v3789_v41 }
 0x756   :  { %2542 = vpow2.f32 %v1506_v47  ;;  %v1466_v22 = vpop.f32.mrf.mxu3 }
 0x757   :  { %v1619_v50 = vsel %vm999_vm12, %v1581_v38, 0.0  ;;  %v1503_v37 = vmin.f32 %v1466_v22, 0.0  ;;  %vm1487_vm11 = vcmp.gt.f32.partialorder %v1466_v22, 0.0 }
 0x759   :  { %v2537_v9 = vpop.eup %2536  ;;  %v1532_v16 = vmul.f32 1.442695, %v1503_v37 }
 0x75a   :  { %v2326_v26 = vadd.f32 -1.0, %v2537_v9  ;;  %v2539_v35 = vpop.eup %2538  ;;  %v1492_v9 = vmin.f32 %v3770_v54, 0.0 }
 0x75b   :  { %v2320_v12 = vadd.f32 -1.0, %v2539_v35  ;;  %v2541_v42 = vpop.eup %2540  ;;  %2544 = vpow2.f32 %v1532_v16 }
 0x75c   :  { %v3784_v15 = vsel %vm1486_vm7, %v1464_v1, %v2326_v26  ;;  %v2319_v60 = vadd.f32 -1.0, %v2541_v42  ;;  %v2543_v8 = vpop.eup %2542  ;;  %v1494_v26 = vmin.f32 %v3774_v19, 0.0  ;;  %v1510_v2 = vmul.f32 1.442695, %v1492_v9 }
 0x75d   :  { %v1582_v31 = vmul.f32 %v3784_v15, %v3784_v15  ;;  %v3795_v40 = vsel %vm1480_vm9, %v1449_v3, %v2320_v12  ;;  %v2314_v23 = vadd.f32 -1.0, %v2543_v8  ;;  %v1493_v8 = vmin.f32 %v3772_v59, 0.0 }
 0x75e   :  { %v1576_v20 = vmul.f32 %v3795_v40, %v3795_v40  ;;  %v3800_v58 = vsel %vm1479_vm10, %v1446_v63, %v2319_v60  ;;  %v1514_v38 = vmul.f32 1.442695, %v1494_v26  ;;  %vm1477_vm7 = vcmp.gt.f32.partialorder %v3772_v59, 0.0 }
 0x75f   :  { %v1622_v7 = vsel %vm999_vm12, %v1582_v31, 0.0  ;;  %v1575_v5 = vmul.f32 %v3800_v58, %v3800_v58  ;;  %v3807_v34 = vsel %vm1474_vm13, %v3766_v56, %v2314_v23  ;;  %v1526_v56 = vmul.f32 1.442695, %v1500_v11 }
 0x760   :  { %1623 = vadd.xlane.f32.xlu1 %v1622_v7  ;;  %v1604_v27 = vsel %vm999_vm12, %v1576_v20, 0.0  ;;  %v1570_v46 = vmul.f32 %v3807_v34, %v3807_v34 }
 0x761   :  { %v1601_v29 = vsel %vm999_vm12, %v1575_v5, 0.0  ;;  %v2545_v55 = vpop.eup %2544 }
 0x762   :  { %v1586_v17 = vsel %vm999_vm12, %v1570_v46, 0.0  ;;  %v2327_v6 = vadd.f32 -1.0, %v2545_v55 }
 0x764   :  { %v3821_v48 = vsel %vm1487_vm11, %v1466_v22, %v2327_v6 }
 0x765   :  { %v1583_v4 = vmul.f32 %v3821_v48, %v3821_v48 }
 0x767   :  { %v1625_v12 = vsel %vm999_vm12, %v1583_v4, 0.0 }
 0x768   :  { %1620 = vadd.xlane.f32.xlu1 %v1619_v50 }
 0x770   :  { %1605 = vadd.xlane.f32.xlu1 %v1604_v27  ;;  %v1491_v27 = vmin.f32 %v3768_v52, 0.0 }
 0x778   :  { %1602 = vadd.xlane.f32.xlu1 %v1601_v29 }
 0x780   :  { %1587 = vadd.xlane.f32.xlu1 %v1586_v17  ;;  %v1512_v17 = vmul.f32 1.442695, %v1493_v8 }
 0x7a8   :  { %v1469_v13 = vpop.f32.mrf.mxu3 }
 0x7a9   :  { %v1504_v30 = vmin.f32 %v1469_v13, 0.0  ;;  %vm1488_vm14 = vcmp.gt.f32.partialorder %v1469_v13, 0.0 }
 0x7ab   :  { %v1534_v18 = vmul.f32 1.442695, %v1504_v30 }
 0x7ad   :  { %2546 = vpow2.f32 %v1534_v18 }
 0x7ae   :  { %2548 = vpow2.f32 %v1522_v57 }
 0x7af   :  { %2550 = vpow2.f32 %v1526_v56 }
 0x7b0   :  { %v1471_v63 = vpop.f32.mrf.mxu3 }
 0x7b1   :  { %v1505_v24 = vmin.f32 %v1471_v63, 0.0  ;;  %vm1489_vm15 = vcmp.gt.f32.partialorder %v1471_v63, 0.0 }
 0x7b3   :  { %v2547_v3 = vpop.eup %2546  ;;  %v1536_v14 = vmul.f32 1.442695, %v1505_v24 }
 0x7b4   :  { %v2328_v28 = vadd.f32 -1.0, %v2547_v3  ;;  %v2549_v1 = vpop.eup %2548 }
 0x7b5   :  { %2552 = vpow2.f32 %v1536_v14  ;;  %v2551_v62 = vpop.eup %2550  ;;  %v2322_v31 = vadd.f32 -1.0, %v2549_v1 }
 0x7b6   :  { %v3816_v53 = vsel %vm1488_vm14, %v1469_v13, %v2328_v28  ;;  %2554 = vpow2.f32 %v1520_v61  ;;  %v2324_v44 = vadd.f32 -1.0, %v2551_v62 }
 0x7b7   :  { %v1584_v43 = vmul.f32 %v3816_v53, %v3816_v53  ;;  %2556 = vpow2.f32 %v1524_v33  ;;  %v3836_v42 = vsel %vm1482_vm0, %v3778_v49, %v2322_v31  ;;  %v1508_v49 = vmul.f32 1.442695, %v1491_v27 }
 0x7b8   :  { %v3839_v20 = vsel %vm1484_vm1, %v3782_v39, %v2324_v44  ;;  %2558 = vpow2.f32 %v1510_v2  ;;  %v1578_v5 = vmul.f32 %v3836_v42, %v3836_v42 }
 0x7b9   :  { %v1628_v0 = vsel %vm999_vm12, %v1584_v43, 0.0  ;;  %2560 = vpow2.f32 %v1514_v38  ;;  %v1580_v23 = vmul.f32 %v3839_v20, %v3839_v20 }
 0x7ba   :  { %1629 = vadd.xlane.f32.xlu2 %v1628_v0  ;;  %v1610_v39 = vsel %vm999_vm12, %v1578_v5, 0.0  ;;  %2562 = vpow2.f32 %v1508_v49 }
 0x7bb   :  { %v2553_v25 = vpop.eup %2552  ;;  %v1616_v22 = vsel %vm999_vm12, %v1580_v23, 0.0  ;;  %2564 = vpow2.f32 %v1512_v17 }
 0x7bc   :  { %v2329_v51 = vadd.f32 -1.0, %v2553_v25  ;;  %v2555_v50 = vpop.eup %2554 }
 0x7bd   :  { %v2557_v60 = vpop.eup %2556  ;;  %v2321_v29 = vadd.f32 -1.0, %v2555_v50 }
 0x7be   :  { %v3827_v7 = vsel %vm1489_vm15, %v1471_v63, %v2329_v51  ;;  %v2323_v46 = vadd.f32 -1.0, %v2557_v60  ;;  %v2559_v37 = vpop.eup %2558 }
 0x7bf   :  { %v1585_v35 = vmul.f32 %v3827_v7, %v3827_v7  ;;  %v3852_v16 = vsel %vm1481_vm2, %v3776_v32, %v2321_v29  ;;  %v2561_v30 = vpop.eup %2560  ;;  %v2316_v11 = vadd.f32 -1.0, %v2559_v37 }
 0x7c0   :  { %v3855_v13 = vsel %vm1483_vm3, %v3780_v36, %v2323_v46  ;;  %v1577_v10 = vmul.f32 %v3852_v16, %v3852_v16  ;;  %v2318_v57 = vadd.f32 -1.0, %v2561_v30  ;;  %v2563_v56 = vpop.eup %2562 }
 0x7c1   :  { %v1631_v47 = vsel %vm999_vm12, %v1585_v35, 0.0  ;;  %v1579_v18 = vmul.f32 %v3855_v13, %v3855_v13  ;;  %v3866_v63 = vsel %vm1476_vm4, %v3770_v54, %v2316_v11  ;;  %v2565_v55 = vpop.eup %2564  ;;  %v2315_v21 = vadd.f32 -1.0, %v2563_v56 }
 0x7c2   :  { %1626 = vadd.xlane.f32.xlu2 %v1625_v12  ;;  %1632 = vadd.xlane.f32.xlu0 %v1631_v47  ;;  %v1607_v32 = vsel %vm999_vm12, %v1577_v10, 0.0  ;;  %v3869_v24 = vsel %vm1478_vm5, %v3774_v19, %v2318_v57  ;;  %v1572_v45 = vmul.f32 %v3866_v63, %v3866_v63  ;;  %v2317_v6 = vadd.f32 -1.0, %v2565_v55 }
 0x7c3   :  { %v1613_v36 = vsel %vm999_vm12, %v1579_v18, 0.0  ;;  %v1574_v28 = vmul.f32 %v3869_v24, %v3869_v24  ;;  %v3880_v43 = vsel %vm1475_vm6, %v3768_v52, %v2315_v21 }
 0x7c4   :  { %v1592_v54 = vsel %vm999_vm12, %v1572_v45, 0.0  ;;  %v3883_v61 = vsel %vm1477_vm7, %v3772_v59, %v2317_v6  ;;  %v1571_v25 = vmul.f32 %v3880_v43, %v3880_v43 }
 0x7c5   :  { %v1598_v19 = vsel %vm999_vm12, %v1574_v28, 0.0  ;;  %v1573_v9 = vmul.f32 %v3883_v61, %v3883_v61 }
 0x7c6   :  { %v1589_v4 = vsel %vm999_vm12, %v1571_v25, 0.0 }
 0x7c7   :  { %v1595_v52 = vsel %vm999_vm12, %v1573_v9, 0.0 }
 0x7ca   :  { %1611 = vadd.xlane.f32.xlu2 %v1610_v39  ;;  %1617 = vadd.xlane.f32.xlu0 %v1616_v22 }
 0x7d2   :  { %1608 = vadd.xlane.f32.xlu2 %v1607_v32  ;;  %1614 = vadd.xlane.f32.xlu0 %v1613_v36 }
 0x7d3   :  { %v1624_v3 = vpop.xlane.xlu1 %1623 }
 0x7d4   :  { %v1646_v14 = vmax.f32 %v1624_v3, 1e-24 }
 0x7d6   :  { %2566 = vrsqrt.f32 %v1646_v14  ;;  %vm1776_vm9 = vweird.f32 %v1646_v14 }
 0x7da   :  { %1593 = vadd.xlane.f32.xlu2 %v1592_v54  ;;  %1599 = vadd.xlane.f32.xlu0 %v1598_v19 }
 0x7db   :  { %v1621_v1 = vpop.xlane.xlu1 %1620 }
 0x7dc   :  { %v2567_v33 = vpop.eup %2566  ;;  %v1645_v0 = vmax.f32 %v1621_v1, 1e-24 }
 0x7dd   :  { %v1771_v62 = vmul.f32 %v2567_v33, %v1646_v14  ;;  %vm1777_vm8 = vweird.f32 %v2567_v33 }
 0x7de   :  { %2568 = vrsqrt.f32 %v1645_v0  ;;  %vm1778_vm10 = vmor %vm1776_vm9, %vm1777_vm8  ;;  %vm1766_vm14 = vweird.f32 %v1645_v0 }
 0x7df   :  { %v1772_v26 = vmul.f32 %v2567_v33, %v1771_v62 }
 0x7e1   :  { %v1773_v51 = vmul.f32 0.5, %v1772_v26 }
 0x7e2   :  { %1590 = vadd.xlane.f32.xlu2 %v1589_v4  ;;  %1596 = vadd.xlane.f32.xlu0 %v1595_v52 }
 0x7e3   :  { %v1774_v59 = vsub.f32 1.5, %v1773_v51  ;;  %v1606_v31 = vpop.xlane.xlu1 %1605 }
 0x7e4   :  { %v2569_v44 = vpop.eup %2568  ;;  %v1640_v35 = vmax.f32 %v1606_v31, 1e-24 }
 0x7e5   :  { %v1761_v2 = vmul.f32 %v2569_v44, %v1645_v0  ;;  %v1775_v38 = vmul.f32 %v2567_v33, %v1774_v59  ;;  %vm1767_vm13 = vweird.f32 %v2569_v44 }
 0x7e6   :  { %2570 = vrsqrt.f32 %v1640_v35  ;;  %vm1768_vm11 = vmor %vm1766_vm14, %vm1767_vm13  ;;  %vm1716_vm0 = vweird.f32 %v1640_v35 }
 0x7e7   :  { %v1762_v12 = vmul.f32 %v2569_v44, %v1761_v2  ;;  %v1779_v47 = vsel %vm1778_vm10, %v2567_v33, %v1775_v38 }
 0x7e8   :  { %v3892_v50 = vmul.f32 %v1779_v47, %v3784_v15 }
 0x7e9   :  { %v1763_v60 = vmul.f32 0.5, %v1762_v12 }
 0x7ea   :  { %2239 = vst.msk [vmem:[%s4102_s10 + $0x60] sm:$0xff] %vm999_vm12, %v3892_v50 }
 0x7eb   :  { %v1764_v27 = vsub.f32 1.5, %v1763_v60  ;;  %v1603_v8 = vpop.xlane.xlu1 %1602 }
 0x7ec   :  { %v2571_v5 = vpop.eup %2570  ;;  %v1639_v23 = vmax.f32 %v1603_v8, 1e-24 }
 0x7ed   :  { %v1711_v29 = vmul.f32 %v2571_v5, %v1640_v35  ;;  %v1765_v46 = vmul.f32 %v2569_v44, %v1764_v27  ;;  %vm1717_vm15 = vweird.f32 %v2571_v5 }
 0x7ee   :  { %2572 = vrsqrt.f32 %v1639_v23  ;;  %vm1718_vm1 = vmor %vm1716_vm0, %vm1717_vm15  ;;  %vm1706_vm3 = vweird.f32 %v1639_v23 }
 0x7ef   :  { %v1712_v49 = vmul.f32 %v2571_v5, %v1711_v29  ;;  %v1769_v15 = vsel %vm1768_vm11, %v2569_v44, %v1765_v46 }
 0x7f0   :  { %v3900_v17 = vmul.f32 %v1769_v15, %v3789_v41 }
 0x7f1   :  { %v1713_v39 = vmul.f32 0.5, %v1712_v49 }
 0x7f2   :  { %2238 = vst.msk [vmem:[%s4102_s10 + $0x58] sm:$0xff] %vm999_vm12, %v3900_v17 }
 0x7f3   :  { %v1714_v22 = vsub.f32 1.5, %v1713_v39  ;;  %v1588_v37 = vpop.xlane.xlu1 %1587 }
 0x7f4   :  { %v2573_v30 = vpop.eup %2572  ;;  %v1634_v10 = vmax.f32 %v1588_v37, 1e-24 }
 0x7f5   :  { %v1701_v18 = vmul.f32 %v2573_v30, %v1639_v23  ;;  %v1715_v11 = vmul.f32 %v2571_v5, %v1714_v22  ;;  %vm1707_vm2 = vweird.f32 %v2573_v30 }
 0x7f6   :  { %2574 = vrsqrt.f32 %v1634_v10  ;;  %vm1708_vm4 = vmor %vm1706_vm3, %vm1707_vm2  ;;  %vm1656_vm6 = vweird.f32 %v1634_v10 }
 0x7f7   :  { %v1702_v57 = vmul.f32 %v2573_v30, %v1701_v18  ;;  %v1719_v41 = vsel %vm1718_vm1, %v2571_v5, %v1715_v11 }
 0x7f8   :  { %v3908_v32 = vmul.f32 %v1719_v41, %v3795_v40 }
 0x7f9   :  { %v1703_v36 = vmul.f32 0.5, %v1702_v57 }
 0x7fa   :  { %2233 = vst.msk [vmem:[%s4102_s10 + $0x30] sm:$0xff] %vm999_vm12, %v3908_v32 }
 0x7fb   :  { %v1704_v56 = vsub.f32 1.5, %v1703_v36 }
 0x7fc   :  { %v2575_v55 = vpop.eup %2574 }
 0x7fd   :  { %v1651_v3 = vmul.f32 %v2575_v55, %v1634_v10  ;;  %v1705_v14 = vmul.f32 %v2573_v30, %v1704_v56  ;;  %vm1657_vm5 = vweird.f32 %v2575_v55 }
 0x7fe   :  { %vm1658_vm7 = vmor %vm1656_vm6, %vm1657_vm5 }
 0x7ff   :  { %v1652_v45 = vmul.f32 %v2575_v55, %v1651_v3  ;;  %v1709_v28 = vsel %vm1708_vm4, %v2573_v30, %v1705_v14 }
 0x800   :  { %v3916_v21 = vmul.f32 %v1709_v28, %v3800_v58 }
 0x801   :  { %v1653_v40 = vmul.f32 0.5, %v1652_v45 }
 0x802   :  { %2232 = vst.msk [vmem:[%s4102_s10 + $0x28] sm:$0xff] %vm999_vm12, %v3916_v21 }
 0x803   :  { %v1654_v6 = vsub.f32 1.5, %v1653_v40 }
 0x805   :  { %v1655_v54 = vmul.f32 %v2575_v55, %v1654_v6 }
 0x807   :  { %v1659_v19 = vsel %vm1658_vm7, %v2575_v55, %v1655_v54 }
 0x808   :  { %v3924_v1 = vmul.f32 %v1659_v19, %v3807_v34 }
 0x80a   :  { %2227 = vst.msk [vmem:[%s4102_s10] sm:$0xff] %vm999_vm12, %v3924_v1 }
 0x82d   :  { %v1630_v58 = vpop.xlane.xlu2 %1629 }
 0x82e   :  { %v1648_v33 = vmax.f32 %v1630_v58, 1e-24 }
 0x830   :  { %2576 = vrsqrt.f32 %v1648_v33  ;;  %vm1796_vm9 = vweird.f32 %v1648_v33 }
 0x835   :  { %v1627_v0 = vpop.xlane.xlu2 %1626  ;;  %v1633_v62 = vpop.xlane.xlu0 %1632 }
 0x836   :  { %v2577_v25 = vpop.eup %2576  ;;  %v1647_v9 = vmax.f32 %v1627_v0, 1e-24  ;;  %v1649_v26 = vmax.f32 %v1633_v62, 1e-24 }
 0x837   :  { %v1791_v51 = vmul.f32 %v2577_v25, %v1648_v33  ;;  %vm1797_vm8 = vweird.f32 %v2577_v25 }
 0x838   :  { %2578 = vrsqrt.f32 %v1647_v9  ;;  %vm1798_vm10 = vmor %vm1796_vm9, %vm1797_vm8  ;;  %vm1786_vm11 = vweird.f32 %v1647_v9  ;;  %vm1806_vm0 = vweird.f32 %v1649_v26 }
 0x839   :  { %v1792_v4 = vmul.f32 %v2577_v25, %v1791_v51  ;;  %2580 = vrsqrt.f32 %v1649_v26 }
 0x83b   :  { %v1793_v34 = vmul.f32 0.5, %v1792_v4 }
 0x83d   :  { %v1794_v52 = vsub.f32 1.5, %v1793_v34  ;;  %v1612_v59 = vpop.xlane.xlu2 %1611  ;;  %v1618_v31 = vpop.xlane.xlu0 %1617 }
 0x83e   :  { %v2579_v44 = vpop.eup %2578  ;;  %v3931_v35 = vmax.f32 %v1612_v59, 1e-24  ;;  %v3933_v2 = vmax.f32 %v1618_v31, 1e-24 }
 0x83f   :  { %v2581_v38 = vpop.eup %2580  ;;  %v1781_v12 = vmul.f32 %v2579_v44, %v1647_v9  ;;  %v1795_v47 = vmul.f32 %v2577_v25, %v1794_v52  ;;  %vm1787_vm13 = vweird.f32 %v2579_v44 }
 0x840   :  { %v1801_v60 = vmul.f32 %v2581_v38, %v1649_v26  ;;  %2582 = vrsqrt.f32 %v3931_v35  ;;  %vm1807_vm14 = vweird.f32 %v2581_v38  ;;  %vm1788_vm15 = vmor %vm1786_vm11, %vm1787_vm13  ;;  %vm1736_vm3 = vweird.f32 %v3931_v35 }
 0x841   :  { %v1782_v27 = vmul.f32 %v2579_v44, %v1781_v12  ;;  %2584 = vrsqrt.f32 %v3933_v2  ;;  %v1799_v8 = vsel %vm1798_vm10, %v2577_v25, %v1795_v47  ;;  %vm1808_vm1 = vmor %vm1806_vm0, %vm1807_vm14  ;;  %vm1756_vm6 = vweird.f32 %v3933_v2 }
 0x842   :  { %v1802_v5 = vmul.f32 %v2581_v38, %v1801_v60  ;;  %v1824_v23 = vmul.f32 %v1799_v8, %v3816_v53 }
 0x843   :  { %v1783_v29 = vmul.f32 0.5, %v1782_v27 }
 0x844   :  { %v1803_v46 = vmul.f32 0.5, %v1802_v5  ;;  %2241 = vst.msk [vmem:[%s4102_s10 + $0x70] sm:$0xff] %vm999_vm12, %v1824_v23 }
 0x845   :  { %v1784_v49 = vsub.f32 1.5, %v1783_v29  ;;  %v1609_v15 = vpop.xlane.xlu2 %1608  ;;  %v1615_v39 = vpop.xlane.xlu0 %1614 }
 0x846   :  { %v2583_v22 = vpop.eup %2582  ;;  %v1804_v37 = vsub.f32 1.5, %v1803_v46  ;;  %v3942_v30 = vmax.f32 %v1609_v15, 1e-24  ;;  %v3944_v10 = vmax.f32 %v1615_v39, 1e-24 }
 0x847   :  { %v2585_v18 = vpop.eup %2584  ;;  %v1731_v53 = vmul.f32 %v2583_v22, %v3931_v35  ;;  %v1785_v11 = vmul.f32 %v2579_v44, %v1784_v49  ;;  %vm1737_vm2 = vweird.f32 %v2583_v22 }
 0x848   :  { %v1751_v57 = vmul.f32 %v2585_v18, %v3933_v2  ;;  %2586 = vrsqrt.f32 %v3942_v30  ;;  %v1805_v36 = vmul.f32 %v2581_v38, %v1804_v37  ;;  %vm1757_vm4 = vweird.f32 %v2585_v18  ;;  %vm1738_vm5 = vmor %vm1736_vm3, %vm1737_vm2 }
 0x849   :  { %v1732_v41 = vmul.f32 %v2583_v22, %v1731_v53  ;;  %2588 = vrsqrt.f32 %v3944_v10  ;;  %v1789_v55 = vsel %vm1788_vm15, %v2579_v44, %v1785_v11  ;;  %vm1758_vm7 = vmor %vm1756_vm6, %vm1757_vm4  ;;  %vm1726_vm9 = vweird.f32 %v3942_v30 }
 0x84a   :  { %v1752_v56 = vmul.f32 %v2585_v18, %v1751_v57  ;;  %v1809_v14 = vsel %vm1808_vm1, %v2581_v38, %v1805_v36  ;;  %v1823_v45 = vmul.f32 %v1789_v55, %v3821_v48  ;;  %vm1746_vm14 = vweird.f32 %v3944_v10 }
 0x84b   :  { %v1733_v3 = vmul.f32 0.5, %v1732_v41  ;;  %v1825_v40 = vmul.f32 %v1809_v14, %v3827_v7 }
 0x84c   :  { %v1753_v28 = vmul.f32 0.5, %v1752_v56  ;;  %2240 = vst.msk [vmem:[%s4102_s10 + $0x68] sm:$0xff] %vm999_vm12, %v1823_v45  ;;  %v3979_v27 = vpack.c.bf16 %v1823_v45, %v3892_v50 }
 0x84d   :  { %v1734_v6 = vsub.f32 1.5, %v1733_v3  ;;  %v1594_v54 = vpop.xlane.xlu2 %1593  ;;  %v1600_v19 = vpop.xlane.xlu0 %1599  ;;  %v3960_v25 = vpack.c.bf16 %v1825_v40, %v1824_v23  ;;  %2242 = vst.msk [vmem:[%s4102_s10 + $0x78] sm:$0xff] %vm999_vm12, %v1825_v40 }
 0x84e   :  { %v2587_v58 = vpop.eup %2586  ;;  %v1754_v33 = vsub.f32 1.5, %v1753_v28  ;;  %v3956_v0 = vmax.f32 %v1594_v54, 1e-24  ;;  %v3958_v62 = vmax.f32 %v1600_v19, 1e-24  ;;  %v1853_v15 = vsel %vm999_vm12, %v3979_v27, 0 }
 0x84f   :  { %v2589_v48 = vpop.eup %2588  ;;  %v1721_v7 = vmul.f32 %v2587_v58, %v3942_v30  ;;  %v1735_v9 = vmul.f32 %v2583_v22, %v1734_v6  ;;  %v1856_v4 = vsel %vm999_vm12, %v3960_v25, 0  ;;  %vm1727_vm8 = vweird.f32 %v2587_v58 }
 0x850   :  { %v1741_v26 = vmul.f32 %v2589_v48, %v3944_v10  ;;  %2590 = vrsqrt.f32 %v3956_v0  ;;  %1858 = vmatpush.bf16.xpose.msrb.mxu2 %v1856_v4  ;;  %2358 = vmatpush.bf16.xpose.msrb.mxu3 %v1856_v4  ;;  %v1755_v52 = vmul.f32 %v2585_v18, %v1754_v33  ;;  %vm1747_vm10 = vweird.f32 %v2589_v48  ;;  %vm1728_vm13 = vmor %vm1726_vm9, %vm1727_vm8 }
 0x851   :  { %v1722_v51 = vmul.f32 %v2587_v58, %v1721_v7  ;;  %2592 = vrsqrt.f32 %v3958_v62  ;;  %v1739_v59 = vsel %vm1738_vm5, %v2583_v22, %v1735_v9  ;;  %vm1748_vm11 = vmor %vm1746_vm14, %vm1747_vm10  ;;  %vm1676_vm1 = vweird.f32 %v3956_v0 }
 0x852   :  { %v1742_v34 = vmul.f32 %v2589_v48, %v1741_v26  ;;  %v3976_v44 = vmul.f32 %v1739_v59, %v3836_v42  ;;  %v1759_v38 = vsel %vm1758_vm7, %v2585_v18, %v1755_v52  ;;  %vm1696_vm3 = vweird.f32 %v3958_v62 }
 0x853   :  { %v1723_v31 = vmul.f32 0.5, %v1722_v51  ;;  %v1820_v2 = vmul.f32 %v1759_v38, %v3839_v20 }
 0x854   :  { %v1743_v35 = vmul.f32 0.5, %v1742_v34  ;;  %2235 = vst.msk [vmem:[%s4102_s10 + $0x40] sm:$0xff] %vm999_vm12, %v3976_v44 }
 0x855   :  { %v1724_v12 = vsub.f32 1.5, %v1723_v31  ;;  %v1591_v47 = vpop.xlane.xlu2 %1590  ;;  %v1597_v60 = vpop.xlane.xlu0 %1596  ;;  %2237 = vst.msk [vmem:[%s4102_s10 + $0x50] sm:$0xff] %vm999_vm12, %v1820_v2  ;;  %v4005_v41 = vpack.c.bf16 %v3900_v17, %v1820_v2 }
 0x856   :  { %v2591_v8 = vpop.eup %2590  ;;  %v1744_v42 = vsub.f32 1.5, %v1743_v35  ;;  %v3987_v5 = vmax.f32 %v1591_v47, 1e-24  ;;  %v3989_v23 = vmax.f32 %v1597_v60, 1e-24 }
 0x857   :  { %v2593_v29 = vpop.eup %2592  ;;  %v1671_v46 = vmul.f32 %v2591_v8, %v3956_v0  ;;  %v1725_v20 = vmul.f32 %v2587_v58, %v1724_v12  ;;  %vm1677_vm15 = vweird.f32 %v2591_v8  ;;  %v1850_v45 = vsel %vm999_vm12, %v4005_v41, 0 }
 0x858   :  { %v1691_v50 = vmul.f32 %v2593_v29, %v3958_v62  ;;  %2594 = vrsqrt.f32 %v3987_v5  ;;  %1859 = vmatpush.bf16.xpose.msrb.mxu2 %v1853_v15  ;;  %2359 = vmatpush.bf16.xpose.msrb.mxu3 %v1853_v15  ;;  %v1745_v22 = vmul.f32 %v2589_v48, %v1744_v42  ;;  %vm1697_vm0 = vweird.f32 %v2593_v29  ;;  %vm1678_vm2 = vmor %vm1676_vm1, %vm1677_vm15 }
 0x859   :  { %v1672_v49 = vmul.f32 %v2591_v8, %v1671_v46  ;;  %2596 = vrsqrt.f32 %v3989_v23  ;;  %v1729_v37 = vsel %vm1728_vm13, %v2587_v58, %v1725_v20  ;;  %vm1698_vm4 = vmor %vm1696_vm3, %vm1697_vm0  ;;  %vm1666_vm7 = vweird.f32 %v3987_v5 }
 0x85a   :  { %v1692_v39 = vmul.f32 %v2593_v29, %v1691_v50  ;;  %v1817_v18 = vmul.f32 %v1729_v37, %v3852_v16  ;;  %v1749_v11 = vsel %vm1748_vm11, %v2589_v48, %v1745_v22  ;;  %vm1686_vm9 = vweird.f32 %v3989_v23 }
 0x85b   :  { %v1673_v30 = vmul.f32 0.5, %v1672_v49  ;;  %v1819_v36 = vmul.f32 %v1749_v11, %v3855_v13 }
 0x85c   :  { %v1693_v53 = vmul.f32 0.5, %v1692_v39  ;;  %2234 = vst.msk [vmem:[%s4102_s10 + $0x38] sm:$0xff] %vm999_vm12, %v1817_v18  ;;  %v1829_v34 = vpack.c.bf16 %v1817_v18, %v3908_v32 }
 0x85d   :  { %v1674_v57 = vsub.f32 1.5, %v1673_v30  ;;  %2236 = vst.msk [vmem:[%s4102_s10 + $0x48] sm:$0xff] %vm999_vm12, %v1819_v36  ;;  %v1830_v62 = vpack.c.bf16 %v1819_v36, %v3976_v44 }
 0x85e   :  { %v2595_v10 = vpop.eup %2594  ;;  %v1694_v56 = vsub.f32 1.5, %v1693_v53  ;;  %v1844_v52 = vsel %vm999_vm12, %v1829_v34, 0 }
 0x85f   :  { %v2597_v55 = vpop.eup %2596  ;;  %v1661_v16 = vmul.f32 %v2595_v10, %v3987_v5  ;;  %v1675_v3 = vmul.f32 %v2591_v8, %v1674_v57  ;;  %vm1667_vm5 = vweird.f32 %v2595_v10  ;;  %v1847_v7 = vsel %vm999_vm12, %v1830_v62, 0 }
 0x860   :  { %v1681_v13 = vmul.f32 %v2597_v55, %v3989_v23  ;;  %v1695_v17 = vmul.f32 %v2593_v29, %v1694_v56  ;;  %1860 = vmatpush.bf16.xpose.msrb.mxu2 %v1850_v45  ;;  %2360 = vmatpush.bf16.xpose.msrb.mxu3 %v1850_v45  ;;  %vm1687_vm6 = vweird.f32 %v2597_v55  ;;  %vm1668_vm8 = vmor %vm1666_vm7, %vm1667_vm5 }
 0x861   :  { %v1662_v14 = vmul.f32 %v2595_v10, %v1661_v16  ;;  %v1679_v6 = vsel %vm1678_vm2, %v2591_v8, %v1675_v3  ;;  %vm1688_vm10 = vmor %vm1686_vm9, %vm1687_vm6 }
 0x862   :  { %v1682_v28 = vmul.f32 %v2597_v55, %v1681_v13  ;;  %v1699_v40 = vsel %vm1698_vm4, %v2593_v29, %v1695_v17  ;;  %v1812_v58 = vmul.f32 %v1679_v6, %v3866_v63 }
 0x863   :  { %v1663_v54 = vmul.f32 0.5, %v1662_v14  ;;  %v1814_v19 = vmul.f32 %v1699_v40, %v3869_v24 }
 0x864   :  { %v1683_v33 = vmul.f32 0.5, %v1682_v28  ;;  %2229 = vst.msk [vmem:[%s4102_s10 + $0x10] sm:$0xff] %vm999_vm12, %v1812_v58 }
 0x865   :  { %v1664_v0 = vsub.f32 1.5, %v1663_v54  ;;  %2231 = vst.msk [vmem:[%s4102_s10 + $0x20] sm:$0xff] %vm999_vm12, %v1814_v19 }
 0x866   :  { %v1684_v48 = vsub.f32 1.5, %v1683_v33 }
 0x867   :  { %v1665_v24 = vmul.f32 %v2595_v10, %v1664_v0 }
 0x868   :  { %v1685_v63 = vmul.f32 %v2597_v55, %v1684_v48  ;;  %1861 = vmatpush.bf16.xpose.msrb.mxu2 %v1847_v7  ;;  %2361 = vmatpush.bf16.xpose.msrb.mxu3 %v1847_v7 }
 0x869   :  { %v1669_v9 = vsel %vm1668_vm8, %v2595_v10, %v1665_v24 }
 0x86a   :  { %v1689_v26 = vsel %vm1688_vm10, %v2597_v55, %v1685_v63  ;;  %v1811_v51 = vmul.f32 %v1669_v9, %v3880_v43  ;;  %v1828_v43 = vpack.c.bf16 %v3916_v21, %v1814_v19 }
 0x86b   :  { %v1813_v4 = vmul.f32 %v1689_v26, %v3883_v61 }
 0x86c   :  { %2228 = vst.msk [vmem:[%s4102_s10 + $0x8] sm:$0xff] %vm999_vm12, %v1811_v51  ;;  %v1841_v61 = vsel %vm999_vm12, %v1828_v43, 0  ;;  %v1826_v32 = vpack.c.bf16 %v1811_v51, %v3924_v1 }
 0x86d   :  { %2230 = vst.msk [vmem:[%s4102_s10 + $0x18] sm:$0xff] %vm999_vm12, %v1813_v4  ;;  %v1827_v59 = vpack.c.bf16 %v1813_v4, %v1812_v58  ;;  %s2733_s10 = smov [#allocation5]  }
 0x86e   :  { %v1835_v44 = vsel %vm999_vm12, %v1826_v32, 0  ;;  %s2247_s17 = sshll.u32 %s2733_s10, 4  ;;  %s2248_s17 = int_to_ptr.vmem [resolvable:$true] %s2247_s17 }
 0x86f   :  { %v1838_v31 = vsel %vm999_vm12, %v1827_v59, 0 }
 0x870   :  { %1862 = vmatpush.bf16.xpose.msrb.mxu2 %v1844_v52  ;;  %2362 = vmatpush.bf16.xpose.msrb.mxu3 %v1844_v52 }
 0x878   :  { %1863 = vmatpush.bf16.xpose.msrb.mxu2 %v1841_v61  ;;  %2363 = vmatpush.bf16.xpose.msrb.mxu3 %v1841_v61 }
 0x880   :  { %1864 = vmatpush.bf16.xpose.msrb.mxu2 %v1838_v31  ;;  %2364 = vmatpush.bf16.xpose.msrb.mxu3 %v1838_v31 }
 0x888   :  { %1865 = vmatpush.bf16.xpose.msrb.mxu2 %v1835_v44  ;;  %2365 = vmatpush.bf16.xpose.msrb.mxu3 %v1835_v44 }
 0x88f   :  { %2330 = vmatmul.msk.bf16.vlgmr.msrb.gmra.mxu2 %vm999_vm12, %v1826_v32  ;;  %2337 = vmatmul.msk.bf16.vlgmr.msrb.gmra.mxu3 %vm999_vm12, %v3960_v25 }
 0x89f   :  { %2331 = vmatmul.msk.bf16.gmra.mxu2 %vm999_vm12, %v1827_v59 }
 0x8af   :  { %2332 = vmatmul.msk.bf16.gmra.mxu2 %vm999_vm12, %v1828_v43 }
 0x8bf   :  { %2333 = vmatmul.msk.bf16.gmra.mxu2 %vm999_vm12, %v1829_v34 }
 0x8cf   :  { %2334 = vmatmul.msk.bf16.gmra.mxu2 %vm999_vm12, %v1830_v62 }
 0x8df   :  { %2335 = vmatmul.msk.bf16.gmra.mxu2 %vm999_vm12, %v4005_v41 }
 0x8ef   :  { %2336 = vmatmul.msk.bf16.gmra.mxu2 %vm999_vm12, %v3979_v27 }
 0x912   :  { %v1867_v21 = vpop.f32.mrf.mxu2  ;;  %v1902_v1 = vpop.f32.mrf.mxu3 }
 0x913   :  { %v2338_v35 = vmul.f32 -1.442695, %v1867_v21  ;;  %v2352_v38 = vmul.f32 -1.442695, %v1902_v1 }
 0x915   :  { %2598 = vpow2.f32 %v2338_v35 }
 0x916   :  { %2600 = vpow2.f32 %v2352_v38 }
 0x91a   :  { %v1869_v25 = vpop.f32.mrf.mxu2  ;;  %v1904_v12 = vpop.f32.mrf.mxu3 }
 0x91b   :  { %v2599_v47 = vpop.eup %2598  ;;  %v2339_v60 = vmul.f32 -1.442695, %v1869_v25  ;;  %v2353_v42 = vmul.f32 -1.442695, %v1904_v12 }
 0x91c   :  { %v2601_v2 = vpop.eup %2600  ;;  %v1955_v8 = vadd.f32 1.0, %v2599_v47 }
 0x91d   :  { %v1969_v5 = vadd.f32 1.0, %v2601_v2  ;;  %2602 = vpow2.f32 %v2339_v60 }
 0x91e   :  { %2604 = vrcp.f32 %v1955_v8  ;;  %v1980_v30 = vand.u32 2147483647, %v1955_v8  ;;  %v1982_v18 = vand.u32 2147483648, %v1955_v8  ;;  %vm1976_vm14 = vweird.f32 %v1955_v8 }
 0x91f   :  { %2606 = vrcp.f32 %v1969_v5  ;;  %v2192_v57 = vand.u32 2147483648, %v1969_v5  ;;  %v2190_v36 = vand.u32 2147483647, %v1969_v5  ;;  %vm2186_vm11 = vweird.f32 %v1969_v5 }
 0x920   :  { %2608 = vpow2.f32 %v2353_v42  ;;  %vm1981_vm0 = vcmp.eq.f32.partialorder %v1980_v30, 8.507059e+37  ;;  %v1983_v17 = vor.u32 1.1754944e-38, %v1982_v18 }
 0x921   :  { %v2193_v28 = vor.u32 1.1754944e-38, %v2192_v57  ;;  %vm2191_vm2 = vcmp.eq.f32.partialorder %v2190_v36, 8.507059e+37 }
 0x922   :  { %v1872_v23 = vpop.f32.mrf.mxu2 }
 0x923   :  { %v2603_v27 = vpop.eup %2602  ;;  %v2340_v29 = vmul.f32 -1.442695, %v1872_v23 }
 0x924   :  { %v2605_v46 = vpop.eup %2604  ;;  %v4064_v20 = vadd.f32 1.0, %v2603_v27 }
 0x925   :  { %v2607_v50 = vpop.eup %2606  ;;  %v1972_v49 = vmul.f32 %v2605_v46, %v1955_v8  ;;  %2610 = vpow2.f32 %v2340_v29  ;;  %vm1977_vm12 = vweird.f32 %v2605_v46 }
 0x926   :  { %v2609_v15 = vpop.eup %2608  ;;  %v2182_v39 = vmul.f32 %v2607_v50, %v1969_v5  ;;  %2612 = vrcp.f32 %v4064_v20  ;;  %vm2187_vm13 = vweird.f32 %v2607_v50  ;;  %vm1978_vm15 = vmor %vm1976_vm14, %vm1977_vm12  ;;  %v1997_v0 = vand.u32 2147483648, %v4064_v20 }
 0x927   :  { %v1973_v22 = vsub.f32 1.0, %v1972_v49  ;;  %v4067_v37 = vadd.f32 1.0, %v2609_v15  ;;  %vm2188_vm1 = vmor %vm2186_vm11, %vm2187_vm13  ;;  %v1995_v24 = vand.u32 2147483647, %v4064_v20  ;;  %vm1991_vm4 = vweird.f32 %v4064_v20 }
 0x928   :  { %v2183_v53 = vsub.f32 1.0, %v2182_v39  ;;  %v1998_v51 = vor.u32 1.1754944e-38, %v1997_v0 }
 0x929   :  { %v1974_v11 = vmul.f32 %v2605_v46, %v1973_v22  ;;  %2614 = vrcp.f32 %v4067_v37  ;;  %v2207_v4 = vand.u32 2147483648, %v4067_v37  ;;  %v2205_v61 = vand.u32 2147483647, %v4067_v37 }
 0x92a   :  { %v2184_v41 = vmul.f32 %v2607_v50, %v2183_v53  ;;  %v1874_v10 = vpop.f32.mrf.mxu2  ;;  %vm1996_vm7 = vcmp.eq.f32.partialorder %v1995_v24, 8.507059e+37  ;;  %vm2201_vm8 = vweird.f32 %v4067_v37 }
 0x92b   :  { %v2611_v56 = vpop.eup %2610  ;;  %v1975_v55 = vadd.f32 %v2605_v46, %v1974_v11  ;;  %v2341_v16 = vmul.f32 -1.442695, %v1874_v10  ;;  %v2208_v1 = vor.u32 1.1754944e-38, %v2207_v4  ;;  %vm2206_vm10 = vcmp.eq.f32.partialorder %v2205_v61, 8.507059e+37 }
 0x92c   :  { %v2613_v13 = vpop.eup %2612  ;;  %v2185_v3 = vadd.f32 %v2607_v50, %v2184_v41  ;;  %v4070_v14 = vadd.f32 1.0, %v2611_v56 }
 0x92d   :  { %v1979_v45 = vsel %vm1978_vm15, %v2605_v46, %v1975_v55  ;;  %v1987_v40 = vmul.f32 %v2613_v13, %v4064_v20  ;;  %2616 = vpow2.f32 %v2341_v16  ;;  %vm1992_vm3 = vweird.f32 %v2613_v13 }
 0x92e   :  { %v1984_v6 = vsel %vm1981_vm0, %v1983_v17, %v1979_v45  ;;  %v2189_v54 = vsel %vm2188_vm1, %v2607_v50, %v2185_v3  ;;  %2618 = vrcp.f32 %v4070_v14  ;;  %vm1993_vm5 = vmor %vm1991_vm4, %vm1992_vm3  ;;  %v2012_v25 = vand.u32 2147483648, %v4070_v14 }
 0x92f   :  { %v2615_v19 = vpop.eup %2614  ;;  %2211 = vst [vmem:[#allocation5] sm:$0xff] %v1984_v6  ;;  %v2194_v58 = vsel %vm2191_vm2, %v2193_v28, %v2189_v54  ;;  %v1988_v33 = vsub.f32 1.0, %v1987_v40  ;;  %v2010_v60 = vand.u32 2147483647, %v4070_v14  ;;  %vm2006_vm13 = vweird.f32 %v4070_v14 }
 0x930   :  { %2225 = vst [vmem:[#allocation5 + $0x70] sm:$0xff] %v2194_v58  ;;  %v2197_v62 = vmul.f32 %v2615_v19, %v4067_v37  ;;  %vm2202_vm6 = vweird.f32 %v2615_v19  ;;  %v2013_v27 = vor.u32 1.1754944e-38, %v2012_v25 }
 0x931   :  { %v1989_v48 = vmul.f32 %v2613_v13, %v1988_v33  ;;  %vm2203_vm9 = vmor %vm2201_vm8, %vm2202_vm6  ;;  %vm2011_vm11 = vcmp.eq.f32.partialorder %v2010_v60, 8.507059e+37 }
 0x932   :  { %v2198_v63 = vsub.f32 1.0, %v2197_v62  ;;  %v1877_v7 = vpop.f32.mrf.mxu2 }
 0x933   :  { %v2617_v9 = vpop.eup %2616  ;;  %v1990_v26 = vadd.f32 %v2613_v13, %v1989_v48  ;;  %v2342_v34 = vmul.f32 -1.442695, %v1877_v7 }
 0x934   :  { %v2619_v52 = vpop.eup %2618  ;;  %v2199_v43 = vmul.f32 %v2615_v19, %v2198_v63  ;;  %v1958_v59 = vadd.f32 1.0, %v2617_v9 }
 0x935   :  { %v1994_v31 = vsel %vm1993_vm5, %v2613_v13, %v1990_v26  ;;  %v2002_v32 = vmul.f32 %v2619_v52, %v4070_v14  ;;  %2620 = vpow2.f32 %v2342_v34  ;;  %vm2007_vm12 = vweird.f32 %v2619_v52 }
 0x936   :  { %v1999_v44 = vsel %vm1996_vm7, %v1998_v51, %v1994_v31  ;;  %v2200_v21 = vadd.f32 %v2615_v19, %v2199_v43  ;;  %2622 = vrcp.f32 %v1958_v59  ;;  %vm2008_vm14 = vmor %vm2006_vm13, %vm2007_vm12  ;;  %v2027_v15 = vand.u32 2147483648, %v1958_v59 }
 0x937   :  { %2212 = vst [vmem:[#allocation5 + $0x8] sm:$0xff] %v1999_v44  ;;  %v2003_v35 = vsub.f32 1.0, %v2002_v32  ;;  %v2025_v22 = vand.u32 2147483647, %v1958_v59  ;;  %vm2021_vm0 = vweird.f32 %v1958_v59 }
 0x938   :  { %v2204_v38 = vsel %vm2203_vm9, %v2615_v19, %v2200_v21  ;;  %v2028_v57 = vor.u32 1.1754944e-38, %v2027_v15 }
 0x939   :  { %v2209_v12 = vsel %vm2206_vm10, %v2208_v1, %v2204_v38  ;;  %v2004_v47 = vmul.f32 %v2619_v52, %v2003_v35  ;;  %vm2026_vm2 = vcmp.eq.f32.partialorder %v2025_v22, 8.507059e+37 }
 0x93a   :  { %2226 = vst [vmem:[#allocation5 + $0x78] sm:$0xff] %v2209_v12  ;;  %v1879_v2 = vpop.f32.mrf.mxu2 }
 0x93b   :  { %v2621_v8 = vpop.eup %2620  ;;  %v2005_v42 = vadd.f32 %v2619_v52, %v2004_v47  ;;  %v2343_v5 = vmul.f32 -1.442695, %v1879_v2 }
 0x93c   :  { %v2623_v23 = vpop.eup %2622  ;;  %v1959_v29 = vadd.f32 1.0, %v2621_v8 }
 0x93d   :  { %v2009_v46 = vsel %vm2008_vm14, %v2619_v52, %v2005_v42  ;;  %v2017_v20 = vmul.f32 %v2623_v23, %v1958_v59  ;;  %2624 = vpow2.f32 %v2343_v5  ;;  %vm2022_vm15 = vweird.f32 %v2623_v23 }
 0x93e   :  { %v2014_v50 = vsel %vm2011_vm11, %v2013_v27, %v2009_v46  ;;  %2626 = vrcp.f32 %v1959_v29  ;;  %vm2023_vm1 = vmor %vm2021_vm0, %vm2022_vm15  ;;  %v2042_v16 = vand.u32 2147483648, %v1959_v29  ;;  %v2040_v17 = vand.u32 2147483647, %v1959_v29 }
 0x93f   :  { %2213 = vst [vmem:[#allocation5 + $0x10] sm:$0xff] %v2014_v50  ;;  %v2018_v49 = vsub.f32 1.0, %v2017_v20  ;;  %vm2036_vm4 = vweird.f32 %v1959_v29 }
 0x940   :  { %v2043_v6 = vor.u32 1.1754944e-38, %v2042_v16  ;;  %vm2041_vm6 = vcmp.eq.f32.partialorder %v2040_v17, 8.507059e+37 }
 0x941   :  { %v2019_v39 = vmul.f32 %v2623_v23, %v2018_v49 }
 0x942   :  { %v1882_v37 = vpop.f32.mrf.mxu2 }
 0x943   :  { %v2625_v30 = vpop.eup %2624  ;;  %v2020_v18 = vadd.f32 %v2623_v23, %v2019_v39  ;;  %v2344_v53 = vmul.f32 -1.442695, %v1882_v37 }
 0x944   :  { %v2627_v11 = vpop.eup %2626  ;;  %v1960_v41 = vadd.f32 1.0, %v2625_v30 }
 0x945   :  { %v2024_v36 = vsel %vm2023_vm1, %v2623_v23, %v2020_v18  ;;  %v2032_v10 = vmul.f32 %v2627_v11, %v1959_v29  ;;  %2628 = vpow2.f32 %v2344_v53  ;;  %vm2037_vm3 = vweird.f32 %v2627_v11 }
 0x946   :  { %v2029_v56 = vsel %vm2026_vm2, %v2028_v57, %v2024_v36  ;;  %2630 = vrcp.f32 %v1960_v41  ;;  %vm2038_vm5 = vmor %vm2036_vm4, %vm2037_vm3  ;;  %v2057_v62 = vand.u32 2147483648, %v1960_v41  ;;  %v2055_v24 = vand.u32 2147483647, %v1960_v41 }
 0x947   :  { %2214 = vst [vmem:[#allocation5 + $0x18] sm:$0xff] %v2029_v56  ;;  %v2033_v55 = vsub.f32 1.0, %v2032_v10  ;;  %vm2051_vm8 = vweird.f32 %v1960_v41 }
 0x948   :  { %v2058_v4 = vor.u32 1.1754944e-38, %v2057_v62  ;;  %vm2056_vm10 = vcmp.eq.f32.partialorder %v2055_v24, 8.507059e+37 }
 0x949   :  { %v2034_v13 = vmul.f32 %v2627_v11, %v2033_v55 }
 0x94a   :  { %v1884_v3 = vpop.f32.mrf.mxu2 }
 0x94b   :  { %v2629_v14 = vpop.eup %2628  ;;  %v2035_v45 = vadd.f32 %v2627_v11, %v2034_v13  ;;  %v2345_v28 = vmul.f32 -1.442695, %v1884_v3 }
 0x94c   :  { %v2631_v40 = vpop.eup %2630  ;;  %v1961_v54 = vadd.f32 1.0, %v2629_v14 }
 0x94d   :  { %v2039_v19 = vsel %vm2038_vm5, %v2627_v11, %v2035_v45  ;;  %v2047_v58 = vmul.f32 %v2631_v40, %v1960_v41  ;;  %2632 = vpow2.f32 %v2345_v28  ;;  %vm2052_vm7 = vweird.f32 %v2631_v40 }
 0x94e   :  { %v2044_v33 = vsel %vm2041_vm6, %v2043_v6, %v2039_v19  ;;  %2634 = vrcp.f32 %v1961_v54  ;;  %vm2053_vm9 = vmor %vm2051_vm8, %vm2052_vm7  ;;  %v2072_v31 = vand.u32 2147483648, %v1961_v54  ;;  %v2070_v44 = vand.u32 2147483647, %v1961_v54 }
 0x94f   :  { %2215 = vst [vmem:[#allocation5 + $0x20] sm:$0xff] %v2044_v33  ;;  %v2048_v0 = vsub.f32 1.0, %v2047_v58  ;;  %vm2066_vm13 = vweird.f32 %v1961_v54 }
 0x950   :  { %v2073_v12 = vor.u32 1.1754944e-38, %v2072_v31  ;;  %vm2071_vm11 = vcmp.eq.f32.partialorder %v2070_v44, 8.507059e+37 }
 0x951   :  { %v2049_v48 = vmul.f32 %v2631_v40, %v2048_v0 }
 0x952   :  { %v1887_v63 = vpop.f32.mrf.mxu2 }
 0x953   :  { %v2633_v7 = vpop.eup %2632  ;;  %v2050_v9 = vadd.f32 %v2631_v40, %v2049_v48  ;;  %v2346_v26 = vmul.f32 -1.442695, %v1887_v63 }
 0x954   :  { %v2635_v51 = vpop.eup %2634  ;;  %v1962_v34 = vadd.f32 1.0, %v2633_v7 }
 0x955   :  { %v2054_v52 = vsel %vm2053_vm9, %v2631_v40, %v2050_v9  ;;  %v2062_v43 = vmul.f32 %v2635_v51, %v1961_v54  ;;  %2636 = vpow2.f32 %v2346_v26  ;;  %vm2067_vm12 = vweird.f32 %v2635_v51 }
 0x956   :  { %v2059_v61 = vsel %vm2056_vm10, %v2058_v4, %v2054_v52  ;;  %2638 = vrcp.f32 %v1962_v34  ;;  %vm2068_vm14 = vmor %vm2066_vm13, %vm2067_vm12  ;;  %v2087_v5 = vand.u32 2147483648, %v1962_v34  ;;  %v2085_v27 = vand.u32 2147483647, %v1962_v34 }
 0x957   :  { %2216 = vst [vmem:[#allocation5 + $0x28] sm:$0xff] %v2059_v61  ;;  %v2063_v59 = vsub.f32 1.0, %v2062_v43  ;;  %vm2081_vm0 = vweird.f32 %v1962_v34 }
 0x958   :  { %v2088_v15 = vor.u32 1.1754944e-38, %v2087_v5  ;;  %vm2086_vm2 = vcmp.eq.f32.partialorder %v2085_v27, 8.507059e+37 }
 0x959   :  { %v2064_v32 = vmul.f32 %v2635_v51, %v2063_v59 }
 0x95a   :  { %v1889_v21 = vpop.f32.mrf.mxu2 }
 0x95b   :  { %v2637_v1 = vpop.eup %2636  ;;  %v2065_v35 = vadd.f32 %v2635_v51, %v2064_v32  ;;  %v2347_v38 = vmul.f32 -1.442695, %v1889_v21 }
 0x95c   :  { %v2639_v25 = vpop.eup %2638  ;;  %v1963_v47 = vadd.f32 1.0, %v2637_v1 }
 0x95d   :  { %v2069_v60 = vsel %vm2068_vm14, %v2635_v51, %v2065_v35  ;;  %v2077_v2 = vmul.f32 %v2639_v25, %v1962_v34  ;;  %2640 = vpow2.f32 %v2347_v38  ;;  %vm2082_vm15 = vweird.f32 %v2639_v25 }
 0x95e   :  { %v2074_v8 = vsel %vm2071_vm11, %v2073_v12, %v2069_v60  ;;  %2642 = vrcp.f32 %v1963_v47  ;;  %vm2083_vm1 = vmor %vm2081_vm0, %vm2082_vm15  ;;  %v2102_v53 = vand.u32 2147483648, %v1963_v47  ;;  %v2100_v57 = vand.u32 2147483647, %v1963_v47 }
 0x95f   :  { %2217 = vst [vmem:[#allocation5 + $0x30] sm:$0xff] %v2074_v8  ;;  %v2078_v42 = vsub.f32 1.0, %v2077_v2  ;;  %vm2096_vm4 = vweird.f32 %v1963_v47 }
 0x960   :  { %v2103_v16 = vor.u32 1.1754944e-38, %v2102_v53  ;;  %vm2101_vm6 = vcmp.eq.f32.partialorder %v2100_v57, 8.507059e+37 }
 0x961   :  { %v2079_v23 = vmul.f32 %v2639_v25, %v2078_v42 }
 0x962   :  { %v1892_v29 = vpop.f32.mrf.mxu2 }
 0x963   :  { %v2641_v46 = vpop.eup %2640  ;;  %v2080_v20 = vadd.f32 %v2639_v25, %v2079_v23  ;;  %v2348_v50 = vmul.f32 -1.442695, %v1892_v29 }
 0x964   :  { %v2643_v49 = vpop.eup %2642  ;;  %v1964_v39 = vadd.f32 1.0, %v2641_v46 }
 0x965   :  { %v2084_v22 = vsel %vm2083_vm1, %v2639_v25, %v2080_v20  ;;  %v2092_v37 = vmul.f32 %v2643_v49, %v1963_v47  ;;  %2644 = vpow2.f32 %v2348_v50  ;;  %vm2097_vm3 = vweird.f32 %v2643_v49 }
 0x966   :  { %v2089_v30 = vsel %vm2086_vm2, %v2088_v15, %v2084_v22  ;;  %2646 = vrcp.f32 %v1964_v39  ;;  %vm2098_vm5 = vmor %vm2096_vm4, %vm2097_vm3  ;;  %v2117_v28 = vand.u32 2147483648, %v1964_v39  ;;  %v2115_v6 = vand.u32 2147483647, %v1964_v39 }
 0x967   :  { %2218 = vst [vmem:[#allocation5 + $0x38] sm:$0xff] %v2089_v30  ;;  %v2093_v18 = vsub.f32 1.0, %v2092_v37  ;;  %vm2111_vm8 = vweird.f32 %v1964_v39 }
 0x968   :  { %v2118_v62 = vor.u32 1.1754944e-38, %v2117_v28  ;;  %vm2116_vm10 = vcmp.eq.f32.partialorder %v2115_v6, 8.507059e+37 }
 0x969   :  { %v2094_v11 = vmul.f32 %v2643_v49, %v2093_v18 }
 0x96a   :  { %v1894_v41 = vpop.f32.mrf.mxu2 }
 0x96b   :  { %v2645_v36 = vpop.eup %2644  ;;  %v2095_v10 = vadd.f32 %v2643_v49, %v2094_v11  ;;  %v2349_v56 = vmul.f32 -1.442695, %v1894_v41 }
 0x96c   :  { %v2647_v55 = vpop.eup %2646  ;;  %v1965_v13 = vadd.f32 1.0, %v2645_v36 }
 0x96d   :  { %v2099_v17 = vsel %vm2098_vm5, %v2643_v49, %v2095_v10  ;;  %v2107_v3 = vmul.f32 %v2647_v55, %v1964_v39  ;;  %2648 = vpow2.f32 %v2349_v56  ;;  %vm2112_vm7 = vweird.f32 %v2647_v55 }
 0x96e   :  { %v2104_v14 = vsel %vm2101_vm6, %v2103_v16, %v2099_v17  ;;  %2650 = vrcp.f32 %v1965_v13  ;;  %vm2113_vm9 = vmor %vm2111_vm8, %vm2112_vm7  ;;  %v2132_v26 = vand.u32 2147483648, %v1965_v13  ;;  %v2130_v4 = vand.u32 2147483647, %v1965_v13 }
 0x96f   :  { %2219 = vst [vmem:[#allocation5 + $0x40] sm:$0xff] %v2104_v14  ;;  %v2108_v45 = vsub.f32 1.0, %v2107_v3  ;;  %vm2126_vm13 = vweird.f32 %v1965_v13 }
 0x970   :  { %v2133_v31 = vor.u32 1.1754944e-38, %v2132_v26  ;;  %vm2131_vm11 = vcmp.eq.f32.partialorder %v2130_v4, 8.507059e+37 }
 0x971   :  { %v2109_v40 = vmul.f32 %v2647_v55, %v2108_v45 }
 0x972   :  { %v1897_v54 = vpop.f32.mrf.mxu2 }
 0x973   :  { %v2649_v19 = vpop.eup %2648  ;;  %v2110_v58 = vadd.f32 %v2647_v55, %v2109_v40  ;;  %v2350_v33 = vmul.f32 -1.442695, %v1897_v54 }
 0x974   :  { %v2651_v0 = vpop.eup %2650  ;;  %v1966_v48 = vadd.f32 1.0, %v2649_v19 }
 0x975   :  { %v2114_v24 = vsel %vm2113_vm9, %v2647_v55, %v2110_v58  ;;  %v2122_v63 = vmul.f32 %v2651_v0, %v1965_v13  ;;  %2652 = vpow2.f32 %v2350_v33  ;;  %vm2127_vm12 = vweird.f32 %v2651_v0 }
 0x976   :  { %v2119_v7 = vsel %vm2116_vm10, %v2118_v62, %v2114_v24  ;;  %2654 = vrcp.f32 %v1966_v48  ;;  %vm2128_vm14 = vmor %vm2126_vm13, %vm2127_vm12  ;;  %v2147_v38 = vand.u32 2147483648, %v1966_v48  ;;  %v2145_v12 = vand.u32 2147483647, %v1966_v48 }
 0x977   :  { %2220 = vst [vmem:[#allocation5 + $0x48] sm:$0xff] %v2119_v7  ;;  %v2123_v9 = vsub.f32 1.0, %v2122_v63  ;;  %vm2141_vm0 = vweird.f32 %v1966_v48 }
 0x978   :  { %v2148_v8 = vor.u32 1.1754944e-38, %v2147_v38  ;;  %vm2146_vm2 = vcmp.eq.f32.partialorder %v2145_v12, 8.507059e+37 }
 0x979   :  { %v2124_v51 = vmul.f32 %v2651_v0, %v2123_v9 }
 0x97a   :  { %v1899_v34 = vpop.f32.mrf.mxu2 }
 0x97b   :  { %v2653_v52 = vpop.eup %2652  ;;  %v2125_v43 = vadd.f32 %v2651_v0, %v2124_v51  ;;  %v2351_v61 = vmul.f32 -1.442695, %v1899_v34 }
 0x97c   :  { %v2655_v59 = vpop.eup %2654  ;;  %v1967_v32 = vadd.f32 1.0, %v2653_v52 }
 0x97d   :  { %v2129_v44 = vsel %vm2128_vm14, %v2651_v0, %v2125_v43  ;;  %v2137_v21 = vmul.f32 %v2655_v59, %v1966_v48  ;;  %2656 = vpow2.f32 %v2351_v61  ;;  %vm2142_vm15 = vweird.f32 %v2655_v59 }
 0x97e   :  { %v2134_v1 = vsel %vm2131_vm11, %v2133_v31, %v2129_v44  ;;  %2658 = vrcp.f32 %v1967_v32  ;;  %vm2143_vm1 = vmor %vm2141_vm0, %vm2142_vm15  ;;  %v2162_v46 = vand.u32 2147483648, %v1967_v32  ;;  %v2160_v50 = vand.u32 2147483647, %v1967_v32 }
 0x97f   :  { %2221 = vst [vmem:[#allocation5 + $0x50] sm:$0xff] %v2134_v1  ;;  %v2138_v35 = vsub.f32 1.0, %v2137_v21  ;;  %vm2156_vm4 = vweird.f32 %v1967_v32 }
 0x980   :  { %v2163_v39 = vor.u32 1.1754944e-38, %v2162_v46  ;;  %vm2161_vm6 = vcmp.eq.f32.partialorder %v2160_v50, 8.507059e+37 }
 0x981   :  { %v2139_v25 = vmul.f32 %v2655_v59, %v2138_v35 }
 0x983   :  { %v2657_v47 = vpop.eup %2656  ;;  %v2140_v60 = vadd.f32 %v2655_v59, %v2139_v25 }
 0x984   :  { %v2659_v2 = vpop.eup %2658  ;;  %v1968_v42 = vadd.f32 1.0, %v2657_v47 }
 0x985   :  { %v2144_v5 = vsel %vm2143_vm1, %v2655_v59, %v2140_v60  ;;  %v2152_v23 = vmul.f32 %v2659_v2, %v1967_v32  ;;  %vm2157_vm3 = vweird.f32 %v2659_v2 }
 0x986   :  { %v2149_v27 = vsel %vm2146_vm2, %v2148_v8, %v2144_v5  ;;  %2660 = vrcp.f32 %v1968_v42  ;;  %vm2158_vm5 = vmor %vm2156_vm4, %vm2157_vm3  ;;  %v2177_v53 = vand.u32 2147483648, %v1968_v42  ;;  %v2175_v57 = vand.u32 2147483647, %v1968_v42 }
 0x987   :  { %2222 = vst [vmem:[#allocation5 + $0x58] sm:$0xff] %v2149_v27  ;;  %v2153_v29 = vsub.f32 1.0, %v2152_v23  ;;  %vm2171_vm8 = vweird.f32 %v1968_v42 }
 0x988   :  { %v2178_v36 = vor.u32 1.1754944e-38, %v2177_v53  ;;  %vm2176_vm10 = vcmp.eq.f32.partialorder %v2175_v57, 8.507059e+37 }
 0x989   :  { %v2154_v20 = vmul.f32 %v2659_v2, %v2153_v29 }
 0x98b   :  { %v2155_v49 = vadd.f32 %v2659_v2, %v2154_v20 }
 0x98c   :  { %v2661_v15 = vpop.eup %2660 }
 0x98d   :  { %v2159_v22 = vsel %vm2158_vm5, %v2659_v2, %v2155_v49  ;;  %v2167_v37 = vmul.f32 %v2661_v15, %v1968_v42  ;;  %vm2172_vm7 = vweird.f32 %v2661_v15 }
 0x98e   :  { %v2164_v30 = vsel %vm2161_vm6, %v2163_v39, %v2159_v22  ;;  %vm2173_vm9 = vmor %vm2171_vm8, %vm2172_vm7 }
 0x98f   :  { %2223 = vst [vmem:[#allocation5 + $0x60] sm:$0xff] %v2164_v30  ;;  %v2168_v18 = vsub.f32 1.0, %v2167_v37 }
 0x991   :  { %v2169_v11 = vmul.f32 %v2661_v15, %v2168_v18 }
 0x993   :  { %v2170_v41 = vadd.f32 %v2661_v15, %v2169_v11 }
 0x995   :  { %v2174_v10 = vsel %vm2173_vm9, %v2661_v15, %v2170_v41 }
 0x996   :  { %v2179_v56 = vsel %vm2176_vm10, %v2178_v36, %v2174_v10 }
 0x997   :  { %2224 = vst [vmem:[#allocation5 + $0x68] sm:$0xff] %v2179_v56 }
 0x998   :  { %2255 = dma.vmem_to_hbm [thread:$0]  %s2248_s17, 2048, %s2250_s0, [#allocation4], %s2731_s18, %s2731_s18, %s2732_s19  }
 0x999   :  { %2728 = dma.done.wait [#allocation4], 2048  }
 0x99a   :  { %2729 = vsyncadd [#allocation4], 4294965248 }
 0x99b   :  { %2264 = vsyncpa [#allocation3], 1 }
 0x99c   :  { %2265 = vsyncpa [#allocation4], 1 }

</bundles_post_ra>
